<compile_context>
chip_gen: v7x
topology: tpu7x:2x2x1
jax: 0.10.0
libtpu: 0.0.40
codegen_flags: <defaults>
</compile_context>

<pallas_src>
import functools

import jax
import jax.numpy as jnp
from jax.experimental import pallas as pl
from jax.experimental.pallas import tpu as pltpu

EPS = 1e-5  # nn.LayerNorm default eps


# ------------------------- chip-dependent configuration ------------------------

def _chip_config():
    kind = ""
    try:
        kind = jax.devices()[0].device_kind.lower()
    except Exception:
        pass
    is_v7 = "v7" in kind
    # v7x: 64 MiB VMEM / 2 TCs  -> 48 MiB scoped budget, smaller blocks, even steps
    # v5e/v6e: 128 MiB VMEM / 1 TC -> 96 MiB scoped budget, big blocks, 1 step OK
    vmem_limit = (48 if is_v7 else 96) * 1024 * 1024
    target_rows = 512 if is_v7 else 1024
    return is_v7, vmem_limit, target_rows


_IS_V7X, VMEM_LIMIT, TARGET_ROWS = _chip_config()
DUAL_CORE = _IS_V7X
_WEIGHT_PIPELINE = pl.Buffered(1) if _IS_V7X else None  # single-buffer weights on v7x


# ----------------------------- in-kernel helpers -----------------------------

def _gelu(x):
    # exact (erf) GELU, matching torch nn.GELU() / F.gelu default
    return 0.5 * x * (1.0 + jax.lax.erf(x * 0.7071067811865476))


def _layernorm(x, w, b):
    mu = jnp.mean(x, axis=-1, keepdims=True)
    var = jnp.mean(jnp.square(x - mu), axis=-1, keepdims=True)
    return (x - mu) * jax.lax.rsqrt(var + EPS) * w + b


def _proj(x3, w):
    # (nb, T, K) activation @ (K, N) bf16 weight, flattened to ONE 2-D matmul
    # with M = nb*T rows (fills the MXU), f32 accumulation.
    nb_, t, k = x3.shape
    y = jnp.dot(x3.reshape(nb_ * t, k).astype(jnp.bfloat16), w,
                preferred_element_type=jnp.float32)
    return y.reshape(nb_, t, w.shape[1])


def _bmm(a, b):
    # (G, M, K) x (G, K, N) -> (G, M, N), f32 accumulation on the MXU
    return jax.lax.dot_general(a, b, (((2,), (1,)), ((0,), (0,))),
                               preferred_element_type=jnp.float32)


def _bmm_nt(a, b):
    # (G, M, K) x (G, N, K) -> (G, M, N)
    return jax.lax.dot_general(a, b, (((2,), (2,)), ((0,), (0,))),
                               preferred_element_type=jnp.float32)


# --------------------------------- kernels -----------------------------------

def patch_embed_kernel(x_ref, w_ref, b_ref, lnw_ref, lnb_ref, pos_ref, o_ref):
    # Linear -> GELU -> LayerNorm -> + positional encoding   (dropout = identity)
    h = _proj(x_ref[...], w_ref[...]) + b_ref[...]
    h = _gelu(h)
    h = _layernorm(h, lnw_ref[...], lnb_ref[...])
    o_ref[...] = h + pos_ref[...]


def encoder_layer_kernel(x_ref,
                         nw_ref, nbias_ref,       # outer residual LayerNorm
                         ln1w_ref, ln1b_ref,      # pre-attention LayerNorm
                         wqkv_ref, bqkv_ref,      # (D, 3D) bf16, (1, 3D)
                         wo_ref, bo_ref,          # (D, D)  bf16, (1, D)
                         ln2w_ref, ln2b_ref,      # pre-FFN LayerNorm
                         w1_ref, b1_ref,          # (D, 4D) bf16, (1, 4D)
                         w2_ref, b2_ref,          # (4D, D) bf16, (1, D)
                         o_ref, *, nhead):
    # Fused ResidualTransformerEncoderLayer (norm_first=True):
    #   y0 = LN(x); y1 = y0 + out_proj(MHA(LN1(y0))); y2 = y1 + FFN(LN2(y1))
    #   out = x + y2
    x = x_ref[...]                                   # (nb, T, D) f32 residual stream
    nb_, T, D = x.shape
    dh = D // nhead
    scale = 1.0 / float(dh) ** 0.5

    y0 = _layernorm(x, nw_ref[...], nbias_ref[...])
    xn = _layernorm(y0, ln1w_ref[...], ln1b_ref[...])

    qkv = _proj(xn, wqkv_ref[...]) + bqkv_ref[...]   # (nb, T, 3D) f32
    qkv_b = qkv.astype(jnp.bfloat16)                 # cast ONCE (not per head)
    q = qkv_b[..., :D]
    k = qkv_b[..., D:2 * D]
    v = qkv_b[..., 2 * D:]

    heads = []
    for hd in range(nhead):                          # static unroll, nhead is small
        sl = slice(hd * dh, (hd + 1) * dh)
        s = _bmm_nt(q[..., sl], k[..., sl]) * scale  # (nb, T, T) f32 scores
        s = s - jnp.max(s, axis=-1, keepdims=True)
        p = jnp.exp(s)
        p = p * pl.reciprocal(jnp.sum(p, axis=-1, keepdims=True), approx=True)
        heads.append(_bmm(p.astype(jnp.bfloat16), v[..., sl]))   # (nb, T, dh) f32
    # one K=D output projection after lane-concatenating the heads
    attn = jnp.concatenate(heads, axis=-1)           # (nb, T, D)
    y1 = y0 + _proj(attn, wo_ref[...]) + bo_ref[...]

    z = _layernorm(y1, ln2w_ref[...], ln2b_ref[...])
    hmid = _gelu(_proj(z, w1_ref[...]) + b1_ref[...])
    ffn = _proj(hmid, w2_ref[...]) + b2_ref[...]
    o_ref[...] = x + y1 + ffn                        # x + (y1 + ffn)


def pool_heads_kernel(x_ref, w1_ref, b1_ref, w2_ref, b2_ref, o_ref):
    # AdaptiveAvgPool1d(1) over patches -> shared LN normalization (per-head
    # affine folded into w1/b1) -> all horizon heads as two lane-dense matmuls
    # (second weight block-diagonal, zero-padded to 128 lanes) -> one dense store.
    pooled = jnp.mean(x_ref[...], axis=1)            # (nbh, D)
    mu = jnp.mean(pooled, axis=-1, keepdims=True)
    var = jnp.mean(jnp.square(pooled - mu), axis=-1, keepdims=True)
    z = (pooled - mu) * jax.lax.rsqrt(var + EPS)
    u = _gelu(jnp.dot(z.astype(jnp.bfloat16), w1_ref[...],
                      preferred_element_type=jnp.float32) + b1_ref[...])
    o_ref[...] = jnp.dot(u.astype(jnp.bfloat16), w2_ref[...],
                         preferred_element_type=jnp.float32) + b2_ref[...]


# ------------------------------ pallas wrappers -------------------------------

def _wspec(a):
    # whole-array (weight / bias / pos) operand; single-buffered on v7x
    nd = a.ndim
    if _WEIGHT_PIPELINE is None:
        return pl.BlockSpec(a.shape, lambda *_: (0,) * nd)
    return pl.BlockSpec(a.shape, lambda *_: (0,) * nd,
                        pipeline_mode=_WEIGHT_PIPELINE)


def _cparams():
    return pltpu.CompilerParams(dimension_semantics=("parallel",),
                                vmem_limit_bytes=VMEM_LIMIT)


def _pick_seq_block(N, T, *, target_rows, dual_core):
    """Sequences per grid step: ~target_rows token rows per step and an exact
    divisor of N (no partial blocks).  On 2-TC chips (v7x) keep >=2 grid steps
    and prefer an even step count so neither core sits idle."""
    nb = max(1, min(N, target_rows // max(T, 1)))
    if dual_core and N >= 2:
        nb = min(nb, N // 2)
    while N % nb != 0:
        nb -= 1
    if dual_core and N % 2 == 0 and (N // nb) % 2 != 0:
        cand = nb
        while cand >= 1 and (N % cand != 0 or (N // cand) % 2 != 0):
            cand -= 1
        if cand >= 1:
            nb = cand
    return nb


def _pick_row_block(N, *, target, dual_core):
    """Row block for the 2-D head output: multiple of 8 (or the full extent)."""
    if dual_core and N >= 16:
        target = min(target, max(8, N // 2))
    if N <= target or N % 8 != 0:
        return N
    nbh = (target // 8) * 8
    while N % nbh != 0:
        nbh -= 8
    return nbh


def patch_embed(patches, pe_w, pe_b, lnw, lnb, pos, *, nb):
    N, T, PF = patches.shape
    D = pe_w.shape[1]
    return pl.pallas_call(
        patch_embed_kernel,
        out_shape=jax.ShapeDtypeStruct((N, T, D), jnp.float32),
        grid=(pl.cdiv(N, nb),),
        in_specs=[pl.BlockSpec((nb, T, PF), lambda i: (i, 0, 0)),
                  _wspec(pe_w), _wspec(pe_b), _wspec(lnw), _wspec(lnb), _wspec(pos)],
        out_specs=pl.BlockSpec((nb, T, D), lambda i: (i, 0, 0)),
        compiler_params=_cparams(),
    )(patches, pe_w, pe_b, lnw, lnb, pos)


def encoder_layer(h, lp, *, nhead, nb):
    N, T, D = h.shape
    weights = (lp["norm_w"], lp["norm_b"], lp["ln1_w"], lp["ln1_b"],
               lp["wqkv"], lp["bqkv"], lp["wo"], lp["bo"],
               lp["ln2_w"], lp["ln2_b"],
               lp["w1"], lp["b1"], lp["w2"], lp["b2"])
    return pl.pallas_call(
        functools.partial(encoder_layer_kernel, nhead=nhead),
        out_shape=jax.ShapeDtypeStruct((N, T, D), jnp.float32),
        grid=(pl.cdiv(N, nb),),
        in_specs=[pl.BlockSpec((nb, T, D), lambda i: (i, 0, 0))]
                 + [_wspec(w) for w in weights],
        out_specs=pl.BlockSpec((nb, T, D), lambda i: (i, 0, 0)),
        compiler_params=_cparams(),
    )(h, *weights)


def pool_heads(h, w1_all, b1_all, w2_all, b2_all, *, nbh):
    N, T, D = h.shape
    HQp = w2_all.shape[1]                       # padded to a multiple of 128
    return pl.pallas_call(
        pool_heads_kernel,
        out_shape=jax.ShapeDtypeStruct((N, HQp), jnp.float32),
        grid=(pl.cdiv(N, nbh),),
        in_specs=[pl.BlockSpec((nbh, T, D), lambda i: (i, 0, 0)),
                  _wspec(w1_all), _wspec(b1_all), _wspec(w2_all), _wspec(b2_all)],
        out_specs=pl.BlockSpec((nbh, HQp), lambda i: (i, 0)),
        compiler_params=_cparams(),
    )(h, w1_all, b1_all, w2_all, b2_all)


# --------------------------------- parameters ---------------------------------

def init_params(key, cfg):
    F, P, D = cfg["num_features"], cfg["patch_size"], cfg["d_model"]
    Tmax = cfg["seq_len"] // P
    Q, H = cfg["num_quantiles"], cfg["num_horizons"]
    D2, DF = D // 2, 4 * D

    def nrm(k, shape, scale=0.02):
        return (scale * jax.random.normal(k, shape)).astype(jnp.float32)

    ones = lambda n: jnp.ones((1, n), jnp.float32)
    zeros = lambda n: jnp.zeros((1, n), jnp.float32)

    keys = iter(jax.random.split(key, 64))
    params = {
        "pe_w": nrm(next(keys), (F * P, D)), "pe_b": zeros(D),
        "pe_lnw": ones(D), "pe_lnb": zeros(D),
        "pos": nrm(next(keys), (1, Tmax, D)),
        "layers": [], "heads": [],
    }
    for _ in range(cfg["num_layers"]):
        params["layers"].append({
            "norm_w": ones(D), "norm_b": zeros(D),          # outer residual norm
            "ln1_w": ones(D), "ln1_b": zeros(D),            # pre-attention norm
            "wqkv": nrm(next(keys), (D, 3 * D)), "bqkv": zeros(3 * D),
            "wo": nrm(next(keys), (D, D)), "bo": zeros(D),
            "ln2_w": ones(D), "ln2_b": zeros(D),            # pre-FFN norm
            "w1": nrm(next(keys), (D, DF)), "b1": zeros(DF),
            "w2": nrm(next(keys), (DF, D)), "b2": zeros(D),
        })
    for _ in range(H):
        params["heads"].append({
            "lnw": ones(D), "lnb": zeros(D),
            "w1": nrm(next(keys), (D, D2)), "b1": zeros(D2),
            "w2": nrm(next(keys), (D2, Q)), "b2": zeros(Q),
        })
    return params


def prepare_params(params, cfg):
    """One-time preparation (outside the per-forward graph): cast matmul weights
    to bf16, fold each head's LayerNorm affine into its first Linear, stack all
    heads into lane-dense weights (block-diagonal second matmul) and zero-pad
    the head output to a multiple of 128 lanes."""
    bf16 = jnp.bfloat16
    D = cfg["d_model"]
    Q, H = cfg["num_quantiles"], cfg["num_horizons"]
    D2 = D // 2

    prep = {
        "pe_w": params["pe_w"].astype(bf16), "pe_b": params["pe_b"],
        "pe_lnw": params["pe_lnw"], "pe_lnb": params["pe_lnb"],
        "pos": params["pos"],
        "layers": [],
    }
    for lp in params["layers"]:
        nl = dict(lp)
        nl["wqkv"] = lp["wqkv"].astype(bf16)
        nl["wo"] = lp["wo"].astype(bf16)
        nl["w1"] = lp["w1"].astype(bf16)
        nl["w2"] = lp["w2"].astype(bf16)
        prep["layers"].append(nl)

    HQ = H * Q
    HQp = ((HQ + 127) // 128) * 128 if HQ % 128 else HQ
    HQp = max(HQp, 128)
    W1_cols, B1_cols = [], []
    W2_bd = jnp.zeros((H * D2, HQp), jnp.float32)
    B2_all = jnp.zeros((1, HQp), jnp.float32)
    for i, hp in enumerate(params["heads"]):
        lnw = hp["lnw"].reshape(D, 1)
        lnb = hp["lnb"].reshape(1, D)
        W1_cols.append(lnw * hp["w1"])                         # (D, D2)
        B1_cols.append(hp["b1"] + lnb @ hp["w1"])              # (1, D2)
        W2_bd = W2_bd.at[i * D2:(i + 1) * D2, i * Q:(i + 1) * Q].set(hp["w2"])
        B2_all = B2_all.at[:, i * Q:(i + 1) * Q].set(hp["b2"])
    prep["head_w1"] = jnp.concatenate(W1_cols, axis=1).astype(bf16)   # (D, H*D2)
    prep["head_b1"] = jnp.concatenate(B1_cols, axis=1)                # (1, H*D2)
    prep["head_w2"] = W2_bd.astype(bf16)                              # (H*D2, HQp)
    prep["head_b2"] = B2_all                                          # (1, HQp)
    return prep


# ---------------------------------- forward -----------------------------------

def quantile_transformer_forward(x, prep, cfg):
    """x: [B, L, S, F]  ->  predictions [B, S, Q, H]"""
    B, L, S, F = x.shape
    P, D = cfg["patch_size"], cfg["d_model"]
    nhead, Q, H = cfg["n_heads"], cfg["num_quantiles"], cfg["num_horizons"]

    usable = (L // P) * P          # same truncation as the PyTorch reference
    T = usable // P
    N = B * S

    # glue: permute/reshape into patch tokens [N, T, P*F] (free in HBM)
    xs = jnp.transpose(x, (0, 2, 1, 3)).reshape(N, L, F)[:, :usable, :]
    patches = xs.reshape(N, T, P * F).astype(jnp.float32)

    nb = _pick_seq_block(N, T, target_rows=TARGET_ROWS, dual_core=DUAL_CORE)

    # patch embedding (Linear+GELU+LayerNorm) with positional encoding fused in
    h = patch_embed(patches, prep["pe_w"], prep["pe_b"],
                    prep["pe_lnw"], prep["pe_lnb"],
                    prep["pos"][:, :T, :], nb=nb)

    # encoder: each ResidualTransformerEncoderLayer is ONE fused pallas_call
    for lp in prep["layers"]:
        h = encoder_layer(h, lp, nhead=nhead, nb=nb)

    # mean-pool + all horizon heads fused into one kernel (lane-dense output)
    nbh = _pick_row_block(N, target=TARGET_ROWS, dual_core=DUAL_CORE)
    out = pool_heads(h, prep["head_w1"], prep["head_b1"],
                     prep["head_w2"], prep["head_b2"], nbh=nbh)   # (N, HQp)
    out = out[:, :H * Q]                                          # strip lane padding
    out = out.reshape(B, S, H, Q)
    return jnp.transpose(out, (0, 1, 3, 2))                       # [B, S, Q, H]


# ----------------------------------- main --------------------------------------

if __name__ == "__main__":
    cfg = dict(seq_len=8, num_stocks=4, num_features=4, patch_size=2,
               d_model=32, n_heads=4, num_layers=2, dropout=0.0,
               num_quantiles=3, num_horizons=3)
    B = 2

    key = jax.random.PRNGKey(0)
    kx, kp = jax.random.split(key)
    x = jax.random.normal(
        kx, (B, cfg["seq_len"], cfg["num_stocks"], cfg["num_features"]), jnp.float32)
    params = init_params(kp, cfg)
    prep = prepare_params(params, cfg)     # one-time bf16 cast / head fusion

    fwd = jax.jit(lambda xx, pp: quantile_transformer_forward(xx, pp, cfg))
    out = fwd(x, prep)
    jax.block_until_ready(out)

    expected = (B, cfg["num_stocks"], cfg["num_quantiles"], cfg["num_horizons"])
    assert out.shape == expected, (out.shape, expected)
    assert bool(jnp.all(jnp.isfinite(out)))
    print("KERNEL_OK")
</pallas_src>

<mosaic_0001>
module attributes {stable_mosaic.version = 11 : i64} {
  func.func @patch_embed_kernel(%arg0: i32, %arg1: memref<8x4x8xf32, #tpu.memory_space<vmem>>, %arg2: memref<8x32xbf16, #tpu.memory_space<vmem>>, %arg3: memref<1x32xf32, #tpu.memory_space<vmem>>, %arg4: memref<1x32xf32, #tpu.memory_space<vmem>>, %arg5: memref<1x32xf32, #tpu.memory_space<vmem>>, %arg6: memref<1x4x32xf32, #tpu.memory_space<vmem>>, %arg7: memref<8x4x32xf32, #tpu.memory_space<vmem>>) attributes {dimension_semantics = [#tpu.dimension_semantics<parallel>], iteration_bounds = array<i64: 1>, scalar_prefetch = 0 : i64, scratch_operands = 0 : i64, tpu.core_type = #tpu.core_type<tc>, window_params = [{transform_indices = @transform_0, window_bounds = array<i64: 8, 4, 8>}, {pipeline_mode = #tpu.pipeline_mode<synchronous>, transform_indices = @transform_1, window_bounds = array<i64: 8, 32>}, {pipeline_mode = #tpu.pipeline_mode<synchronous>, transform_indices = @transform_2, window_bounds = array<i64: 1, 32>}, {pipeline_mode = #tpu.pipeline_mode<synchronous>, transform_indices = @transform_3, window_bounds = array<i64: 1, 32>}, {pipeline_mode = #tpu.pipeline_mode<synchronous>, transform_indices = @transform_4, window_bounds = array<i64: 1, 32>}, {pipeline_mode = #tpu.pipeline_mode<synchronous>, transform_indices = @transform_5, window_bounds = array<i64: 1, 4, 32>}, {transform_indices = @transform_6, window_bounds = array<i64: 8, 4, 32>}]} {
    %c0 = arith.constant 0 : index
    %c0_0 = arith.constant 0 : index
    %c0_1 = arith.constant 0 : index
    %0 = vector.load %arg1[%c0, %c0_0, %c0_1] : memref<8x4x8xf32, #tpu.memory_space<vmem>>, vector<8x4x8xf32>
    %c0_2 = arith.constant 0 : index
    %c0_3 = arith.constant 0 : index
    %1 = vector.load %arg2[%c0_2, %c0_3] : memref<8x32xbf16, #tpu.memory_space<vmem>>, vector<8x32xbf16>
    %2 = vector.shape_cast %0 : vector<8x4x8xf32> to vector<32x8xf32>
    %3 = arith.truncf %2 : vector<32x8xf32> to vector<32x8xbf16>
    %cst = arith.constant dense<0.000000e+00> : vector<32x32xf32>
    %4 = tpu.matmul %3, %1, %cst {dimension_numbers = #tpu.dot_dimension_numbers<[1], [0], [0], [1], [0, 0, 1, 1], [], []>} : vector<32x8xbf16>, vector<8x32xbf16>, vector<32x32xf32> -> vector<32x32xf32>
    %5 = vector.shape_cast %4 : vector<32x32xf32> to vector<8x4x32xf32>
    %c0_4 = arith.constant 0 : index
    %c0_5 = arith.constant 0 : index
    %6 = vector.load %arg3[%c0_4, %c0_5] : memref<1x32xf32, #tpu.memory_space<vmem>>, vector<1x32xf32>
    %7 = vector.shape_cast %6 : vector<1x32xf32> to vector<1x1x32xf32>
    %8 = vector.broadcast %7 : vector<1x1x32xf32> to vector<8x4x32xf32>
    %9 = arith.addf %5, %8 : vector<8x4x32xf32>
    %cst_6 = arith.constant 5.000000e-01 : f32
    %10 = vector.broadcast %cst_6 : f32 to vector<8x4x32xf32>
    %11 = arith.mulf %10, %9 : vector<8x4x32xf32>
    %cst_7 = arith.constant 0.707106769 : f32
    %12 = vector.broadcast %cst_7 : f32 to vector<8x4x32xf32>
    %13 = arith.mulf %9, %12 : vector<8x4x32xf32>
    %14 = math.erf %13 : vector<8x4x32xf32>
    %cst_8 = arith.constant 1.000000e+00 : f32
    %15 = vector.broadcast %cst_8 : f32 to vector<8x4x32xf32>
    %16 = arith.addf %15, %14 : vector<8x4x32xf32>
    %17 = arith.mulf %11, %16 : vector<8x4x32xf32>
    %c0_9 = arith.constant 0 : index
    %c0_10 = arith.constant 0 : index
    %18 = vector.load %arg4[%c0_9, %c0_10] : memref<1x32xf32, #tpu.memory_space<vmem>>, vector<1x32xf32>
    %c0_11 = arith.constant 0 : index
    %c0_12 = arith.constant 0 : index
    %19 = vector.load %arg5[%c0_11, %c0_12] : memref<1x32xf32, #tpu.memory_space<vmem>>, vector<1x32xf32>
    %cst_13 = arith.constant dense<0.000000e+00> : vector<8x4xf32>
    %20 = vector.multi_reduction <add>, %17, %cst_13 [2] : vector<8x4x32xf32> to vector<8x4xf32>
    %21 = vector.shape_cast %20 : vector<8x4xf32> to vector<8x4x1xf32>
    %cst_14 = arith.constant 3.200000e+01 : f32
    %22 = vector.broadcast %cst_14 : f32 to vector<8x4x1xf32>
    %23 = arith.divf %21, %22 : vector<8x4x1xf32>
    %24 = vector.broadcast %23 : vector<8x4x1xf32> to vector<8x4x32xf32>
    %25 = arith.subf %17, %24 : vector<8x4x32xf32>
    %26 = arith.mulf %25, %25 : vector<8x4x32xf32>
    %cst_15 = arith.constant dense<0.000000e+00> : vector<8x4xf32>
    %27 = vector.multi_reduction <add>, %26, %cst_15 [2] : vector<8x4x32xf32> to vector<8x4xf32>
    %28 = vector.shape_cast %27 : vector<8x4xf32> to vector<8x4x1xf32>
    %cst_16 = arith.constant 3.200000e+01 : f32
    %29 = vector.broadcast %cst_16 : f32 to vector<8x4x1xf32>
    %30 = arith.divf %28, %29 : vector<8x4x1xf32>
    %31 = vector.broadcast %23 : vector<8x4x1xf32> to vector<8x4x32xf32>
    %32 = arith.subf %17, %31 : vector<8x4x32xf32>
    %cst_17 = arith.constant 9.99999974E-6 : f32
    %33 = vector.broadcast %cst_17 : f32 to vector<8x4x1xf32>
    %34 = arith.addf %30, %33 : vector<8x4x1xf32>
    %35 = math.rsqrt %34 : vector<8x4x1xf32>
    %36 = vector.broadcast %35 : vector<8x4x1xf32> to vector<8x4x32xf32>
    %37 = arith.mulf %32, %36 : vector<8x4x32xf32>
    %38 = vector.shape_cast %18 : vector<1x32xf32> to vector<1x1x32xf32>
    %39 = vector.broadcast %38 : vector<1x1x32xf32> to vector<8x4x32xf32>
    %40 = arith.mulf %37, %39 : vector<8x4x32xf32>
    %41 = vector.shape_cast %19 : vector<1x32xf32> to vector<1x1x32xf32>
    %42 = vector.broadcast %41 : vector<1x1x32xf32> to vector<8x4x32xf32>
    %43 = arith.addf %40, %42 : vector<8x4x32xf32>
    %c0_18 = arith.constant 0 : index
    %c0_19 = arith.constant 0 : index
    %c0_20 = arith.constant 0 : index
    %44 = vector.load %arg6[%c0_18, %c0_19, %c0_20] : memref<1x4x32xf32, #tpu.memory_space<vmem>>, vector<1x4x32xf32>
    %45 = vector.broadcast %44 : vector<1x4x32xf32> to vector<8x4x32xf32>
    %46 = arith.addf %43, %45 : vector<8x4x32xf32>
    %c0_21 = arith.constant 0 : index
    %c0_22 = arith.constant 0 : index
    %c0_23 = arith.constant 0 : index
    %47 = vector.load %arg7[%c0_21, %c0_22, %c0_23] : memref<8x4x32xf32, #tpu.memory_space<vmem>>, vector<8x4x32xf32>
    tpu.vector_store %arg7[%c0_21, %c0_22, %c0_23], %46 {strides = array<i32>} : memref<8x4x32xf32, #tpu.memory_space<vmem>>, vector<8x4x32xf32>,
    return
  }
  func.func @transform_0(%arg0: i32) -> (i32, i32, i32) {
    %c0_i32 = arith.constant 0 : i32
    %c0_i32_0 = arith.constant 0 : i32
    %c0_i32_1 = arith.constant 0 : i32
    return %arg0, %c0_i32, %c0_i32_0 : i32, i32, i32
  }
  func.func @transform_1(%arg0: i32) -> (i32, i32) {
    %c0_i32 = arith.constant 0 : i32
    %c0_i32_0 = arith.constant 0 : i32
    %c0_i32_1 = arith.constant 0 : i32
    return %c0_i32, %c0_i32_0 : i32, i32
  }
  func.func @transform_2(%arg0: i32) -> (i32, i32) {
    %c0_i32 = arith.constant 0 : i32
    %c0_i32_0 = arith.constant 0 : i32
    %c0_i32_1 = arith.constant 0 : i32
    return %c0_i32, %c0_i32_0 : i32, i32
  }
  func.func @transform_3(%arg0: i32) -> (i32, i32) {
    %c0_i32 = arith.constant 0 : i32
    %c0_i32_0 = arith.constant 0 : i32
    %c0_i32_1 = arith.constant 0 : i32
    return %c0_i32, %c0_i32_0 : i32, i32
  }
  func.func @transform_4(%arg0: i32) -> (i32, i32) {
    %c0_i32 = arith.constant 0 : i32
    %c0_i32_0 = arith.constant 0 : i32
    %c0_i32_1 = arith.constant 0 : i32
    return %c0_i32, %c0_i32_0 : i32, i32
  }
  func.func @transform_5(%arg0: i32) -> (i32, i32, i32) {
    %c0_i32 = arith.constant 0 : i32
    %c0_i32_0 = arith.constant 0 : i32
    %c0_i32_1 = arith.constant 0 : i32
    %c0_i32_2 = arith.constant 0 : i32
    return %c0_i32, %c0_i32_0, %c0_i32_1 : i32, i32, i32
  }
  func.func @transform_6(%arg0: i32) -> (i32, i32, i32) {
    %c0_i32 = arith.constant 0 : i32
    %c0_i32_0 = arith.constant 0 : i32
    %c0_i32_1 = arith.constant 0 : i32
    return %arg0, %c0_i32, %c0_i32_0 : i32, i32, i32
  }
}

module attributes {stable_mosaic.version = 11 : i64} {
  func.func @encoder_layer_kernel(%arg0: i32, %arg1: memref<8x4x32xf32, #tpu.memory_space<vmem>>, %arg2: memref<1x32xf32, #tpu.memory_space<vmem>>, %arg3: memref<1x32xf32, #tpu.memory_space<vmem>>, %arg4: memref<1x32xf32, #tpu.memory_space<vmem>>, %arg5: memref<1x32xf32, #tpu.memory_space<vmem>>, %arg6: memref<32x96xbf16, #tpu.memory_space<vmem>>, %arg7: memref<1x96xf32, #tpu.memory_space<vmem>>, %arg8: memref<32x32xbf16, #tpu.memory_space<vmem>>, %arg9: memref<1x32xf32, #tpu.memory_space<vmem>>, %arg10: memref<1x32xf32, #tpu.memory_space<vmem>>, %arg11: memref<1x32xf32, #tpu.memory_space<vmem>>, %arg12: memref<32x128xbf16, #tpu.memory_space<vmem>>, %arg13: memref<1x128xf32, #tpu.memory_space<vmem>>, %arg14: memref<128x32xbf16, #tpu.memory_space<vmem>>, %arg15: memref<1x32xf32, #tpu.memory_space<vmem>>, %arg16: memref<8x4x32xf32, #tpu.memory_space<vmem>>) attributes {dimension_semantics = [#tpu.dimension_semantics<parallel>], iteration_bounds = array<i64: 1>, scalar_prefetch = 0 : i64, scratch_operands = 0 : i64, tpu.core_type = #tpu.core_type<tc>, window_params = [{transform_indices = @transform_0, window_bounds = array<i64: 8, 4, 32>}, {pipeline_mode = #tpu.pipeline_mode<synchronous>, transform_indices = @transform_1, window_bounds = array<i64: 1, 32>}, {pipeline_mode = #tpu.pipeline_mode<synchronous>, transform_indices = @transform_2, window_bounds = array<i64: 1, 32>}, {pipeline_mode = #tpu.pipeline_mode<synchronous>, transform_indices = @transform_3, window_bounds = array<i64: 1, 32>}, {pipeline_mode = #tpu.pipeline_mode<synchronous>, transform_indices = @transform_4, window_bounds = array<i64: 1, 32>}, {pipeline_mode = #tpu.pipeline_mode<synchronous>, transform_indices = @transform_5, window_bounds = array<i64: 32, 96>}, {pipeline_mode = #tpu.pipeline_mode<synchronous>, transform_indices = @transform_6, window_bounds = array<i64: 1, 96>}, {pipeline_mode = #tpu.pipeline_mode<synchronous>, transform_indices = @transform_7, window_bounds = array<i64: 32, 32>}, {pipeline_mode = #tpu.pipeline_mode<synchronous>, transform_indices = @transform_8, window_bounds = array<i64: 1, 32>}, {pipeline_mode = #tpu.pipeline_mode<synchronous>, transform_indices = @transform_9, window_bounds = array<i64: 1, 32>}, {pipeline_mode = #tpu.pipeline_mode<synchronous>, transform_indices = @transform_10, window_bounds = array<i64: 1, 32>}, {pipeline_mode = #tpu.pipeline_mode<synchronous>, transform_indices = @transform_11, window_bounds = array<i64: 32, 128>}, {pipeline_mode = #tpu.pipeline_mode<synchronous>, transform_indices = @transform_12, window_bounds = array<i64: 1, 128>}, {pipeline_mode = #tpu.pipeline_mode<synchronous>, transform_indices = @transform_13, window_bounds = array<i64: 128, 32>}, {pipeline_mode = #tpu.pipeline_mode<synchronous>, transform_indices = @transform_14, window_bounds = array<i64: 1, 32>}, {transform_indices = @transform_15, window_bounds = array<i64: 8, 4, 32>}]} {
    %c0 = arith.constant 0 : index
    %c0_0 = arith.constant 0 : index
    %c0_1 = arith.constant 0 : index
    %0 = vector.load %arg1[%c0, %c0_0, %c0_1] : memref<8x4x32xf32, #tpu.memory_space<vmem>>, vector<8x4x32xf32>
    %c0_2 = arith.constant 0 : index
    %c0_3 = arith.constant 0 : index
    %1 = vector.load %arg2[%c0_2, %c0_3] : memref<1x32xf32, #tpu.memory_space<vmem>>, vector<1x32xf32>
    %c0_4 = arith.constant 0 : index
    %c0_5 = arith.constant 0 : index
    %2 = vector.load %arg3[%c0_4, %c0_5] : memref<1x32xf32, #tpu.memory_space<vmem>>, vector<1x32xf32>
    %cst = arith.constant dense<0.000000e+00> : vector<8x4xf32>
    %3 = vector.multi_reduction <add>, %0, %cst [2] : vector<8x4x32xf32> to vector<8x4xf32>
    %4 = vector.shape_cast %3 : vector<8x4xf32> to vector<8x4x1xf32>
    %cst_6 = arith.constant 3.200000e+01 : f32
    %5 = vector.broadcast %cst_6 : f32 to vector<8x4x1xf32>
    %6 = arith.divf %4, %5 : vector<8x4x1xf32>
    %7 = vector.broadcast %6 : vector<8x4x1xf32> to vector<8x4x32xf32>
    %8 = arith.subf %0, %7 : vector<8x4x32xf32>
    %9 = arith.mulf %8, %8 : vector<8x4x32xf32>
    %cst_7 = arith.constant dense<0.000000e+00> : vector<8x4xf32>
    %10 = vector.multi_reduction <add>, %9, %cst_7 [2] : vector<8x4x32xf32> to vector<8x4xf32>
    %11 = vector.shape_cast %10 : vector<8x4xf32> to vector<8x4x1xf32>
    %cst_8 = arith.constant 3.200000e+01 : f32
    %12 = vector.broadcast %cst_8 : f32 to vector<8x4x1xf32>
    %13 = arith.divf %11, %12 : vector<8x4x1xf32>
    %14 = vector.broadcast %6 : vector<8x4x1xf32> to vector<8x4x32xf32>
    %15 = arith.subf %0, %14 : vector<8x4x32xf32>
    %cst_9 = arith.constant 9.99999974E-6 : f32
    %16 = vector.broadcast %cst_9 : f32 to vector<8x4x1xf32>
    %17 = arith.addf %13, %16 : vector<8x4x1xf32>
    %18 = math.rsqrt %17 : vector<8x4x1xf32>
    %19 = vector.broadcast %18 : vector<8x4x1xf32> to vector<8x4x32xf32>
    %20 = arith.mulf %15, %19 : vector<8x4x32xf32>
    %21 = vector.shape_cast %1 : vector<1x32xf32> to vector<1x1x32xf32>
    %22 = vector.broadcast %21 : vector<1x1x32xf32> to vector<8x4x32xf32>
    %23 = arith.mulf %20, %22 : vector<8x4x32xf32>
    %24 = vector.shape_cast %2 : vector<1x32xf32> to vector<1x1x32xf32>
    %25 = vector.broadcast %24 : vector<1x1x32xf32> to vector<8x4x32xf32>
    %26 = arith.addf %23, %25 : vector<8x4x32xf32>
    %c0_10 = arith.constant 0 : index
    %c0_11 = arith.constant 0 : index
    %27 = vector.load %arg4[%c0_10, %c0_11] : memref<1x32xf32, #tpu.memory_space<vmem>>, vector<1x32xf32>
    %c0_12 = arith.constant 0 : index
    %c0_13 = arith.constant 0 : index
    %28 = vector.load %arg5[%c0_12, %c0_13] : memref<1x32xf32, #tpu.memory_space<vmem>>, vector<1x32xf32>
    %cst_14 = arith.constant dense<0.000000e+00> : vector<8x4xf32>
    %29 = vector.multi_reduction <add>, %26, %cst_14 [2] : vector<8x4x32xf32> to vector<8x4xf32>
    %30 = vector.shape_cast %29 : vector<8x4xf32> to vector<8x4x1xf32>
    %cst_15 = arith.constant 3.200000e+01 : f32
    %31 = vector.broadcast %cst_15 : f32 to vector<8x4x1xf32>
    %32 = arith.divf %30, %31 : vector<8x4x1xf32>
    %33 = vector.broadcast %32 : vector<8x4x1xf32> to vector<8x4x32xf32>
    %34 = arith.subf %26, %33 : vector<8x4x32xf32>
    %35 = arith.mulf %34, %34 : vector<8x4x32xf32>
    %cst_16 = arith.constant dense<0.000000e+00> : vector<8x4xf32>
    %36 = vector.multi_reduction <add>, %35, %cst_16 [2] : vector<8x4x32xf32> to vector<8x4xf32>
    %37 = vector.shape_cast %36 : vector<8x4xf32> to vector<8x4x1xf32>
    %cst_17 = arith.constant 3.200000e+01 : f32
    %38 = vector.broadcast %cst_17 : f32 to vector<8x4x1xf32>
    %39 = arith.divf %37, %38 : vector<8x4x1xf32>
    %40 = vector.broadcast %32 : vector<8x4x1xf32> to vector<8x4x32xf32>
    %41 = arith.subf %26, %40 : vector<8x4x32xf32>
    %cst_18 = arith.constant 9.99999974E-6 : f32
    %42 = vector.broadcast %cst_18 : f32 to vector<8x4x1xf32>
    %43 = arith.addf %39, %42 : vector<8x4x1xf32>
    %44 = math.rsqrt %43 : vector<8x4x1xf32>
    %45 = vector.broadcast %44 : vector<8x4x1xf32> to vector<8x4x32xf32>
    %46 = arith.mulf %41, %45 : vector<8x4x32xf32>
    %47 = vector.shape_cast %27 : vector<1x32xf32> to vector<1x1x32xf32>
    %48 = vector.broadcast %47 : vector<1x1x32xf32> to vector<8x4x32xf32>
    %49 = arith.mulf %46, %48 : vector<8x4x32xf32>
    %50 = vector.shape_cast %28 : vector<1x32xf32> to vector<1x1x32xf32>
    %51 = vector.broadcast %50 : vector<1x1x32xf32> to vector<8x4x32xf32>
    %52 = arith.addf %49, %51 : vector<8x4x32xf32>
    %c0_19 = arith.constant 0 : index
    %c0_20 = arith.constant 0 : index
    %53 = vector.load %arg6[%c0_19, %c0_20] : memref<32x96xbf16, #tpu.memory_space<vmem>>, vector<32x96xbf16>
    %54 = vector.shape_cast %52 : vector<8x4x32xf32> to vector<32x32xf32>
    %55 = arith.truncf %54 : vector<32x32xf32> to vector<32x32xbf16>
    %cst_21 = arith.constant dense<0.000000e+00> : vector<32x96xf32>
    %56 = tpu.matmul %55, %53, %cst_21 {dimension_numbers = #tpu.dot_dimension_numbers<[1], [0], [0], [1], [0, 0, 1, 1], [], []>} : vector<32x32xbf16>, vector<32x96xbf16>, vector<32x96xf32> -> vector<32x96xf32>
    %57 = vector.shape_cast %56 : vector<32x96xf32> to vector<8x4x96xf32>
    %c0_22 = arith.constant 0 : index
    %c0_23 = arith.constant 0 : index
    %58 = vector.load %arg7[%c0_22, %c0_23] : memref<1x96xf32, #tpu.memory_space<vmem>>, vector<1x96xf32>
    %59 = vector.shape_cast %58 : vector<1x96xf32> to vector<1x1x96xf32>
    %60 = vector.broadcast %59 : vector<1x1x96xf32> to vector<8x4x96xf32>
    %61 = arith.addf %57, %60 : vector<8x4x96xf32>
    %62 = arith.truncf %61 : vector<8x4x96xf32> to vector<8x4x96xbf16>
    %63 = vector.extract_strided_slice %62 {offsets = [0, 0, 0], sizes = [8, 4, 32], strides = [1, 1, 1]} : vector<8x4x96xbf16> to vector<8x4x32xbf16>
    %64 = vector.extract_strided_slice %62 {offsets = [0, 0, 32], sizes = [8, 4, 32], strides = [1, 1, 1]} : vector<8x4x96xbf16> to vector<8x4x32xbf16>
    %65 = vector.extract_strided_slice %62 {offsets = [0, 0, 64], sizes = [8, 4, 32], strides = [1, 1, 1]} : vector<8x4x96xbf16> to vector<8x4x32xbf16>
    %66 = vector.extract_strided_slice %63 {offsets = [0, 0, 0], sizes = [8, 4, 8], strides = [1, 1, 1]} : vector<8x4x32xbf16> to vector<8x4x8xbf16>
    %67 = vector.extract_strided_slice %64 {offsets = [0, 0, 0], sizes = [8, 4, 8], strides = [1, 1, 1]} : vector<8x4x32xbf16> to vector<8x4x8xbf16>
    %cst_24 = arith.constant dense<0.000000e+00> : vector<8x4x4xf32>
    %68 = tpu.matmul %66, %67, %cst_24 {dimension_numbers = #tpu.dot_dimension_numbers<[2], [2], [1], [1], [0, 0, 0, 1, 1, 1], [0], [0]>} : vector<8x4x8xbf16>, vector<8x4x8xbf16>, vector<8x4x4xf32> -> vector<8x4x4xf32>
    %cst_25 = arith.constant 0.353553385 : f32
    %69 = vector.broadcast %cst_25 : f32 to vector<8x4x4xf32>
    %70 = arith.mulf %68, %69 : vector<8x4x4xf32>
    %cst_26 = arith.constant dense<0xFF800000> : vector<8x4xf32>
    %71 = vector.multi_reduction <maximumf>, %70, %cst_26 [2] : vector<8x4x4xf32> to vector<8x4xf32>
    %72 = vector.shape_cast %71 : vector<8x4xf32> to vector<8x4x1xf32>
    %73 = vector.broadcast %72 : vector<8x4x1xf32> to vector<8x4x4xf32>
    %74 = arith.subf %70, %73 : vector<8x4x4xf32>
    %75 = math.exp %74 : vector<8x4x4xf32>
    %cst_27 = arith.constant dense<0.000000e+00> : vector<8x4xf32>
    %76 = vector.multi_reduction <add>, %75, %cst_27 [2] : vector<8x4x4xf32> to vector<8x4xf32>
    %77 = vector.shape_cast %76 : vector<8x4xf32> to vector<8x4x1xf32>
    %78 = tpu.reciprocal %77 {approx = true} : vector<8x4x1xf32> -> vector<8x4x1xf32>
    %79 = vector.broadcast %78 : vector<8x4x1xf32> to vector<8x4x4xf32>
    %80 = arith.mulf %75, %79 : vector<8x4x4xf32>
    %81 = arith.truncf %80 : vector<8x4x4xf32> to vector<8x4x4xbf16>
    %82 = vector.extract_strided_slice %65 {offsets = [0, 0, 0], sizes = [8, 4, 8], strides = [1, 1, 1]} : vector<8x4x32xbf16> to vector<8x4x8xbf16>
    %cst_28 = arith.constant dense<0.000000e+00> : vector<8x4x8xf32>
    %83 = tpu.matmul %81, %82, %cst_28 {dimension_numbers = #tpu.dot_dimension_numbers<[2], [1], [1], [2], [0, 0, 0, 1, 1, 2], [0], [0]>} : vector<8x4x4xbf16>, vector<8x4x8xbf16>, vector<8x4x8xf32> -> vector<8x4x8xf32>
    %84 = vector.extract_strided_slice %63 {offsets = [0, 0, 8], sizes = [8, 4, 8], strides = [1, 1, 1]} : vector<8x4x32xbf16> to vector<8x4x8xbf16>
    %85 = vector.extract_strided_slice %64 {offsets = [0, 0, 8], sizes = [8, 4, 8], strides = [1, 1, 1]} : vector<8x4x32xbf16> to vector<8x4x8xbf16>
    %cst_29 = arith.constant dense<0.000000e+00> : vector<8x4x4xf32>
    %86 = tpu.matmul %84, %85, %cst_29 {dimension_numbers = #tpu.dot_dimension_numbers<[2], [2], [1], [1], [0, 0, 0, 1, 1, 1], [0], [0]>} : vector<8x4x8xbf16>, vector<8x4x8xbf16>, vector<8x4x4xf32> -> vector<8x4x4xf32>
    %cst_30 = arith.constant 0.353553385 : f32
    %87 = vector.broadcast %cst_30 : f32 to vector<8x4x4xf32>
    %88 = arith.mulf %86, %87 : vector<8x4x4xf32>
    %cst_31 = arith.constant dense<0xFF800000> : vector<8x4xf32>
    %89 = vector.multi_reduction <maximumf>, %88, %cst_31 [2] : vector<8x4x4xf32> to vector<8x4xf32>
    %90 = vector.shape_cast %89 : vector<8x4xf32> to vector<8x4x1xf32>
    %91 = vector.broadcast %90 : vector<8x4x1xf32> to vector<8x4x4xf32>
    %92 = arith.subf %88, %91 : vector<8x4x4xf32>
    %93 = math.exp %92 : vector<8x4x4xf32>
    %cst_32 = arith.constant dense<0.000000e+00> : vector<8x4xf32>
    %94 = vector.multi_reduction <add>, %93, %cst_32 [2] : vector<8x4x4xf32> to vector<8x4xf32>
    %95 = vector.shape_cast %94 : vector<8x4xf32> to vector<8x4x1xf32>
    %96 = tpu.reciprocal %95 {approx = true} : vector<8x4x1xf32> -> vector<8x4x1xf32>
    %97 = vector.broadcast %96 : vector<8x4x1xf32> to vector<8x4x4xf32>
    %98 = arith.mulf %93, %97 : vector<8x4x4xf32>
    %99 = arith.truncf %98 : vector<8x4x4xf32> to vector<8x4x4xbf16>
    %100 = vector.extract_strided_slice %65 {offsets = [0, 0, 8], sizes = [8, 4, 8], strides = [1, 1, 1]} : vector<8x4x32xbf16> to vector<8x4x8xbf16>
    %cst_33 = arith.constant dense<0.000000e+00> : vector<8x4x8xf32>
    %101 = tpu.matmul %99, %100, %cst_33 {dimension_numbers = #tpu.dot_dimension_numbers<[2], [1], [1], [2], [0, 0, 0, 1, 1, 2], [0], [0]>} : vector<8x4x4xbf16>, vector<8x4x8xbf16>, vector<8x4x8xf32> -> vector<8x4x8xf32>
    %102 = vector.extract_strided_slice %63 {offsets = [0, 0, 16], sizes = [8, 4, 8], strides = [1, 1, 1]} : vector<8x4x32xbf16> to vector<8x4x8xbf16>
    %103 = vector.extract_strided_slice %64 {offsets = [0, 0, 16], sizes = [8, 4, 8], strides = [1, 1, 1]} : vector<8x4x32xbf16> to vector<8x4x8xbf16>
    %cst_34 = arith.constant dense<0.000000e+00> : vector<8x4x4xf32>
    %104 = tpu.matmul %102, %103, %cst_34 {dimension_numbers = #tpu.dot_dimension_numbers<[2], [2], [1], [1], [0, 0, 0, 1, 1, 1], [0], [0]>} : vector<8x4x8xbf16>, vector<8x4x8xbf16>, vector<8x4x4xf32> -> vector<8x4x4xf32>
    %cst_35 = arith.constant 0.353553385 : f32
    %105 = vector.broadcast %cst_35 : f32 to vector<8x4x4xf32>
    %106 = arith.mulf %104, %105 : vector<8x4x4xf32>
    %cst_36 = arith.constant dense<0xFF800000> : vector<8x4xf32>
    %107 = vector.multi_reduction <maximumf>, %106, %cst_36 [2] : vector<8x4x4xf32> to vector<8x4xf32>
    %108 = vector.shape_cast %107 : vector<8x4xf32> to vector<8x4x1xf32>
    %109 = vector.broadcast %108 : vector<8x4x1xf32> to vector<8x4x4xf32>
    %110 = arith.subf %106, %109 : vector<8x4x4xf32>
    %111 = math.exp %110 : vector<8x4x4xf32>
    %cst_37 = arith.constant dense<0.000000e+00> : vector<8x4xf32>
    %112 = vector.multi_reduction <add>, %111, %cst_37 [2] : vector<8x4x4xf32> to vector<8x4xf32>
    %113 = vector.shape_cast %112 : vector<8x4xf32> to vector<8x4x1xf32>
    %114 = tpu.reciprocal %113 {approx = true} : vector<8x4x1xf32> -> vector<8x4x1xf32>
    %115 = vector.broadcast %114 : vector<8x4x1xf32> to vector<8x4x4xf32>
    %116 = arith.mulf %111, %115 : vector<8x4x4xf32>
    %117 = arith.truncf %116 : vector<8x4x4xf32> to vector<8x4x4xbf16>
    %118 = vector.extract_strided_slice %65 {offsets = [0, 0, 16], sizes = [8, 4, 8], strides = [1, 1, 1]} : vector<8x4x32xbf16> to vector<8x4x8xbf16>
    %cst_38 = arith.constant dense<0.000000e+00> : vector<8x4x8xf32>
    %119 = tpu.matmul %117, %118, %cst_38 {dimension_numbers = #tpu.dot_dimension_numbers<[2], [1], [1], [2], [0, 0, 0, 1, 1, 2], [0], [0]>} : vector<8x4x4xbf16>, vector<8x4x8xbf16>, vector<8x4x8xf32> -> vector<8x4x8xf32>
    %120 = vector.extract_strided_slice %63 {offsets = [0, 0, 24], sizes = [8, 4, 8], strides = [1, 1, 1]} : vector<8x4x32xbf16> to vector<8x4x8xbf16>
    %121 = vector.extract_strided_slice %64 {offsets = [0, 0, 24], sizes = [8, 4, 8], strides = [1, 1, 1]} : vector<8x4x32xbf16> to vector<8x4x8xbf16>
    %cst_39 = arith.constant dense<0.000000e+00> : vector<8x4x4xf32>
    %122 = tpu.matmul %120, %121, %cst_39 {dimension_numbers = #tpu.dot_dimension_numbers<[2], [2], [1], [1], [0, 0, 0, 1, 1, 1], [0], [0]>} : vector<8x4x8xbf16>, vector<8x4x8xbf16>, vector<8x4x4xf32> -> vector<8x4x4xf32>
    %cst_40 = arith.constant 0.353553385 : f32
    %123 = vector.broadcast %cst_40 : f32 to vector<8x4x4xf32>
    %124 = arith.mulf %122, %123 : vector<8x4x4xf32>
    %cst_41 = arith.constant dense<0xFF800000> : vector<8x4xf32>
    %125 = vector.multi_reduction <maximumf>, %124, %cst_41 [2] : vector<8x4x4xf32> to vector<8x4xf32>
    %126 = vector.shape_cast %125 : vector<8x4xf32> to vector<8x4x1xf32>
    %127 = vector.broadcast %126 : vector<8x4x1xf32> to vector<8x4x4xf32>
    %128 = arith.subf %124, %127 : vector<8x4x4xf32>
    %129 = math.exp %128 : vector<8x4x4xf32>
    %cst_42 = arith.constant dense<0.000000e+00> : vector<8x4xf32>
    %130 = vector.multi_reduction <add>, %129, %cst_42 [2] : vector<8x4x4xf32> to vector<8x4xf32>
    %131 = vector.shape_cast %130 : vector<8x4xf32> to vector<8x4x1xf32>
    %132 = tpu.reciprocal %131 {approx = true} : vector<8x4x1xf32> -> vector<8x4x1xf32>
    %133 = vector.broadcast %132 : vector<8x4x1xf32> to vector<8x4x4xf32>
    %134 = arith.mulf %129, %133 : vector<8x4x4xf32>
    %135 = arith.truncf %134 : vector<8x4x4xf32> to vector<8x4x4xbf16>
    %136 = vector.extract_strided_slice %65 {offsets = [0, 0, 24], sizes = [8, 4, 8], strides = [1, 1, 1]} : vector<8x4x32xbf16> to vector<8x4x8xbf16>
    %cst_43 = arith.constant dense<0.000000e+00> : vector<8x4x8xf32>
    %137 = tpu.matmul %135, %136, %cst_43 {dimension_numbers = #tpu.dot_dimension_numbers<[2], [1], [1], [2], [0, 0, 0, 1, 1, 2], [0], [0]>} : vector<8x4x4xbf16>, vector<8x4x8xbf16>, vector<8x4x8xf32> -> vector<8x4x8xf32>
    %138 = tpu.concatenate %83, %101, %119, %137 in 2 : vector<8x4x8xf32>, vector<8x4x8xf32>, vector<8x4x8xf32>, vector<8x4x8xf32> -> vector<8x4x32xf32>
    %c0_44 = arith.constant 0 : index
    %c0_45 = arith.constant 0 : index
    %139 = vector.load %arg8[%c0_44, %c0_45] : memref<32x32xbf16, #tpu.memory_space<vmem>>, vector<32x32xbf16>
    %140 = vector.shape_cast %138 : vector<8x4x32xf32> to vector<32x32xf32>
    %141 = arith.truncf %140 : vector<32x32xf32> to vector<32x32xbf16>
    %cst_46 = arith.constant dense<0.000000e+00> : vector<32x32xf32>
    %142 = tpu.matmul %141, %139, %cst_46 {dimension_numbers = #tpu.dot_dimension_numbers<[1], [0], [0], [1], [0, 0, 1, 1], [], []>} : vector<32x32xbf16>, vector<32x32xbf16>, vector<32x32xf32> -> vector<32x32xf32>
    %143 = vector.shape_cast %142 : vector<32x32xf32> to vector<8x4x32xf32>
    %144 = arith.addf %26, %143 : vector<8x4x32xf32>
    %c0_47 = arith.constant 0 : index
    %c0_48 = arith.constant 0 : index
    %145 = vector.load %arg9[%c0_47, %c0_48] : memref<1x32xf32, #tpu.memory_space<vmem>>, vector<1x32xf32>
    %146 = vector.shape_cast %145 : vector<1x32xf32> to vector<1x1x32xf32>
    %147 = vector.broadcast %146 : vector<1x1x32xf32> to vector<8x4x32xf32>
    %148 = arith.addf %144, %147 : vector<8x4x32xf32>
    %c0_49 = arith.constant 0 : index
    %c0_50 = arith.constant 0 : index
    %149 = vector.load %arg10[%c0_49, %c0_50] : memref<1x32xf32, #tpu.memory_space<vmem>>, vector<1x32xf32>
    %c0_51 = arith.constant 0 : index
    %c0_52 = arith.constant 0 : index
    %150 = vector.load %arg11[%c0_51, %c0_52] : memref<1x32xf32, #tpu.memory_space<vmem>>, vector<1x32xf32>
    %cst_53 = arith.constant dense<0.000000e+00> : vector<8x4xf32>
    %151 = vector.multi_reduction <add>, %148, %cst_53 [2] : vector<8x4x32xf32> to vector<8x4xf32>
    %152 = vector.shape_cast %151 : vector<8x4xf32> to vector<8x4x1xf32>
    %cst_54 = arith.constant 3.200000e+01 : f32
    %153 = vector.broadcast %cst_54 : f32 to vector<8x4x1xf32>
    %154 = arith.divf %152, %153 : vector<8x4x1xf32>
    %155 = vector.broadcast %154 : vector<8x4x1xf32> to vector<8x4x32xf32>
    %156 = arith.subf %148, %155 : vector<8x4x32xf32>
    %157 = arith.mulf %156, %156 : vector<8x4x32xf32>
    %cst_55 = arith.constant dense<0.000000e+00> : vector<8x4xf32>
    %158 = vector.multi_reduction <add>, %157, %cst_55 [2] : vector<8x4x32xf32> to vector<8x4xf32>
    %159 = vector.shape_cast %158 : vector<8x4xf32> to vector<8x4x1xf32>
    %cst_56 = arith.constant 3.200000e+01 : f32
    %160 = vector.broadcast %cst_56 : f32 to vector<8x4x1xf32>
    %161 = arith.divf %159, %160 : vector<8x4x1xf32>
    %162 = vector.broadcast %154 : vector<8x4x1xf32> to vector<8x4x32xf32>
    %163 = arith.subf %148, %162 : vector<8x4x32xf32>
    %cst_57 = arith.constant 9.99999974E-6 : f32
    %164 = vector.broadcast %cst_57 : f32 to vector<8x4x1xf32>
    %165 = arith.addf %161, %164 : vector<8x4x1xf32>
    %166 = math.rsqrt %165 : vector<8x4x1xf32>
    %167 = vector.broadcast %166 : vector<8x4x1xf32> to vector<8x4x32xf32>
    %168 = arith.mulf %163, %167 : vector<8x4x32xf32>
    %169 = vector.shape_cast %149 : vector<1x32xf32> to vector<1x1x32xf32>
    %170 = vector.broadcast %169 : vector<1x1x32xf32> to vector<8x4x32xf32>
    %171 = arith.mulf %168, %170 : vector<8x4x32xf32>
    %172 = vector.shape_cast %150 : vector<1x32xf32> to vector<1x1x32xf32>
    %173 = vector.broadcast %172 : vector<1x1x32xf32> to vector<8x4x32xf32>
    %174 = arith.addf %171, %173 : vector<8x4x32xf32>
    %c0_58 = arith.constant 0 : index
    %c0_59 = arith.constant 0 : index
    %175 = vector.load %arg12[%c0_58, %c0_59] : memref<32x128xbf16, #tpu.memory_space<vmem>>, vector<32x128xbf16>
    %176 = vector.shape_cast %174 : vector<8x4x32xf32> to vector<32x32xf32>
    %177 = arith.truncf %176 : vector<32x32xf32> to vector<32x32xbf16>
    %cst_60 = arith.constant dense<0.000000e+00> : vector<32x128xf32>
    %178 = tpu.matmul %177, %175, %cst_60 {dimension_numbers = #tpu.dot_dimension_numbers<[1], [0], [0], [1], [0, 0, 1, 1], [], []>} : vector<32x32xbf16>, vector<32x128xbf16>, vector<32x128xf32> -> vector<32x128xf32>
    %179 = vector.shape_cast %178 : vector<32x128xf32> to vector<8x4x128xf32>
    %c0_61 = arith.constant 0 : index
    %c0_62 = arith.constant 0 : index
    %180 = vector.load %arg13[%c0_61, %c0_62] : memref<1x128xf32, #tpu.memory_space<vmem>>, vector<1x128xf32>
    %181 = vector.shape_cast %180 : vector<1x128xf32> to vector<1x1x128xf32>
    %182 = vector.broadcast %181 : vector<1x1x128xf32> to vector<8x4x128xf32>
    %183 = arith.addf %179, %182 : vector<8x4x128xf32>
    %cst_63 = arith.constant 5.000000e-01 : f32
    %184 = vector.broadcast %cst_63 : f32 to vector<8x4x128xf32>
    %185 = arith.mulf %184, %183 : vector<8x4x128xf32>
    %cst_64 = arith.constant 0.707106769 : f32
    %186 = vector.broadcast %cst_64 : f32 to vector<8x4x128xf32>
    %187 = arith.mulf %183, %186 : vector<8x4x128xf32>
    %188 = math.erf %187 : vector<8x4x128xf32>
    %cst_65 = arith.constant 1.000000e+00 : f32
    %189 = vector.broadcast %cst_65 : f32 to vector<8x4x128xf32>
    %190 = arith.addf %189, %188 : vector<8x4x128xf32>
    %191 = arith.mulf %185, %190 : vector<8x4x128xf32>
    %c0_66 = arith.constant 0 : index
    %c0_67 = arith.constant 0 : index
    %192 = vector.load %arg14[%c0_66, %c0_67] : memref<128x32xbf16, #tpu.memory_space<vmem>>, vector<128x32xbf16>
    %193 = vector.shape_cast %191 : vector<8x4x128xf32> to vector<32x128xf32>
    %194 = arith.truncf %193 : vector<32x128xf32> to vector<32x128xbf16>
    %cst_68 = arith.constant dense<0.000000e+00> : vector<32x32xf32>
    %195 = tpu.matmul %194, %192, %cst_68 {dimension_numbers = #tpu.dot_dimension_numbers<[1], [0], [0], [1], [0, 0, 1, 1], [], []>} : vector<32x128xbf16>, vector<128x32xbf16>, vector<32x32xf32> -> vector<32x32xf32>
    %196 = vector.shape_cast %195 : vector<32x32xf32> to vector<8x4x32xf32>
    %c0_69 = arith.constant 0 : index
    %c0_70 = arith.constant 0 : index
    %197 = vector.load %arg15[%c0_69, %c0_70] : memref<1x32xf32, #tpu.memory_space<vmem>>, vector<1x32xf32>
    %198 = vector.shape_cast %197 : vector<1x32xf32> to vector<1x1x32xf32>
    %199 = vector.broadcast %198 : vector<1x1x32xf32> to vector<8x4x32xf32>
    %200 = arith.addf %196, %199 : vector<8x4x32xf32>
    %201 = arith.addf %0, %148 : vector<8x4x32xf32>
    %202 = arith.addf %201, %200 : vector<8x4x32xf32>
    %c0_71 = arith.constant 0 : index
    %c0_72 = arith.constant 0 : index
    %c0_73 = arith.constant 0 : index
    %203 = vector.load %arg16[%c0_71, %c0_72, %c0_73] : memref<8x4x32xf32, #tpu.memory_space<vmem>>, vector<8x4x32xf32>
    tpu.vector_store %arg16[%c0_71, %c0_72, %c0_73], %202 {strides = array<i32>} : memref<8x4x32xf32, #tpu.memory_space<vmem>>, vector<8x4x32xf32>,
    return
  }
  func.func @transform_0(%arg0: i32) -> (i32, i32, i32) {
    %c0_i32 = arith.constant 0 : i32
    %c0_i32_0 = arith.constant 0 : i32
    %c0_i32_1 = arith.constant 0 : i32
    return %arg0, %c0_i32, %c0_i32_0 : i32, i32, i32
  }
  func.func @transform_1(%arg0: i32) -> (i32, i32) {
    %c0_i32 = arith.constant 0 : i32
    %c0_i32_0 = arith.constant 0 : i32
    %c0_i32_1 = arith.constant 0 : i32
    return %c0_i32, %c0_i32_0 : i32, i32
  }
  func.func @transform_2(%arg0: i32) -> (i32, i32) {
    %c0_i32 = arith.constant 0 : i32
    %c0_i32_0 = arith.constant 0 : i32
    %c0_i32_1 = arith.constant 0 : i32
    return %c0_i32, %c0_i32_0 : i32, i32
  }
  func.func @transform_3(%arg0: i32) -> (i32, i32) {
    %c0_i32 = arith.constant 0 : i32
    %c0_i32_0 = arith.constant 0 : i32
    %c0_i32_1 = arith.constant 0 : i32
    return %c0_i32, %c0_i32_0 : i32, i32
  }
  func.func @transform_4(%arg0: i32) -> (i32, i32) {
    %c0_i32 = arith.constant 0 : i32
    %c0_i32_0 = arith.constant 0 : i32
    %c0_i32_1 = arith.constant 0 : i32
    return %c0_i32, %c0_i32_0 : i32, i32
  }
  func.func @transform_5(%arg0: i32) -> (i32, i32) {
    %c0_i32 = arith.constant 0 : i32
    %c0_i32_0 = arith.constant 0 : i32
    %c0_i32_1 = arith.constant 0 : i32
    return %c0_i32, %c0_i32_0 : i32, i32
  }
  func.func @transform_6(%arg0: i32) -> (i32, i32) {
    %c0_i32 = arith.constant 0 : i32
    %c0_i32_0 = arith.constant 0 : i32
    %c0_i32_1 = arith.constant 0 : i32
    return %c0_i32, %c0_i32_0 : i32, i32
  }
  func.func @transform_7(%arg0: i32) -> (i32, i32) {
    %c0_i32 = arith.constant 0 : i32
    %c0_i32_0 = arith.constant 0 : i32
    %c0_i32_1 = arith.constant 0 : i32
    return %c0_i32, %c0_i32_0 : i32, i32
  }
  func.func @transform_8(%arg0: i32) -> (i32, i32) {
    %c0_i32 = arith.constant 0 : i32
    %c0_i32_0 = arith.constant 0 : i32
    %c0_i32_1 = arith.constant 0 : i32
    return %c0_i32, %c0_i32_0 : i32, i32
  }
  func.func @transform_9(%arg0: i32) -> (i32, i32) {
    %c0_i32 = arith.constant 0 : i32
    %c0_i32_0 = arith.constant 0 : i32
    %c0_i32_1 = arith.constant 0 : i32
    return %c0_i32, %c0_i32_0 : i32, i32
  }
  func.func @transform_10(%arg0: i32) -> (i32, i32) {
    %c0_i32 = arith.constant 0 : i32
    %c0_i32_0 = arith.constant 0 : i32
    %c0_i32_1 = arith.constant 0 : i32
    return %c0_i32, %c0_i32_0 : i32, i32
  }
  func.func @transform_11(%arg0: i32) -> (i32, i32) {
    %c0_i32 = arith.constant 0 : i32
    %c0_i32_0 = arith.constant 0 : i32
    %c0_i32_1 = arith.constant 0 : i32
    return %c0_i32, %c0_i32_0 : i32, i32
  }
  func.func @transform_12(%arg0: i32) -> (i32, i32) {
    %c0_i32 = arith.constant 0 : i32
    %c0_i32_0 = arith.constant 0 : i32
    %c0_i32_1 = arith.constant 0 : i32
    return %c0_i32, %c0_i32_0 : i32, i32
  }
  func.func @transform_13(%arg0: i32) -> (i32, i32) {
    %c0_i32 = arith.constant 0 : i32
    %c0_i32_0 = arith.constant 0 : i32
    %c0_i32_1 = arith.constant 0 : i32
    return %c0_i32, %c0_i32_0 : i32, i32
  }
  func.func @transform_14(%arg0: i32) -> (i32, i32) {
    %c0_i32 = arith.constant 0 : i32
    %c0_i32_0 = arith.constant 0 : i32
    %c0_i32_1 = arith.constant 0 : i32
    return %c0_i32, %c0_i32_0 : i32, i32
  }
  func.func @transform_15(%arg0: i32) -> (i32, i32, i32) {
    %c0_i32 = arith.constant 0 : i32
    %c0_i32_0 = arith.constant 0 : i32
    %c0_i32_1 = arith.constant 0 : i32
    return %arg0, %c0_i32, %c0_i32_0 : i32, i32, i32
  }
}

module attributes {stable_mosaic.version = 11 : i64} {
  func.func @pool_heads_kernel(%arg0: i32, %arg1: memref<8x4x32xf32, #tpu.memory_space<vmem>>, %arg2: memref<32x48xbf16, #tpu.memory_space<vmem>>, %arg3: memref<1x48xf32, #tpu.memory_space<vmem>>, %arg4: memref<48x128xbf16, #tpu.memory_space<vmem>>, %arg5: memref<1x128xf32, #tpu.memory_space<vmem>>, %arg6: memref<8x128xf32, #tpu.memory_space<vmem>>) attributes {dimension_semantics = [#tpu.dimension_semantics<parallel>], iteration_bounds = array<i64: 1>, scalar_prefetch = 0 : i64, scratch_operands = 0 : i64, tpu.core_type = #tpu.core_type<tc>, window_params = [{transform_indices = @transform_0, window_bounds = array<i64: 8, 4, 32>}, {pipeline_mode = #tpu.pipeline_mode<synchronous>, transform_indices = @transform_1, window_bounds = array<i64: 32, 48>}, {pipeline_mode = #tpu.pipeline_mode<synchronous>, transform_indices = @transform_2, window_bounds = array<i64: 1, 48>}, {pipeline_mode = #tpu.pipeline_mode<synchronous>, transform_indices = @transform_3, window_bounds = array<i64: 48, 128>}, {pipeline_mode = #tpu.pipeline_mode<synchronous>, transform_indices = @transform_4, window_bounds = array<i64: 1, 128>}, {transform_indices = @transform_5, window_bounds = array<i64: 8, 128>}]} {
    %c0 = arith.constant 0 : index
    %c0_0 = arith.constant 0 : index
    %c0_1 = arith.constant 0 : index
    %0 = vector.load %arg1[%c0, %c0_0, %c0_1] : memref<8x4x32xf32, #tpu.memory_space<vmem>>, vector<8x4x32xf32>
    %cst = arith.constant dense<0.000000e+00> : vector<8x32xf32>
    %1 = vector.multi_reduction <add>, %0, %cst [1] : vector<8x4x32xf32> to vector<8x32xf32>
    %cst_2 = arith.constant 4.000000e+00 : f32
    %2 = vector.broadcast %cst_2 : f32 to vector<8x32xf32>
    %3 = arith.divf %1, %2 : vector<8x32xf32>
    %cst_3 = arith.constant dense<0.000000e+00> : vector<8xf32>
    %4 = vector.multi_reduction <add>, %3, %cst_3 [1] : vector<8x32xf32> to vector<8xf32>
    %5 = vector.shape_cast %4 : vector<8xf32> to vector<8x1xf32>
    %cst_4 = arith.constant 3.200000e+01 : f32
    %6 = vector.broadcast %cst_4 : f32 to vector<8x1xf32>
    %7 = arith.divf %5, %6 : vector<8x1xf32>
    %8 = vector.broadcast %7 : vector<8x1xf32> to vector<8x32xf32>
    %9 = arith.subf %3, %8 : vector<8x32xf32>
    %10 = arith.mulf %9, %9 : vector<8x32xf32>
    %cst_5 = arith.constant dense<0.000000e+00> : vector<8xf32>
    %11 = vector.multi_reduction <add>, %10, %cst_5 [1] : vector<8x32xf32> to vector<8xf32>
    %12 = vector.shape_cast %11 : vector<8xf32> to vector<8x1xf32>
    %cst_6 = arith.constant 3.200000e+01 : f32
    %13 = vector.broadcast %cst_6 : f32 to vector<8x1xf32>
    %14 = arith.divf %12, %13 : vector<8x1xf32>
    %15 = vector.broadcast %7 : vector<8x1xf32> to vector<8x32xf32>
    %16 = arith.subf %3, %15 : vector<8x32xf32>
    %cst_7 = arith.constant 9.99999974E-6 : f32
    %17 = vector.broadcast %cst_7 : f32 to vector<8x1xf32>
    %18 = arith.addf %14, %17 : vector<8x1xf32>
    %19 = math.rsqrt %18 : vector<8x1xf32>
    %20 = vector.broadcast %19 : vector<8x1xf32> to vector<8x32xf32>
    %21 = arith.mulf %16, %20 : vector<8x32xf32>
    %22 = arith.truncf %21 : vector<8x32xf32> to vector<8x32xbf16>
    %c0_8 = arith.constant 0 : index
    %c0_9 = arith.constant 0 : index
    %23 = vector.load %arg2[%c0_8, %c0_9] : memref<32x48xbf16, #tpu.memory_space<vmem>>, vector<32x48xbf16>
    %cst_10 = arith.constant dense<0.000000e+00> : vector<8x48xf32>
    %24 = tpu.matmul %22, %23, %cst_10 {dimension_numbers = #tpu.dot_dimension_numbers<[1], [0], [0], [1], [0, 0, 1, 1], [], []>} : vector<8x32xbf16>, vector<32x48xbf16>, vector<8x48xf32> -> vector<8x48xf32>
    %c0_11 = arith.constant 0 : index
    %c0_12 = arith.constant 0 : index
    %25 = vector.load %arg3[%c0_11, %c0_12] : memref<1x48xf32, #tpu.memory_space<vmem>>, vector<1x48xf32>
    %26 = vector.broadcast %25 : vector<1x48xf32> to vector<8x48xf32>
    %27 = arith.addf %24, %26 : vector<8x48xf32>
    %cst_13 = arith.constant 5.000000e-01 : f32
    %28 = vector.broadcast %cst_13 : f32 to vector<8x48xf32>
    %29 = arith.mulf %28, %27 : vector<8x48xf32>
    %cst_14 = arith.constant 0.707106769 : f32
    %30 = vector.broadcast %cst_14 : f32 to vector<8x48xf32>
    %31 = arith.mulf %27, %30 : vector<8x48xf32>
    %32 = math.erf %31 : vector<8x48xf32>
    %cst_15 = arith.constant 1.000000e+00 : f32
    %33 = vector.broadcast %cst_15 : f32 to vector<8x48xf32>
    %34 = arith.addf %33, %32 : vector<8x48xf32>
    %35 = arith.mulf %29, %34 : vector<8x48xf32>
    %36 = arith.truncf %35 : vector<8x48xf32> to vector<8x48xbf16>
    %c0_16 = arith.constant 0 : index
    %c0_17 = arith.constant 0 : index
    %37 = vector.load %arg4[%c0_16, %c0_17] : memref<48x128xbf16, #tpu.memory_space<vmem>>, vector<48x128xbf16>
    %cst_18 = arith.constant dense<0.000000e+00> : vector<8x128xf32>
    %38 = tpu.matmul %36, %37, %cst_18 {dimension_numbers = #tpu.dot_dimension_numbers<[1], [0], [0], [1], [0, 0, 1, 1], [], []>} : vector<8x48xbf16>, vector<48x128xbf16>, vector<8x128xf32> -> vector<8x128xf32>
    %c0_19 = arith.constant 0 : index
    %c0_20 = arith.constant 0 : index
    %39 = vector.load %arg5[%c0_19, %c0_20] : memref<1x128xf32, #tpu.memory_space<vmem>>, vector<1x128xf32>
    %40 = vector.broadcast %39 : vector<1x128xf32> to vector<8x128xf32>
    %41 = arith.addf %38, %40 : vector<8x128xf32>
    %c0_21 = arith.constant 0 : index
    %c0_22 = arith.constant 0 : index
    %42 = vector.load %arg6[%c0_21, %c0_22] : memref<8x128xf32, #tpu.memory_space<vmem>>, vector<8x128xf32>
    tpu.vector_store %arg6[%c0_21, %c0_22], %41 {strides = array<i32>} : memref<8x128xf32, #tpu.memory_space<vmem>>, vector<8x128xf32>,
    return
  }
  func.func @transform_0(%arg0: i32) -> (i32, i32, i32) {
    %c0_i32 = arith.constant 0 : i32
    %c0_i32_0 = arith.constant 0 : i32
    %c0_i32_1 = arith.constant 0 : i32
    return %arg0, %c0_i32, %c0_i32_0 : i32, i32, i32
  }
  func.func @transform_1(%arg0: i32) -> (i32, i32) {
    %c0_i32 = arith.constant 0 : i32
    %c0_i32_0 = arith.constant 0 : i32
    %c0_i32_1 = arith.constant 0 : i32
    return %c0_i32, %c0_i32_0 : i32, i32
  }
  func.func @transform_2(%arg0: i32) -> (i32, i32) {
    %c0_i32 = arith.constant 0 : i32
    %c0_i32_0 = arith.constant 0 : i32
    %c0_i32_1 = arith.constant 0 : i32
    return %c0_i32, %c0_i32_0 : i32, i32
  }
  func.func @transform_3(%arg0: i32) -> (i32, i32) {
    %c0_i32 = arith.constant 0 : i32
    %c0_i32_0 = arith.constant 0 : i32
    %c0_i32_1 = arith.constant 0 : i32
    return %c0_i32, %c0_i32_0 : i32, i32
  }
  func.func @transform_4(%arg0: i32) -> (i32, i32) {
    %c0_i32 = arith.constant 0 : i32
    %c0_i32_0 = arith.constant 0 : i32
    %c0_i32_1 = arith.constant 0 : i32
    return %c0_i32, %c0_i32_0 : i32, i32
  }
  func.func @transform_5(%arg0: i32) -> (i32, i32) {
    %c0_i32 = arith.constant 0 : i32
    %c0_i32_0 = arith.constant 0 : i32
    return %arg0, %c0_i32 : i32, i32
  }
}

</mosaic_0001>

<bundles_post_ra>
// kernel: _lambda_.4
= control target key start
LH: loop header
LB: loop body
LE: loop exit
PB: predicated region body
PF: predicated region fallthrough
CT: control target
= control target key end

     0   :  { %11 = vsyncpa [#allocation3], 0  ;;  %s846_s0 = inlined_call_operand.hbm [shape: f32[8,4,8], index: 0, kind: input, shape index: {}]   ;;  %s847_s1 = inlined_call_operand.hbm [shape: bf16[8,32], index: 1, kind: input, shape index: {}]   ;;  %s848_s2 = inlined_call_operand.hbm [shape: f32[1,32], index: 2, kind: input, shape index: {}]   ;;  %s849_s3 = inlined_call_operand.hbm [shape: f32[1,32], index: 3, kind: input, shape index: {}]   ;;  %s850_s4 = inlined_call_operand.hbm [shape: f32[1,32], index: 4, kind: input, shape index: {}]   ;;  %s851_s5 = inlined_call_operand.hbm [shape: f32[1,4,32], index: 5, kind: input, shape index: {}]   ;;  %s852_s6 = inlined_call_operand.hbm [shape: f32[8,4,32], index: 6, kind: output, shape index: {}]  }
   0x1   :  { %12 = vsyncpa [#allocation6], 0 }
   0x2   :  { %13 = vsyncpa [#allocation9], 0 }
   0x3   :  { %14 = vsyncpa [#allocation12], 0 }
   0x4   :  { %15 = vsyncpa [#allocation4], 0  ;;  %s648_s21 = smov [#allocation5]   ;;  %s649_s23 = smov [#allocation8]  }
   0x5   :  { %s34_s22 = sshll.u32 %s648_s21, 4  ;;  %s54_s24 = sshll.u32 %s649_s23, 4  ;;  %s35_s22 = int_to_ptr.vmem [resolvable:$true] %s34_s22  ;;  %s55_s24 = int_to_ptr.vmem [resolvable:$true] %s54_s24 }
   0x6   :  { %s484_s27 = scalar_lea.hbm %s847_s1, 64 }
   0x7   :  { %p485_p0 = scmp.ne.s32.totalorder %s847_s1, %s484_s27  ;;  %p488_p1 = scmp.lt.u32.totalorder %s484_s27, %s847_s1 }
   0x9   :  { %p490_p2 = pnand %p488_p1, %p485_p0 }
   0xb   :  { %493 = shalt.err (!%p490_p2)
}
   0xc   :  { %s494_s8 = scalar_lea.vmem %s35_s22, 64  ;;  %p499_p4 = scmp.lt.s32.totalorder %s35_s22, %s35_s22 }
   0xd   :  { %p495_p3 = scmp.ne.s32.totalorder %s35_s22, %s494_s8  ;;  %p500_p5 = scmp.lt.s32.totalorder %s494_s8, %s494_s8 }
   0xf   :  { %p501_p6 = por %p500_p5, %p499_p4 }
  0x11   :  { %p502_p7 = pnand %p501_p6, %p495_p3 }
  0x13   :  { %505 = shalt.err (!%p502_p7)
}
  0x14   :  { %37 = dma.hbm_to_vmem [thread:$0]  %s847_s1, 64, %s35_s22, [#allocation6]  }
  0x15   :  { %s506_s13 = scalar_lea.hbm %s849_s3, 16 }
  0x16   :  { %p507_p8 = scmp.ne.s32.totalorder %s849_s3, %s506_s13  ;;  %p510_p9 = scmp.lt.u32.totalorder %s506_s13, %s849_s3 }
  0x18   :  { %p512_p10 = pnand %p510_p9, %p507_p8 }
  0x1a   :  { %515 = shalt.err (!%p512_p10)
}
  0x1b   :  { %s516_s18 = scalar_lea.vmem %s55_s24, 16  ;;  %s520_s19 = scalar_lea.vmem %s55_s24, 32 }
  0x1c   :  { %p517_p11 = scmp.ne.s32.totalorder %s55_s24, %s516_s18  ;;  %p521_p12 = scmp.lt.s32.totalorder %s55_s24, %s55_s24 }
  0x1d   :  { %p522_p13 = scmp.lt.s32.totalorder %s520_s19, %s516_s18 }
  0x1f   :  { %p523_p0 = por %p522_p13, %p521_p12 }
  0x21   :  { %p524_p1 = pnand %p523_p0, %p517_p11 }
  0x23   :  { %527 = shalt.err (!%p524_p1)
}
  0x24   :  { %57 = dma.hbm_to_vmem [thread:$0]  %s849_s3, 16, %s55_s24, [#allocation9]  }
  0x25   :  { %s650_s21 = smov [#allocation2]   ;;  %s528_s26 = scalar_lea.hbm %s846_s0, 512 }
  0x26   :  { %s21_s22 = sshll.u32 %s650_s21, 4  ;;  %p529_p2 = scmp.ne.s32.totalorder %s846_s0, %s528_s26  ;;  %s22_s22 = int_to_ptr.vmem [resolvable:$true] %s21_s22 }
  0x27   :  { %p532_p3 = scmp.lt.u32.totalorder %s528_s26, %s846_s0 }
  0x29   :  { %p534_p4 = pnand %p532_p3, %p529_p2 }
  0x2b   :  { %537 = shalt.err (!%p534_p4)
}
  0x2c   :  { %s538_s7 = scalar_lea.vmem %s22_s22, 512  ;;  %p543_p6 = scmp.lt.s32.totalorder %s22_s22, %s22_s22 }
  0x2d   :  { %p539_p5 = scmp.ne.s32.totalorder %s22_s22, %s538_s7  ;;  %p544_p7 = scmp.lt.s32.totalorder %s538_s7, %s538_s7 }
  0x2f   :  { %p545_p8 = por %p544_p7, %p543_p6 }
  0x31   :  { %p546_p9 = pnand %p545_p8, %p539_p5 }
  0x33   :  { %549 = shalt.err (!%p546_p9)
}
  0x34   :  { %s651_s3 = smov 64   ;;  %s652_s24 = smov 4  }
  0x35   :  { %27 = dma.hbm_to_vmem [thread:$0]  %s846_s0, 512, %s22_s22, [#allocation3], %s651_s3, %s651_s3, %s652_s24  }
  0x36   :  { %s653_s10 = smov [#allocation7]   ;;  %s654_s12 = smov [#allocation10]  }
  0x37   :  { %s44_s11 = sshll.u32 %s653_s10, 4  ;;  %s64_s13 = sshll.u32 %s654_s12, 4  ;;  %s45_s11 = int_to_ptr.vmem [resolvable:$true] %s44_s11  ;;  %s65_s13 = int_to_ptr.vmem [resolvable:$true] %s64_s13 }
  0x38   :  { %s550_s16 = scalar_lea.hbm %s848_s2, 16 }
  0x39   :  { %p551_p10 = scmp.ne.s32.totalorder %s848_s2, %s550_s16  ;;  %p554_p11 = scmp.lt.u32.totalorder %s550_s16, %s848_s2 }
  0x3b   :  { %p556_p12 = pnand %p554_p11, %p551_p10 }
  0x3d   :  { %559 = shalt.err (!%p556_p12)
}
  0x3e   :  { %s560_s0 = scalar_lea.vmem %s45_s11, 16  ;;  %s564_s20 = scalar_lea.vmem %s45_s11, 32 }
  0x3f   :  { %p561_p13 = scmp.ne.s32.totalorder %s45_s11, %s560_s0  ;;  %p565_p0 = scmp.lt.s32.totalorder %s45_s11, %s45_s11 }
  0x40   :  { %p566_p1 = scmp.lt.s32.totalorder %s564_s20, %s560_s0 }
  0x42   :  { %p567_p2 = por %p566_p1, %p565_p0 }
  0x44   :  { %p568_p3 = pnand %p567_p2, %p561_p13 }
  0x46   :  { %571 = shalt.err (!%p568_p3)
}
  0x47   :  { %47 = dma.hbm_to_vmem [thread:$0]  %s848_s2, 16, %s45_s11, [#allocation6]  }
  0x48   :  { %s572_s26 = scalar_lea.hbm %s850_s4, 16 }
  0x49   :  { %p573_p4 = scmp.ne.s32.totalorder %s850_s4, %s572_s26  ;;  %p576_p5 = scmp.lt.u32.totalorder %s572_s26, %s850_s4 }
  0x4b   :  { %p578_p6 = pnand %p576_p5, %p573_p4 }
  0x4d   :  { %581 = shalt.err (!%p578_p6)
}
  0x4e   :  { %s582_s7 = scalar_lea.vmem %s65_s13, 16  ;;  %s586_s8 = scalar_lea.vmem %s65_s13, 32 }
  0x4f   :  { %p583_p7 = scmp.ne.s32.totalorder %s65_s13, %s582_s7  ;;  %p587_p8 = scmp.lt.s32.totalorder %s65_s13, %s65_s13 }
  0x50   :  { %p588_p9 = scmp.lt.s32.totalorder %s586_s8, %s582_s7 }
  0x52   :  { %p589_p10 = por %p588_p9, %p587_p8 }
  0x54   :  { %p590_p11 = pnand %p589_p10, %p583_p7 }
  0x56   :  { %593 = shalt.err (!%p590_p11)
}
  0x57   :  { %67 = dma.hbm_to_vmem [thread:$0]  %s850_s4, 16, %s65_s13, [#allocation9]  }
  0x58   :  { %s655_s10 = smov [#allocation11]   ;;  %s594_s15 = scalar_lea.hbm %s851_s5, 64 }
  0x59   :  { %s74_s11 = sshll.u32 %s655_s10, 4  ;;  %p595_p12 = scmp.ne.s32.totalorder %s851_s5, %s594_s15  ;;  %s75_s11 = int_to_ptr.vmem [resolvable:$true] %s74_s11 }
  0x5a   :  { %p598_p13 = scmp.lt.u32.totalorder %s594_s15, %s851_s5 }
  0x5c   :  { %p600_p0 = pnand %p598_p13, %p595_p12 }
  0x5e   :  { %603 = shalt.err (!%p600_p0)
}
  0x5f   :  { %s604_s1 = scalar_lea.vmem %s75_s11, 64  ;;  %p609_p2 = scmp.lt.s32.totalorder %s75_s11, %s75_s11 }
  0x60   :  { %p605_p1 = scmp.ne.s32.totalorder %s75_s11, %s604_s1  ;;  %p610_p3 = scmp.lt.s32.totalorder %s604_s1, %s604_s1 }
  0x62   :  { %p611_p4 = por %p610_p3, %p609_p2 }
  0x64   :  { %p612_p5 = pnand %p611_p4, %p605_p1 }
  0x66   :  { %615 = shalt.err (!%p612_p5)
}
  0x67   :  { %77 = dma.hbm_to_vmem [thread:$0]  %s851_s5, 64, %s75_s11, [#allocation12]  }
  0x68   :  { %638 = dma.done.wait [#allocation3], 512  }
  0x69   :  { %639 = vsyncadd [#allocation3], 4294966784 }
  0x6a   :  { %640 = dma.done.wait [#allocation6], 80  }
  0x6b   :  { %641 = vsyncadd [#allocation6], 4294967216 }
  0x6c   :  { %642 = dma.done.wait [#allocation9], 32  }
  0x6d   :  { %643 = vsyncadd [#allocation9], 4294967264 }
  0x6e   :  { %644 = dma.done.wait [#allocation12], 64  }
  0x6f   :  { %645 = vsyncadd [#allocation12], 4294967232  ;;  %vm131_vm0 = vcmask 1043456   ;;  %v105_v0 = vld [vmem:[#allocation5] sm:$0xf]  ;;  %v449_v3 = vld [vmem:[#allocation2 + $0x8] sm:$0xff]  }
  0x70   :  { %438 = vmatprep.subr.msk.bf16.mxu0 %vm131_vm0, %v105_v0  ;;  %v133_v1 = vsel %vm131_vm0, %v105_v0, 0  ;;  %v448_v2 = vld [vmem:[#allocation2] sm:$0xff]   ;;  %vm124_vm1 = vcmask 64512   ;;  %v450_v4 = vld [vmem:[#allocation2 + $0x10] sm:$0xff]   ;;  %v451_v6 = vld [vmem:[#allocation2 + $0x18] sm:$0xff]   ;;  %vm253_vm2 = vcmask 257024  }
  0x71   :  { %433 = vmatpush3.bf16.msra.mxu0 %v133_v1  ;;  %v122_v5 = vpack.c.bf16 %v449_v3, %v448_v2  ;;  %v123_v7 = vpack.c.bf16 %v451_v6, %v450_v4  ;;  %v426_v8 = vld [vmem:[#allocation7] ss:$0 sm:$0xff]  ;;  %s656_s5 = smov [#allocation13]  }
  0x72   :  { %s409_s0 = sshll.u32 %s656_s5, 4  ;;  %s410_s0 = int_to_ptr.vmem [resolvable:$true] %s409_s0 }
  0x73   :  { %434 = vmatprep.mubr.msk.bf16.mxu0 %vm124_vm1, %v122_v5  ;;  %s616_s20 = scalar_lea.vmem %s410_s0, 512  ;;  %p621_p7 = scmp.lt.s32.totalorder %s410_s0, %s410_s0 }
  0x74   :  { %435 = vmatmul.mubr.msk.bf16.vlgmr.msra.gmra.mrb[0].mxu0 %vm124_vm1, %v123_v7  ;;  %p617_p6 = scmp.ne.s32.totalorder %s410_s0, %s616_s20  ;;  %p622_p8 = scmp.lt.s32.totalorder %s616_s20, %s616_s20 }
  0x76   :  { %p623_p9 = por %p622_p8, %p621_p7 }
  0x78   :  { %p624_p10 = pnand %p623_p9, %p617_p6 }
 0x147   :  { %v436_v9 = vpop.f32.mrb[0].mxu0 }
 0x148   :  { %v190_v10 = vcombine.high %v436_v9, %v436_v9  ;;  %v207_v11 = vadd.f32 %v436_v9, %v426_v8  ;;  %v169_v12 = vpop.f32.mrb[1].mxu0 }
 0x149   :  { %v188_v13 = vcombine.high %v169_v12, %v169_v12  ;;  %v203_v14 = vadd.f32 %v426_v8, %v169_v12  ;;  %v437_v15 = vpop.f32.mrb[2].mxu0 }
 0x14a   :  { %v208_v16 = vadd.f32 %v426_v8, %v190_v10  ;;  %v223_v17 = vmul.f32 0.70710677, %v207_v11  ;;  %v191_v18 = vcombine.high %v437_v15, %v437_v15  ;;  %v209_v19 = vadd.f32 %v437_v15, %v426_v8  ;;  %v172_v20 = vpop.f32.mrb[3].mxu0 }
 0x14b   :  { %v204_v21 = vadd.f32 %v426_v8, %v188_v13  ;;  %v219_v22 = vmul.f32 0.70710677, %v203_v14  ;;  %v189_v23 = vcombine.high %v172_v20, %v172_v20  ;;  %v205_v28 = vadd.f32 %v426_v8, %v172_v20 }
 0x14c   :  { %v224_v24 = vmul.f32 0.70710677, %v208_v16  ;;  %452 = verf.f32 %v223_v17  ;;  %v210_v25 = vadd.f32 %v426_v8, %v191_v18  ;;  %v225_v27 = vmul.f32 0.70710677, %v209_v19 }
 0x14d   :  { %v220_v26 = vmul.f32 0.70710677, %v204_v21  ;;  %454 = verf.f32 %v219_v22  ;;  %v206_v29 = vadd.f32 %v426_v8, %v189_v23  ;;  %v221_v30 = vmul.f32 0.70710677, %v205_v28 }
 0x14e   :  { %456 = verf.f32 %v224_v24  ;;  %v226_v31 = vmul.f32 0.70710677, %v210_v25  ;;  %v215_v35 = vmul.f32 0.5, %v207_v11  ;;  %v211_v40 = vmul.f32 0.5, %v203_v14 }
 0x14f   :  { %458 = verf.f32 %v220_v26  ;;  %v222_v32 = vmul.f32 0.70710677, %v206_v29  ;;  %v216_v42 = vmul.f32 0.5, %v208_v16  ;;  %v213_v51 = vmul.f32 0.5, %v205_v28 }
 0x150   :  { %460 = verf.f32 %v225_v27  ;;  %v212_v54 = vmul.f32 0.5, %v204_v21  ;;  %v214_v56 = vmul.f32 0.5, %v206_v29  ;;  %v217_v62 = vmul.f32 0.5, %v209_v19 }
 0x151   :  { %462 = verf.f32 %v221_v30  ;;  %v218_v4 = vmul.f32 0.5, %v210_v25 }
 0x152   :  { %464 = verf.f32 %v222_v32 }
 0x153   :  { %466 = verf.f32 %v226_v31 }
 0x156   :  { %v453_v33 = vpop.eup %452 }
 0x157   :  { %v455_v34 = vpop.eup %454  ;;  %v239_v36 = vadd.f32 1.0, %v453_v33 }
 0x158   :  { %v457_v37 = vpop.eup %456  ;;  %v235_v38 = vadd.f32 1.0, %v455_v34 }
 0x159   :  { %v459_v39 = vpop.eup %458  ;;  %v247_v41 = vmul.f32 %v239_v36, %v215_v35  ;;  %v240_v43 = vadd.f32 1.0, %v457_v37 }
 0x15a   :  { %v461_v44 = vpop.eup %460  ;;  %v243_v47 = vmul.f32 %v235_v38, %v211_v40  ;;  %v236_v48 = vadd.f32 1.0, %v459_v39 }
 0x15b   :  { %v266_v45 = vsel %vm253_vm2, %v247_v41, 0.0  ;;  %v248_v46 = vmul.f32 %v240_v43, %v216_v42  ;;  %v463_v49 = vpop.eup %462  ;;  %v241_v61 = vadd.f32 1.0, %v461_v44 }
 0x15c   :  { %267 = vadd.xlane.f32.xlu0 %v266_v45  ;;  %v465_v50 = vpop.eup %464  ;;  %v237_v53 = vadd.f32 1.0, %v463_v49  ;;  %v254_v58 = vsel %vm253_vm2, %v243_v47, 0.0  ;;  %v244_v60 = vmul.f32 %v236_v48, %v212_v54 }
 0x15d   :  { %v269_v52 = vsel %vm253_vm2, %v248_v46, 0.0  ;;  %v467_v55 = vpop.eup %466  ;;  %v238_v57 = vadd.f32 1.0, %v465_v50  ;;  %v249_v3 = vmul.f32 %v241_v61, %v217_v62 }
 0x15e   :  { %270 = vadd.xlane.f32.xlu1 %v269_v52  ;;  %v245_v59 = vmul.f32 %v237_v53, %v213_v51  ;;  %v242_v1 = vadd.f32 1.0, %v467_v55  ;;  %v257_v2 = vsel %vm253_vm2, %v244_v60, 0.0 }
 0x15f   :  { %v246_v0 = vmul.f32 %v238_v57, %v214_v56  ;;  %v272_v7 = vsel %vm253_vm2, %v249_v3, 0.0 }
 0x160   :  { %255 = vadd.xlane.f32.xlu0 %v254_v58  ;;  %v260_v63 = vsel %vm253_vm2, %v245_v59, 0.0  ;;  %v250_v6 = vmul.f32 %v242_v1, %v218_v4 }
 0x161   :  { %v263_v5 = vsel %vm253_vm2, %v246_v0, 0.0 }
 0x162   :  { %261 = vadd.xlane.f32.xlu1 %v260_v63  ;;  %v275_v8 = vsel %vm253_vm2, %v250_v6, 0.0 }
 0x164   :  { %258 = vadd.xlane.f32.xlu0 %v257_v2 }
 0x166   :  { %264 = vadd.xlane.f32.xlu1 %v263_v5  ;;  %v427_v5 = vld [vmem:[#allocation8] ss:$0 sm:$0xff] }
 0x168   :  { %273 = vadd.xlane.f32.xlu0 %v272_v7 }
 0x16a   :  { %276 = vadd.xlane.f32.xlu1 %v275_v8 }
 0x1e9   :  { %v268_v9 = vpop.xlane.xlu0 %267 }
 0x1ea   :  { %v283_v10 = vmul.f32 0.03125, %v268_v9 }
 0x1eb   :  { %v271_v11 = vpop.xlane.xlu1 %270 }
 0x1ec   :  { %v775_v12 = vsub.f32 %v247_v41, %v283_v10  ;;  %v284_v13 = vmul.f32 0.03125, %v271_v11  ;;  %v428_v11 = vld [vmem:[#allocation10] ss:$0 sm:$0xff] }
 0x1ed   :  { %v256_v14 = vpop.xlane.xlu0 %255 }
 0x1ee   :  { %v777_v15 = vsub.f32 %v248_v46, %v284_v13  ;;  %v279_v16 = vmul.f32 0.03125, %v256_v14  ;;  %v299_v17 = vmul.f32 %v775_v12, %v775_v12 }
 0x1ef   :  { %v262_v18 = vpop.xlane.xlu1 %261 }
 0x1f0   :  { %v781_v19 = vsub.f32 %v243_v47, %v279_v16  ;;  %v281_v20 = vmul.f32 0.03125, %v262_v18  ;;  %v315_v21 = vsel %vm253_vm2, %v299_v17, 0.0  ;;  %v300_v22 = vmul.f32 %v777_v15, %v777_v15  ;;  %v387_v18 = vld [vmem:[#allocation11] sm:$0xf] }
 0x1f1   :  { %v259_v23 = vpop.xlane.xlu0 %258  ;;  %316 = vadd.xlane.f32.xlu0 %v315_v21 }
 0x1f2   :  { %v786_v24 = vsub.f32 %v245_v59, %v281_v20  ;;  %v280_v25 = vmul.f32 0.03125, %v259_v23  ;;  %v318_v26 = vsel %vm253_vm2, %v300_v22, 0.0  ;;  %v295_v27 = vmul.f32 %v781_v19, %v781_v19 }
 0x1f3   :  { %319 = vadd.xlane.f32.xlu1 %v318_v26  ;;  %v265_v28 = vpop.xlane.xlu1 %264 }
 0x1f4   :  { %v791_v29 = vsub.f32 %v244_v60, %v280_v25  ;;  %v282_v30 = vmul.f32 0.03125, %v265_v28  ;;  %v303_v31 = vsel %vm253_vm2, %v295_v27, 0.0  ;;  %v297_v32 = vmul.f32 %v786_v24, %v786_v24 }
 0x1f5   :  { %304 = vadd.xlane.f32.xlu0 %v303_v31  ;;  %v274_v33 = vpop.xlane.xlu0 %273 }
 0x1f6   :  { %v796_v34 = vsub.f32 %v246_v0, %v282_v30  ;;  %v285_v35 = vmul.f32 0.03125, %v274_v33  ;;  %v296_v36 = vmul.f32 %v791_v29, %v791_v29  ;;  %v309_v38 = vsel %vm253_vm2, %v297_v32, 0.0 }
 0x1f7   :  { %v277_v37 = vpop.xlane.xlu1 %276 }
 0x1f8   :  { %v801_v39 = vsub.f32 %v249_v3, %v285_v35  ;;  %v286_v40 = vmul.f32 0.03125, %v277_v37  ;;  %v306_v41 = vsel %vm253_vm2, %v296_v36, 0.0  ;;  %v298_v42 = vmul.f32 %v796_v34, %v796_v34 }
 0x1f9   :  { %310 = vadd.xlane.f32.xlu0 %v309_v38  ;;  %307 = vadd.xlane.f32.xlu1 %v306_v41 }
 0x1fa   :  { %v806_v43 = vsub.f32 %v250_v6, %v286_v40  ;;  %v301_v44 = vmul.f32 %v801_v39, %v801_v39  ;;  %v312_v46 = vsel %vm253_vm2, %v298_v42, 0.0 }
 0x1fc   :  { %v321_v45 = vsel %vm253_vm2, %v301_v44, 0.0  ;;  %v302_v47 = vmul.f32 %v806_v43, %v806_v43 }
 0x1fd   :  { %322 = vadd.xlane.f32.xlu0 %v321_v45  ;;  %313 = vadd.xlane.f32.xlu1 %v312_v46 }
 0x1fe   :  { %v324_v48 = vsel %vm253_vm2, %v302_v47, 0.0 }
 0x201   :  { %325 = vadd.xlane.f32.xlu1 %v324_v48 }
 0x27e   :  { %v317_v49 = vpop.xlane.xlu0 %316 }
 0x27f   :  { %v331_v50 = vmul.f32 0.03125, %v317_v49 }
 0x280   :  { %v320_v51 = vpop.xlane.xlu1 %319 }
 0x281   :  { %v339_v52 = vadd.f32 1e-05, %v331_v50  ;;  %v332_v53 = vmul.f32 0.03125, %v320_v51 }
 0x282   :  { %v305_v54 = vpop.xlane.xlu0 %304 }
 0x283   :  { %468 = vrsqrt.f32 %v339_v52  ;;  %v340_v55 = vadd.f32 1e-05, %v332_v53  ;;  %v327_v56 = vmul.f32 0.03125, %v305_v54 }
 0x285   :  { %470 = vrsqrt.f32 %v340_v55  ;;  %v335_v57 = vadd.f32 1e-05, %v327_v56 }
 0x286   :  { %v311_v58 = vpop.xlane.xlu0 %310  ;;  %v308_v59 = vpop.xlane.xlu1 %307 }
 0x287   :  { %472 = vrsqrt.f32 %v335_v57  ;;  %v329_v60 = vmul.f32 0.03125, %v311_v58  ;;  %v328_v61 = vmul.f32 0.03125, %v308_v59 }
 0x289   :  { %v337_v62 = vadd.f32 1e-05, %v329_v60  ;;  %v336_v63 = vadd.f32 1e-05, %v328_v61 }
 0x28a   :  { %v323_v0 = vpop.xlane.xlu0 %322  ;;  %v314_v1 = vpop.xlane.xlu1 %313 }
 0x28b   :  { %474 = vrsqrt.f32 %v337_v62  ;;  %v333_v2 = vmul.f32 0.03125, %v323_v0  ;;  %v330_v3 = vmul.f32 0.03125, %v314_v1 }
 0x28c   :  { %476 = vrsqrt.f32 %v336_v63 }
 0x28d   :  { %v469_v4 = vpop.eup %468  ;;  %v341_v6 = vadd.f32 1e-05, %v333_v2  ;;  %v338_v7 = vadd.f32 1e-05, %v330_v3 }
 0x28e   :  { %v355_v8 = vmul.f32 %v469_v4, %v775_v12  ;;  %v326_v9 = vpop.xlane.xlu1 %325 }
 0x28f   :  { %v471_v10 = vpop.eup %470  ;;  %478 = vrsqrt.f32 %v341_v6  ;;  %v334_v13 = vmul.f32 0.03125, %v326_v9 }
 0x290   :  { %v369_v14 = vmul.f32 %v427_v5, %v355_v8  ;;  %v356_v16 = vmul.f32 %v471_v10, %v777_v15  ;;  %480 = vrsqrt.f32 %v338_v7 }
 0x291   :  { %v473_v17 = vpop.eup %472  ;;  %v342_v20 = vadd.f32 1e-05, %v334_v13 }
 0x292   :  { %v383_v21 = vadd.f32 %v428_v11, %v369_v14  ;;  %v370_v22 = vmul.f32 %v427_v5, %v356_v16  ;;  %v351_v23 = vmul.f32 %v473_v17, %v781_v19 }
 0x293   :  { %482 = vrsqrt.f32 %v342_v20 }
 0x294   :  { %v392_v25 = vadd.f32 %v387_v18, %v383_v21  ;;  %v384_v26 = vadd.f32 %v428_v11, %v370_v22  ;;  %v365_v12 = vmul.f32 %v427_v5, %v351_v23 }
 0x295   :  { %v475_v27 = vpop.eup %474 }
 0x296   :  { %v477_v28 = vpop.eup %476  ;;  %400 = vst.msk [vmem:[#allocation13 + $0x10] sm:$0xf] %vm253_vm2, %v392_v25  ;;  %v393_v30 = vadd.f32 %v387_v18, %v384_v26  ;;  %v379_v31 = vadd.f32 %v428_v11, %v365_v12  ;;  %v353_v15 = vmul.f32 %v475_v27, %v786_v24 }
 0x297   :  { %v352_v32 = vmul.f32 %v477_v28, %v791_v29 }
 0x298   :  { %401 = vst.msk [vmem:[#allocation13 + $0x14] sm:$0xf] %vm253_vm2, %v393_v30  ;;  %v388_v33 = vadd.f32 %v387_v18, %v379_v31  ;;  %v367_v35 = vmul.f32 %v427_v5, %v353_v15 }
 0x299   :  { %v479_v36 = vpop.eup %478  ;;  %v366_v19 = vmul.f32 %v427_v5, %v352_v32 }
 0x29a   :  { %v481_v37 = vpop.eup %480  ;;  %396 = vst.msk [vmem:[#allocation13] sm:$0xf] %vm253_vm2, %v388_v33  ;;  %v381_v38 = vadd.f32 %v428_v11, %v367_v35  ;;  %v357_v40 = vmul.f32 %v479_v36, %v801_v39 }
 0x29b   :  { %v380_v41 = vadd.f32 %v428_v11, %v366_v19  ;;  %v354_v42 = vmul.f32 %v481_v37, %v796_v34 }
 0x29c   :  { %v390_v44 = vadd.f32 %v387_v18, %v381_v38  ;;  %v371_v45 = vmul.f32 %v427_v5, %v357_v40 }
 0x29d   :  { %v483_v24 = vpop.eup %482  ;;  %v389_v46 = vadd.f32 %v387_v18, %v380_v41  ;;  %v368_v29 = vmul.f32 %v427_v5, %v354_v42 }
 0x29e   :  { %398 = vst.msk [vmem:[#allocation13 + $0x8] sm:$0xf] %vm253_vm2, %v390_v44  ;;  %v385_v47 = vadd.f32 %v428_v11, %v371_v45  ;;  %v358_v48 = vmul.f32 %v483_v24, %v806_v43 }
 0x29f   :  { %397 = vst.msk [vmem:[#allocation13 + $0x4] sm:$0xf] %vm253_vm2, %v389_v46  ;;  %v382_v49 = vadd.f32 %v428_v11, %v368_v29 }
 0x2a0   :  { %v394_v50 = vadd.f32 %v387_v18, %v385_v47  ;;  %v372_v51 = vmul.f32 %v427_v5, %v358_v48 }
 0x2a1   :  { %v391_v52 = vadd.f32 %v387_v18, %v382_v49 }
 0x2a2   :  { %402 = vst.msk [vmem:[#allocation13 + $0x18] sm:$0xf] %vm253_vm2, %v394_v50  ;;  %v386_v34 = vadd.f32 %v428_v11, %v372_v51 }
 0x2a3   :  { %399 = vst.msk [vmem:[#allocation13 + $0xc] sm:$0xf] %vm253_vm2, %v391_v52 }
 0x2a4   :  { %v395_v39 = vadd.f32 %v387_v18, %v386_v34 }
 0x2a6   :  { %403 = vst.msk [vmem:[#allocation13 + $0x1c] sm:$0xf] %vm253_vm2, %v395_v39 }
 0x2a7   :  { %627 = shalt.err (!%p624_p10)
}
 0x2a8   :  { %s628_s23 = scalar_lea.hbm %s852_s6, 512 }
 0x2a9   :  { %p629_p11 = scmp.ne.s32.totalorder %s852_s6, %s628_s23  ;;  %p632_p12 = scmp.lt.u32.totalorder %s628_s23, %s852_s6 }
 0x2ab   :  { %p634_p13 = pnand %p632_p12, %p629_p11 }
 0x2ad   :  { %637 = shalt.err (!%p634_p13)
}
 0x2ae   :  { %415 = dma.vmem_to_hbm [thread:$0]  %s410_s0, 512, %s852_s6, [#allocation4], %s651_s3, %s651_s3, %s652_s24  }
 0x2af   :  { %646 = dma.done.wait [#allocation4], 512  }
 0x2b0   :  { %647 = vsyncadd [#allocation4], 4294966784 }
 0x2b1   :  { %419 = vsyncpa [#allocation3], 1 }
 0x2b2   :  { %420 = vsyncpa [#allocation6], 1 }
 0x2b3   :  { %421 = vsyncpa [#allocation9], 1 }
 0x2b4   :  { %422 = vsyncpa [#allocation12], 1 }
 0x2b5   :  { %423 = vsyncpa [#allocation4], 1 }

// kernel: _lambda_.7
= control target key start
LH: loop header
LB: loop body
LE: loop exit
PB: predicated region body
PF: predicated region fallthrough
CT: control target
= control target key end

     0   :  { %10 = vsyncpa [#allocation3], 0  ;;  %s838_s0 = inlined_call_operand.hbm [shape: f32[8,4,32], index: 0, kind: input, shape index: {}]   ;;  %s839_s1 = inlined_call_operand.hbm [shape: bf16[32,48], index: 1, kind: input, shape index: {}]   ;;  %s840_s2 = inlined_call_operand.hbm [shape: f32[1,48], index: 2, kind: input, shape index: {}]   ;;  %s841_s3 = inlined_call_operand.hbm [shape: bf16[48,128], index: 3, kind: input, shape index: {}]   ;;  %s842_s4 = inlined_call_operand.hbm [shape: f32[1,128], index: 4, kind: input, shape index: {}]   ;;  %s843_s5 = inlined_call_operand.hbm [shape: f32[8,128], index: 5, kind: output, shape index: {}]  }
   0x1   :  { %11 = vsyncpa [#allocation6], 0 }
   0x2   :  { %12 = vsyncpa [#allocation9], 0 }
   0x3   :  { %13 = vsyncpa [#allocation4], 0  ;;  %s671_s18 = smov [#allocation5]   ;;  %s672_s20 = smov [#allocation8]  }
   0x4   :  { %s31_s19 = sshll.u32 %s671_s18, 4  ;;  %s53_s21 = sshll.u32 %s672_s20, 4  ;;  %s32_s19 = int_to_ptr.vmem [resolvable:$true] %s31_s19  ;;  %s711_s21 = int_to_ptr.vmem [resolvable:$true] %s53_s21 }
   0x5   :  { %s531_s24 = scalar_lea.hbm %s839_s1, 256 }
   0x6   :  { %p532_p0 = scmp.ne.s32.totalorder %s839_s1, %s531_s24  ;;  %p535_p1 = scmp.lt.u32.totalorder %s531_s24, %s839_s1 }
   0x8   :  { %p537_p2 = pnand %p535_p1, %p532_p0 }
   0xa   :  { %540 = shalt.err (!%p537_p2)
}
   0xb   :  { %s541_s29 = scalar_lea.vmem %s32_s19, 256  ;;  %p546_p4 = scmp.lt.s32.totalorder %s32_s19, %s32_s19 }
   0xc   :  { %p542_p3 = scmp.ne.s32.totalorder %s32_s19, %s541_s29  ;;  %p547_p5 = scmp.lt.s32.totalorder %s541_s29, %s541_s29 }
   0xe   :  { %p548_p6 = por %p547_p5, %p546_p4 }
  0x10   :  { %p549_p7 = pnand %p548_p6, %p542_p3 }
  0x12   :  { %552 = shalt.err (!%p549_p7)
}
  0x13   :  { %s673_s30 = smov 64   ;;  %s674_s6 = smov 4  }
  0x14   :  { %37 = dma.hbm_to_vmem [thread:$0]  %s839_s1, 256, %s32_s19, [#allocation6], %s673_s30, %s673_s30, %s674_s6  }
  0x15   :  { %s553_s11 = scalar_lea.hbm %s841_s3, 384 }
  0x16   :  { %p554_p8 = scmp.ne.s32.totalorder %s841_s3, %s553_s11  ;;  %p557_p9 = scmp.lt.u32.totalorder %s553_s11, %s841_s3 }
  0x18   :  { %p559_p10 = pnand %p557_p9, %p554_p8 }
  0x1a   :  { %562 = shalt.err (!%p559_p10)
}
  0x1b   :  { %s563_s16 = scalar_lea.vmem %s711_s21, 384  ;;  %p568_p12 = scmp.lt.s32.totalorder %s711_s21, %s711_s21 }
  0x1c   :  { %p564_p11 = scmp.ne.s32.totalorder %s711_s21, %s563_s16  ;;  %p569_p13 = scmp.lt.s32.totalorder %s563_s16, %s563_s16 }
  0x1e   :  { %p570_p0 = por %p569_p13, %p568_p12 }
  0x20   :  { %p571_p1 = pnand %p570_p0, %p564_p11 }
  0x22   :  { %574 = shalt.err (!%p571_p1)
}
  0x23   :  { %59 = dma.hbm_to_vmem [thread:$0]  %s841_s3, 384, %s711_s21, [#allocation9], %s673_s30, %s673_s30, %s674_s6  }
  0x24   :  { %s675_s18 = smov [#allocation2]   ;;  %s676_s20 = smov [#allocation7]  }
  0x25   :  { %s19_s19 = sshll.u32 %s675_s18, 4  ;;  %s44_s22 = sshll.u32 %s676_s20, 4  ;;  %s20_s19 = int_to_ptr.vmem [resolvable:$true] %s19_s19  ;;  %s45_s22 = int_to_ptr.vmem [resolvable:$true] %s44_s22 }
  0x26   :  { %s575_s25 = scalar_lea.hbm %s838_s0, 512 }
  0x27   :  { %p576_p2 = scmp.ne.s32.totalorder %s838_s0, %s575_s25  ;;  %p579_p3 = scmp.lt.u32.totalorder %s575_s25, %s838_s0 }
  0x29   :  { %p581_p4 = pnand %p579_p3, %p576_p2 }
  0x2b   :  { %584 = shalt.err (!%p581_p4)
}
  0x2c   :  { %s585_s3 = scalar_lea.vmem %s20_s19, 512  ;;  %p590_p6 = scmp.lt.s32.totalorder %s20_s19, %s20_s19 }
  0x2d   :  { %p586_p5 = scmp.ne.s32.totalorder %s20_s19, %s585_s3  ;;  %p591_p7 = scmp.lt.s32.totalorder %s585_s3, %s585_s3 }
  0x2f   :  { %p592_p8 = por %p591_p7, %p590_p6 }
  0x31   :  { %p593_p9 = pnand %p592_p8, %p586_p5 }
  0x33   :  { %596 = shalt.err (!%p593_p9)
}
  0x34   :  { %25 = dma.hbm_to_vmem [thread:$0]  %s838_s0, 512, %s20_s19, [#allocation3], %s673_s30, %s673_s30, %s674_s6  }
  0x35   :  { %s597_s10 = scalar_lea.hbm %s840_s2, 16 }
  0x36   :  { %p598_p10 = scmp.ne.s32.totalorder %s840_s2, %s597_s10  ;;  %p601_p11 = scmp.lt.u32.totalorder %s597_s10, %s840_s2 }
  0x38   :  { %p603_p12 = pnand %p601_p11, %p598_p10 }
  0x3a   :  { %606 = shalt.err (!%p603_p12)
}
  0x3b   :  { %s607_s15 = scalar_lea.vmem %s45_s22, 16  ;;  %s611_s16 = scalar_lea.vmem %s45_s22, 32 }
  0x3c   :  { %p608_p13 = scmp.ne.s32.totalorder %s45_s22, %s607_s15  ;;  %p612_p0 = scmp.lt.s32.totalorder %s45_s22, %s45_s22 }
  0x3d   :  { %p613_p1 = scmp.lt.s32.totalorder %s611_s16, %s607_s15 }
  0x3f   :  { %p614_p2 = por %p613_p1, %p612_p0 }
  0x41   :  { %p615_p3 = pnand %p614_p2, %p608_p13 }
  0x43   :  { %618 = shalt.err (!%p615_p3)
}
  0x44   :  { %47 = dma.hbm_to_vmem [thread:$0]  %s840_s2, 16, %s45_s22, [#allocation6]  }
  0x45   :  { %s677_s6 = smov [#allocation10]   ;;  %s619_s19 = scalar_lea.hbm %s842_s4, 16 }
  0x46   :  { %s66_s1 = sshll.u32 %s677_s6, 4  ;;  %p620_p4 = scmp.ne.s32.totalorder %s842_s4, %s619_s19  ;;  %s67_s1 = int_to_ptr.vmem [resolvable:$true] %s66_s1 }
  0x47   :  { %p623_p5 = scmp.lt.u32.totalorder %s619_s19, %s842_s4 }
  0x49   :  { %p625_p6 = pnand %p623_p5, %p620_p4 }
  0x4b   :  { %628 = shalt.err (!%p625_p6)
}
  0x4c   :  { %s629_s26 = scalar_lea.vmem %s67_s1, 16  ;;  %s633_s2 = scalar_lea.vmem %s67_s1, 32 }
  0x4d   :  { %p630_p7 = scmp.ne.s32.totalorder %s67_s1, %s629_s26  ;;  %p634_p8 = scmp.lt.s32.totalorder %s67_s1, %s67_s1 }
  0x4e   :  { %p635_p9 = scmp.lt.s32.totalorder %s633_s2, %s629_s26 }
  0x50   :  { %p636_p10 = por %p635_p9, %p634_p8 }
  0x52   :  { %p637_p11 = pnand %p636_p10, %p630_p7 }
  0x54   :  { %640 = shalt.err (!%p637_p11)
}
  0x55   :  { %69 = dma.hbm_to_vmem [thread:$0]  %s842_s4, 16, %s67_s1, [#allocation9]  }
  0x56   :  { %663 = dma.done.wait [#allocation3], 512  }
  0x57   :  { %664 = vsyncadd [#allocation3], 4294966784 }
  0x58   :  { %665 = dma.done.wait [#allocation6], 272  }
  0x59   :  { %666 = vsyncadd [#allocation6], 4294967024 }
  0x5a   :  { %667 = dma.done.wait [#allocation9], 400  }
  0x5b   :  { %668 = vsyncadd [#allocation9], 4294966896  ;;  %vm94_vm0 = vcmask 257024   ;;  %v86_v0 = vld [vmem:[#allocation2] sm:$0xf]  ;;  %vm168_vm1 = vcmask 1041409  }
  0x5c   :  { %v87_v1 = vld [vmem:[#allocation2 + $0x4] sm:$0xf]  ;;  %v88_v2 = vld [vmem:[#allocation2 + $0x8] sm:$0xf]  ;;  %v89_v3 = vld [vmem:[#allocation2 + $0xc] sm:$0xf] }
  0x5d   :  { %v90_v4 = vld [vmem:[#allocation2 + $0x10] sm:$0xf]  ;;  %v91_v5 = vld [vmem:[#allocation2 + $0x14] sm:$0xf]  ;;  %v92_v6 = vld [vmem:[#allocation2 + $0x18] sm:$0xf] }
  0x5e   :  { %v93_v7 = vld [vmem:[#allocation2 + $0x1c] sm:$0xf]  ;;  %v95_v8 = vsel %vm94_vm0, %v86_v0, 0.0  ;;  %v102_v9 = vsel %vm94_vm0, %v87_v1, 0.0  ;;  %v109_v12 = vsel %vm94_vm0, %v88_v2, 0.0  ;;  %v116_v13 = vsel %vm94_vm0, %v89_v3, 0.0 }
  0x5f   :  { %v96_v10 = vrot.slane %v95_v8, 4  ;;  %v103_v11 = vrot.slane %v102_v9, 4  ;;  %v110_v14 = vrot.slane %v109_v12, 4  ;;  %v117_v15 = vrot.slane %v116_v13, 4  ;;  %s680_s4 = smov [#allocation11]  }
  0x60   :  { %v123_v16 = vsel %vm94_vm0, %v90_v4, 0.0  ;;  %v130_v17 = vsel %vm94_vm0, %v91_v5, 0.0  ;;  %v137_v24 = vsel %vm94_vm0, %v92_v6, 0.0  ;;  %v144_v25 = vsel %vm94_vm0, %v93_v7, 0.0  ;;  %s467_s28 = sshll.u32 %s680_s4, 4  ;;  %s468_s28 = int_to_ptr.vmem [resolvable:$true] %s467_s28 }
  0x61   :  { %v97_v18 = vadd.f32 %v96_v10, %v95_v8  ;;  %v104_v19 = vadd.f32 %v103_v11, %v102_v9  ;;  %v124_v20 = vrot.slane %v123_v16, 4  ;;  %v131_v21 = vrot.slane %v130_v17, 4  ;;  %s641_s29 = scalar_lea.vmem %s468_s28, 128  ;;  %p646_p13 = scmp.lt.s32.totalorder %s468_s28, %s468_s28 }
  0x62   :  { %v111_v22 = vadd.f32 %v110_v14, %v109_v12  ;;  %v118_v23 = vadd.f32 %v117_v15, %v116_v13  ;;  %vm170_vm2 = vcmask 1042434   ;;  %v138_v32 = vrot.slane %v137_v24, 4  ;;  %p642_p12 = scmp.ne.s32.totalorder %s468_s28, %s641_s29  ;;  %p647_p0 = scmp.lt.s32.totalorder %s641_s29, %s641_s29 }
  0x63   :  { %v98_v26 = vrot.slane %v97_v18, 2  ;;  %v105_v27 = vrot.slane %v104_v19, 2  ;;  %v125_v28 = vadd.f32 %v124_v20, %v123_v16  ;;  %v132_v29 = vadd.f32 %v131_v21, %v130_v17 }
  0x64   :  { %v112_v30 = vrot.slane %v111_v22, 2  ;;  %v119_v31 = vrot.slane %v118_v23, 2  ;;  %v145_v33 = vrot.slane %v144_v25, 4  ;;  %vm172_vm3 = vcmask 1043459   ;;  %p648_p1 = por %p647_p0, %p646_p13 }
  0x65   :  { %v99_v34 = vadd.f32 %v98_v26, %v97_v18  ;;  %v106_v35 = vadd.f32 %v105_v27, %v104_v19  ;;  %v126_v36 = vrot.slane %v125_v28, 2  ;;  %v133_v37 = vrot.slane %v132_v29, 2 }
  0x66   :  { %v113_v38 = vadd.f32 %v112_v30, %v111_v22  ;;  %v120_v39 = vadd.f32 %v119_v31, %v118_v23  ;;  %v139_v40 = vadd.f32 %v138_v32, %v137_v24  ;;  %v146_v41 = vadd.f32 %v145_v33, %v144_v25  ;;  %p649_p2 = pnand %p648_p1, %p642_p12 }
  0x67   :  { %v100_v42 = vrot.slane %v99_v34, 1  ;;  %v107_v43 = vrot.slane %v106_v35, 1  ;;  %v127_v44 = vadd.f32 %v126_v36, %v125_v28  ;;  %v134_v45 = vadd.f32 %v133_v37, %v132_v29 }
  0x68   :  { %v114_v46 = vrot.slane %v113_v38, 1  ;;  %v121_v47 = vrot.slane %v120_v39, 1  ;;  %v140_v48 = vrot.slane %v139_v40, 2  ;;  %v147_v49 = vrot.slane %v146_v41, 2 }
  0x69   :  { %v101_v50 = vadd.f32 %v100_v42, %v99_v34  ;;  %v108_v51 = vadd.f32 %v107_v43, %v106_v35  ;;  %v128_v52 = vrot.slane %v127_v44, 1  ;;  %v135_v53 = vrot.slane %v134_v45, 1 }
  0x6a   :  { %v115_v54 = vadd.f32 %v114_v46, %v113_v38  ;;  %v122_v55 = vadd.f32 %v121_v47, %v120_v39  ;;  %v141_v56 = vadd.f32 %v140_v48, %v139_v40  ;;  %v148_v57 = vadd.f32 %v147_v49, %v146_v41 }
  0x6b   :  { %v129_v58 = vadd.f32 %v128_v52, %v127_v44  ;;  %v136_v59 = vadd.f32 %v135_v53, %v134_v45  ;;  %v152_v60 = vmul.f32 0.25, %v101_v50  ;;  %v153_v61 = vmul.f32 0.25, %v108_v51 }
  0x6c   :  { %v142_v62 = vrot.slane %v141_v56, 1  ;;  %v149_v63 = vrot.slane %v148_v57, 1  ;;  %v154_v0 = vmul.f32 0.25, %v115_v54  ;;  %v155_v1 = vmul.f32 0.25, %v122_v55 }
  0x6d   :  { %v156_v2 = vmul.f32 0.25, %v129_v58  ;;  %v157_v3 = vmul.f32 0.25, %v136_v59  ;;  %v169_v4 = vsel %vm168_vm1, %v153_v61, %v152_v60  ;;  %vm174_vm4 = vcmask 1044484   ;;  %v523_v58 = vld [vmem:[#allocation5 + $0x8] sm:$0xff]  }
  0x6e   :  { %v143_v5 = vadd.f32 %v142_v62, %v141_v56  ;;  %v150_v6 = vadd.f32 %v149_v63, %v148_v57  ;;  %v171_v7 = vsel %vm170_vm2, %v154_v0, %v169_v4  ;;  %vm176_vm5 = vcmask 1045509   ;;  %v522_v56 = vld [vmem:[#allocation5] sm:$0xff]  }
  0x6f   :  { %v173_v8 = vsel %vm172_vm3, %v155_v1, %v171_v7  ;;  %vm178_vm6 = vcmask 1046534   ;;  %vm180_vm7 = vcmask 1047559   ;;  %vm183_vm8 = vcmask 261120  }
  0x70   :  { %v158_v9 = vmul.f32 0.25, %v143_v5  ;;  %v159_v10 = vmul.f32 0.25, %v150_v6  ;;  %v175_v11 = vsel %vm174_vm4, %v156_v2, %v173_v8  ;;  %v678_v57 = vmov 0.0  }
  0x71   :  { %v177_v12 = vsel %vm176_vm5, %v157_v3, %v175_v11  ;;  %494 = vmatprep.subr.bf16.mxu0 %v678_v57  ;;  %vm679_vm9 = vmmov 0   ;;  %502 = vmatprep.subr.bf16.mxu1 %v678_v57  ;;  %vm416_vm10 = vcmask 392192  }
  0x72   :  { %v179_v13 = vsel %vm178_vm6, %v158_v9, %v177_v12  ;;  %498 = vmatprep.mubr.msk.bf16.mxu0 %vm679_vm9, %v678_v57  ;;  %495 = vmatpush3.bf16.msra.mxu0 %v522_v56 }
  0x73   :  { %v181_v14 = vsel %vm180_vm7, %v159_v10, %v179_v13  ;;  %496 = vmatprep.subr.bf16.mxu0 %v678_v57  ;;  %508 = vmatprep.mubr.msk.bf16.mxu1 %vm679_vm9, %v678_v57 }
  0x74   :  { %v184_v15 = vsel %vm183_vm8, %v181_v14, 0.0 }
  0x75   :  { %185 = vadd.xlane.f32.xlu0 %v184_v15 }
  0x76   :  { %497 = vmatpush3.bf16.msra.mxu0 %v523_v58 }
 0x102   :  { %v186_v16 = vpop.xlane.xlu0 %185 }
 0x103   :  { %v188_v17 = vmul.f32 0.03125, %v186_v16 }
 0x105   :  { %v190_v18 = vrot.slane %v188_v17, 1  ;;  %v191_v19 = vrot.slane %v188_v17, 2  ;;  %v192_v20 = vrot.slane %v188_v17, 3  ;;  %v193_v21 = vrot.slane %v188_v17, 4 }
 0x106   :  { %v194_v22 = vrot.slane %v188_v17, 5  ;;  %v195_v23 = vrot.slane %v188_v17, 6  ;;  %v196_v24 = vrot.slane %v188_v17, 7  ;;  %v205_v25 = vsub.f32 %v152_v60, %v188_v17 }
 0x107   :  { %v206_v26 = vsub.f32 %v153_v61, %v190_v18  ;;  %v207_v27 = vsub.f32 %v154_v0, %v191_v19  ;;  %v208_v28 = vsub.f32 %v155_v1, %v192_v20  ;;  %v209_v29 = vsub.f32 %v156_v2, %v193_v21 }
 0x108   :  { %v210_v30 = vsub.f32 %v157_v3, %v194_v22  ;;  %v211_v31 = vsub.f32 %v158_v9, %v195_v23  ;;  %v212_v32 = vsub.f32 %v159_v10, %v196_v24  ;;  %v213_v37 = vmul.f32 %v205_v25, %v205_v25 }
 0x109   :  { %v214_v33 = vmul.f32 %v206_v26, %v206_v26  ;;  %v215_v34 = vmul.f32 %v207_v27, %v207_v27  ;;  %v216_v35 = vmul.f32 %v208_v28, %v208_v28  ;;  %v217_v36 = vmul.f32 %v209_v29, %v209_v29 }
 0x10a   :  { %v218_v38 = vmul.f32 %v210_v30, %v210_v30  ;;  %v219_v41 = vmul.f32 %v211_v31, %v211_v31  ;;  %v220_v42 = vmul.f32 %v212_v32, %v212_v32 }
 0x10b   :  { %v229_v39 = vrot.slane %v214_v33, 7  ;;  %v231_v40 = vrot.slane %v215_v34, 6  ;;  %v233_v44 = vrot.slane %v216_v35, 5  ;;  %v235_v46 = vrot.slane %v217_v36, 4 }
 0x10c   :  { %v237_v48 = vrot.slane %v218_v38, 3  ;;  %v239_v50 = vrot.slane %v219_v41, 2  ;;  %v241_v52 = vrot.slane %v220_v42, 1 }
 0x10d   :  { %v230_v43 = vsel %vm168_vm1, %v229_v39, %v213_v37 }
 0x10e   :  { %v232_v45 = vsel %vm170_vm2, %v231_v40, %v230_v43 }
 0x10f   :  { %v234_v47 = vsel %vm172_vm3, %v233_v44, %v232_v45  ;;  %v524_v45 = vld [vmem:[#allocation8] sm:$0xff]  }
 0x110   :  { %v236_v49 = vsel %vm174_vm4, %v235_v46, %v234_v47  ;;  %503 = vmatpush3.bf16.msra.mxu1 %v524_v45  ;;  %v525_v46 = vld [vmem:[#allocation8 + $0x8] sm:$0xff]   ;;  %v526_v47 = vld [vmem:[#allocation8 + $0x10] sm:$0xff]  }
 0x111   :  { %v238_v51 = vsel %vm176_vm5, %v237_v48, %v236_v49  ;;  %504 = vmatprep.subr.bf16.mxu1 %v678_v57  ;;  %v478_v48 = vld [vmem:[#allocation7] ss:$0 sm:$0xff] }
 0x112   :  { %v240_v53 = vsel %vm178_vm6, %v239_v50, %v238_v51 }
 0x113   :  { %v242_v54 = vsel %vm180_vm7, %v241_v52, %v240_v53 }
 0x114   :  { %v244_v55 = vsel %vm183_vm8, %v242_v54, 0.0  ;;  %505 = vmatpush3.bf16.msra.mxu1 %v525_v46 }
 0x115   :  { %245 = vadd.xlane.f32.xlu0 %v244_v55  ;;  %506 = vmatprep.subr.bf16.mxu1 %v678_v57 }
 0x118   :  { %507 = vmatpush3.bf16.msra.mxu1 %v526_v47 }
 0x1a2   :  { %v246_v59 = vpop.xlane.xlu0 %245 }
 0x1a3   :  { %v247_v60 = vmul.f32 0.03125, %v246_v59 }
 0x1a5   :  { %v248_v61 = vadd.f32 1e-05, %v247_v60 }
 0x1a7   :  { %527 = vrsqrt.f32 %v248_v61  ;;  %v482_v61 = vld [vmem:[#allocation10] ss:$0 sm:$0xff] }
 0x1b1   :  { %v528_v62 = vpop.eup %527 }
 0x1b2   :  { %v251_v63 = vrot.slane %v528_v62, 1  ;;  %v252_v0 = vrot.slane %v528_v62, 2  ;;  %v253_v1 = vrot.slane %v528_v62, 3  ;;  %v254_v2 = vrot.slane %v528_v62, 4 }
 0x1b3   :  { %v255_v3 = vrot.slane %v528_v62, 5  ;;  %v256_v4 = vrot.slane %v528_v62, 6  ;;  %v257_v5 = vrot.slane %v528_v62, 7  ;;  %v266_v6 = vmul.f32 %v528_v62, %v205_v25 }
 0x1b4   :  { %v267_v7 = vmul.f32 %v251_v63, %v206_v26  ;;  %v268_v8 = vmul.f32 %v252_v0, %v207_v27  ;;  %v269_v9 = vmul.f32 %v253_v1, %v208_v28  ;;  %v270_v10 = vmul.f32 %v254_v2, %v209_v29 }
 0x1b5   :  { %v271_v11 = vmul.f32 %v255_v3, %v210_v30  ;;  %v272_v12 = vmul.f32 %v256_v4, %v211_v31  ;;  %v273_v13 = vmul.f32 %v257_v5, %v212_v32  ;;  %v274_v14 = vpack.c.bf16 %v266_v6, %v266_v6 }
 0x1b6   :  { %v275_v15 = vpack.c.bf16 %v267_v7, %v267_v7  ;;  %v276_v16 = vpack.c.bf16 %v268_v8, %v268_v8  ;;  %v277_v17 = vpack.c.bf16 %v269_v9, %v269_v9  ;;  %v278_v18 = vpack.c.bf16 %v270_v10, %v270_v10 }
 0x1b7   :  { %v279_v19 = vpack.c.bf16 %v271_v11, %v271_v11  ;;  %v280_v20 = vpack.c.bf16 %v272_v12, %v272_v12  ;;  %v281_v21 = vpack.c.bf16 %v273_v13, %v273_v13  ;;  %v301_v25 = vunpack.c.l.b16 %v274_v14 }
 0x1b8   :  { %v302_v22 = vunpack.c.l.b16 %v275_v15  ;;  %v303_v23 = vunpack.c.l.b16 %v276_v16  ;;  %v304_v24 = vunpack.c.l.b16 %v277_v17  ;;  %v305_v33 = vunpack.c.l.b16 %v278_v18 }
 0x1b9   :  { %v306_v26 = vunpack.c.l.b16 %v279_v19  ;;  %v307_v29 = vunpack.c.l.b16 %v280_v20  ;;  %v308_v30 = vunpack.c.l.b16 %v281_v21 }
 0x1ba   :  { %v309_v27 = vrot.slane %v302_v22, 7  ;;  %v311_v28 = vrot.slane %v303_v23, 6  ;;  %v313_v32 = vrot.slane %v304_v24, 5  ;;  %v315_v35 = vrot.slane %v305_v33, 4 }
 0x1bb   :  { %v317_v37 = vrot.slane %v306_v26, 3  ;;  %v319_v39 = vrot.slane %v307_v29, 2  ;;  %v321_v41 = vrot.slane %v308_v30, 1 }
 0x1bc   :  { %v310_v31 = vsel %vm168_vm1, %v309_v27, %v301_v25 }
 0x1bd   :  { %v312_v34 = vsel %vm170_vm2, %v311_v28, %v310_v31 }
 0x1be   :  { %v314_v36 = vsel %vm172_vm3, %v313_v32, %v312_v34 }
 0x1bf   :  { %v316_v38 = vsel %vm174_vm4, %v315_v35, %v314_v36 }
 0x1c0   :  { %v318_v40 = vsel %vm176_vm5, %v317_v37, %v316_v38 }
 0x1c1   :  { %v320_v42 = vsel %vm178_vm6, %v319_v39, %v318_v40 }
 0x1c2   :  { %v322_v43 = vsel %vm180_vm7, %v321_v41, %v320_v42 }
 0x1c3   :  { %v323_v44 = vpack.c.b16 %v322_v43, %v322_v43 }
 0x1c5   :  { %499 = vmatmul.mubr.msk.bf16.vlgmr.msra.gmra.mrb[0].mxu0 %vm183_vm8, %v323_v44 }
 0x298   :  { %v373_v49 = vpop.f32.mrb[0].mxu0 }
 0x299   :  { %v374_v50 = vadd.f32 %v478_v48, %v373_v49  ;;  %v500_v51 = vpop.f32.mrb[1].mxu0 }
 0x29a   :  { %v376_v52 = vpop.f32.mrb[2].mxu0 }
 0x29b   :  { %v380_v53 = vmul.f32 0.70710677, %v374_v50  ;;  %v501_v54 = vpop.f32.mrb[3].mxu0  ;;  %v379_v56 = vmul.f32 0.5, %v374_v50 }
 0x29d   :  { %529 = verf.f32 %v380_v53 }
 0x2a7   :  { %v530_v55 = vpop.eup %529 }
 0x2a8   :  { %v382_v58 = vadd.f32 1.0, %v530_v55 }
 0x2aa   :  { %v383_v59 = vmul.f32 %v382_v58, %v379_v56 }
 0x2ac   :  { %v384_v60 = vpack.c.bf16 %v383_v59, %v383_v59 }
 0x2ae   :  { %509 = vmatmul.mubr.msk.bf16.vlgmr.msra.gmra.mrb[0].mxu1 %vm416_vm10, %v384_v60 }
 0x381   :  { %v454_v57 = vpop.f32.mrb[0].mxu1 }
 0x382   :  { %v455_v62 = vadd.f32 %v482_v61, %v454_v57  ;;  %v510_v63 = vpop.f32.mrb[1].mxu1 }
 0x383   :  { %v457_v0 = vpop.f32.mrb[2].mxu1 }
 0x384   :  { %460 = vst [vmem:[#allocation11] sm:$0xff] %v455_v62  ;;  %v511_v1 = vpop.f32.mrb[3].mxu1 }
 0x385   :  { %652 = shalt.err (!%p649_p2)
}
 0x386   :  { %s653_s7 = scalar_lea.hbm %s843_s5, 128 }
 0x387   :  { %p654_p3 = scmp.ne.s32.totalorder %s843_s5, %s653_s7  ;;  %p657_p4 = scmp.lt.u32.totalorder %s653_s7, %s843_s5 }
 0x389   :  { %p659_p5 = pnand %p657_p4, %p654_p3 }
 0x38b   :  { %662 = shalt.err (!%p659_p5)
}
 0x38c   :  { %470 = dma.vmem_to_hbm [thread:$0]  %s468_s28, 128, %s843_s5, [#allocation4]  }
 0x38d   :  { %669 = dma.done.wait [#allocation4], 128  }
 0x38e   :  { %670 = vsyncadd [#allocation4], 4294967168 }
 0x38f   :  { %474 = vsyncpa [#allocation3], 1 }
 0x390   :  { %475 = vsyncpa [#allocation6], 1 }
 0x391   :  { %476 = vsyncpa [#allocation9], 1 }
 0x392   :  { %477 = vsyncpa [#allocation4], 1 }

// kernel: _lambda_.5
= control target key start
LH: loop header
LB: loop body
LE: loop exit
PB: predicated region body
PF: predicated region fallthrough
CT: control target
= control target key end

     0   :  { %20 = vsyncpa [#allocation3], 0  ;;  %s7724_s0 = inlined_call_operand.hbm [shape: f32[8,4,32], index: 0, kind: input, shape index: {}]   ;;  %s7725_s1 = inlined_call_operand.hbm [shape: f32[1,32], index: 1, kind: input, shape index: {}]   ;;  %s7726_s2 = inlined_call_operand.hbm [shape: f32[1,32], index: 2, kind: input, shape index: {}]   ;;  %s7727_s3 = inlined_call_operand.hbm [shape: f32[1,32], index: 3, kind: input, shape index: {}]   ;;  %s7728_s4 = inlined_call_operand.hbm [shape: f32[1,32], index: 4, kind: input, shape index: {}]   ;;  %s7729_s5 = inlined_call_operand.hbm [shape: bf16[32,96], index: 5, kind: input, shape index: {}]   ;;  %s7730_s6 = inlined_call_operand.hbm [shape: f32[1,96], index: 6, kind: input, shape index: {}]   ;;  %s7731_s7 = inlined_call_operand.hbm [shape: bf16[32,32], index: 7, kind: input, shape index: {}]   ;;  %s7732_s8 = inlined_call_operand.hbm [shape: f32[1,32], index: 8, kind: input, shape index: {}]   ;;  %s7733_s9 = inlined_call_operand.hbm [shape: f32[1,32], index: 9, kind: input, shape index: {}]   ;;  %s7734_s10 = inlined_call_operand.hbm [shape: f32[1,32], index: 10, kind: input, shape index: {}]   ;;  %s7735_s11 = inlined_call_operand.hbm [shape: bf16[32,128], index: 11, kind: input, shape index: {}]   ;;  %s7736_s12 = inlined_call_operand.hbm [shape: f32[1,128], index: 12, kind: input, shape index: {}]   ;;  %s7737_s13 = inlined_call_operand.hbm [shape: bf16[128,32], index: 13, kind: input, shape index: {}]   ;;  %s7738_s14 = inlined_call_operand.hbm [shape: f32[1,32], index: 14, kind: input, shape index: {}]   ;;  %s7739_s15 = inlined_call_operand.hbm [shape: f32[8,4,32], index: 15, kind: output, shape index: {}]  }
   0x1   :  { %21 = vsyncpa [#allocation6], 0 }
   0x2   :  { %22 = vsyncpa [#allocation9], 0 }
   0x3   :  { %23 = vsyncpa [#allocation12], 0 }
   0x4   :  { %24 = vsyncpa [#allocation15], 0 }
   0x5   :  { %25 = vsyncpa [#allocation18], 0 }
   0x6   :  { %26 = vsyncpa [#allocation21], 0 }
   0x7   :  { %27 = vsyncpa [#allocation24], 0 }
   0x8   :  { %28 = vsyncpa [#allocation4], 0  ;;  %s6217_s18 = smov [#allocation5]   ;;  %s6218_s20 = smov [#allocation8]  }
   0x9   :  { %s47_s19 = sshll.u32 %s6217_s18, 4  ;;  %s67_s21 = sshll.u32 %s6218_s20, 4  ;;  %s48_s19 = int_to_ptr.vmem [resolvable:$true] %s47_s19  ;;  %s68_s21 = int_to_ptr.vmem [resolvable:$true] %s67_s21 }
   0xa   :  { %s5847_s24 = scalar_lea.hbm %s7725_s1, 16 }
   0xb   :  { %p5848_p0 = scmp.ne.s32.totalorder %s7725_s1, %s5847_s24  ;;  %p5851_p1 = scmp.lt.u32.totalorder %s5847_s24, %s7725_s1 }
   0xd   :  { %p5853_p2 = pnand %p5851_p1, %p5848_p0 }
   0xf   :  { %5856 = shalt.err (!%p5853_p2)
}
  0x10   :  { %s5857_s29 = scalar_lea.vmem %s48_s19, 16  ;;  %s5861_s30 = scalar_lea.vmem %s48_s19, 32 }
  0x11   :  { %p5858_p3 = scmp.ne.s32.totalorder %s48_s19, %s5857_s29  ;;  %p5862_p4 = scmp.lt.s32.totalorder %s48_s19, %s48_s19 }
  0x12   :  { %p5863_p5 = scmp.lt.s32.totalorder %s5861_s30, %s5857_s29 }
  0x14   :  { %p5864_p6 = por %p5863_p5, %p5862_p4 }
  0x16   :  { %p5865_p7 = pnand %p5864_p6, %p5858_p3 }
  0x18   :  { %5868 = shalt.err (!%p5865_p7)
}
  0x19   :  { %50 = dma.hbm_to_vmem [thread:$0]  %s7725_s1, 16, %s48_s19, [#allocation6]  }
  0x1a   :  { %s5869_s22 = scalar_lea.hbm %s7727_s3, 16 }
  0x1b   :  { %p5870_p8 = scmp.ne.s32.totalorder %s7727_s3, %s5869_s22  ;;  %p5873_p9 = scmp.lt.u32.totalorder %s5869_s22, %s7727_s3 }
  0x1d   :  { %p5875_p10 = pnand %p5873_p9, %p5870_p8 }
  0x1f   :  { %5878 = shalt.err (!%p5875_p10)
}
  0x20   :  { %s5879_s27 = scalar_lea.vmem %s68_s21, 16  ;;  %s5883_s28 = scalar_lea.vmem %s68_s21, 32 }
  0x21   :  { %p5880_p11 = scmp.ne.s32.totalorder %s68_s21, %s5879_s27  ;;  %p5884_p12 = scmp.lt.s32.totalorder %s68_s21, %s68_s21 }
  0x22   :  { %p5885_p13 = scmp.lt.s32.totalorder %s5883_s28, %s5879_s27 }
  0x24   :  { %p5886_p0 = por %p5885_p13, %p5884_p12 }
  0x26   :  { %p5887_p1 = pnand %p5886_p0, %p5880_p11 }
  0x28   :  { %5890 = shalt.err (!%p5887_p1)
}
  0x29   :  { %70 = dma.hbm_to_vmem [thread:$0]  %s7727_s3, 16, %s68_s21, [#allocation9]  }
  0x2a   :  { %s6219_s29 = smov [#allocation11]   ;;  %s6220_s16 = smov [#allocation14]  }
  0x2b   :  { %s86_s30 = sshll.u32 %s6219_s29, 4  ;;  %s108_s17 = sshll.u32 %s6220_s16, 4  ;;  %s87_s30 = int_to_ptr.vmem [resolvable:$true] %s86_s30  ;;  %s6354_s17 = int_to_ptr.vmem [resolvable:$true] %s108_s17 }
  0x2c   :  { %s5891_s22 = scalar_lea.hbm %s7729_s5, 256 }
  0x2d   :  { %p5892_p2 = scmp.ne.s32.totalorder %s7729_s5, %s5891_s22  ;;  %p5895_p3 = scmp.lt.u32.totalorder %s5891_s22, %s7729_s5 }
  0x2f   :  { %p5897_p4 = pnand %p5895_p3, %p5892_p2 }
  0x31   :  { %5900 = shalt.err (!%p5897_p4)
}
  0x32   :  { %s5901_s3 = scalar_lea.vmem %s87_s30, 256  ;;  %p5906_p6 = scmp.lt.s32.totalorder %s87_s30, %s87_s30 }
  0x33   :  { %p5902_p5 = scmp.ne.s32.totalorder %s87_s30, %s5901_s3  ;;  %p5907_p7 = scmp.lt.s32.totalorder %s5901_s3, %s5901_s3 }
  0x35   :  { %p5908_p8 = por %p5907_p7, %p5906_p6 }
  0x37   :  { %p5909_p9 = pnand %p5908_p8, %p5902_p5 }
  0x39   :  { %5912 = shalt.err (!%p5909_p9)
}
  0x3a   :  { %s6221_s21 = smov 64   ;;  %s6222_s27 = smov 4  }
  0x3b   :  { %92 = dma.hbm_to_vmem [thread:$0]  %s7729_s5, 256, %s87_s30, [#allocation12], %s6221_s21, %s6221_s21, %s6222_s27  }
  0x3c   :  { %s5913_s16 = scalar_lea.hbm %s7731_s7, 256 }
  0x3d   :  { %p5914_p10 = scmp.ne.s32.totalorder %s7731_s7, %s5913_s16  ;;  %p5917_p11 = scmp.lt.u32.totalorder %s5913_s16, %s7731_s7 }
  0x3f   :  { %p5919_p12 = pnand %p5917_p11, %p5914_p10 }
  0x41   :  { %5922 = shalt.err (!%p5919_p12)
}
  0x42   :  { %s5923_s24 = scalar_lea.vmem %s6354_s17, 256  ;;  %p5928_p0 = scmp.lt.s32.totalorder %s6354_s17, %s6354_s17 }
  0x43   :  { %p5924_p13 = scmp.ne.s32.totalorder %s6354_s17, %s5923_s24  ;;  %p5929_p1 = scmp.lt.s32.totalorder %s5923_s24, %s5923_s24 }
  0x45   :  { %p5930_p2 = por %p5929_p1, %p5928_p0 }
  0x47   :  { %p5931_p3 = pnand %p5930_p2, %p5924_p13 }
  0x49   :  { %5934 = shalt.err (!%p5931_p3)
}
  0x4a   :  { %114 = dma.hbm_to_vmem [thread:$0]  %s7731_s7, 256, %s6354_s17, [#allocation15], %s6221_s21, %s6221_s21, %s6222_s27  }
  0x4b   :  { %s6223_s25 = smov [#allocation17]   ;;  %s6224_s3 = smov [#allocation20]  }
  0x4c   :  { %s131_s26 = sshll.u32 %s6223_s25, 4  ;;  %s150_s28 = sshll.u32 %s6224_s3, 4  ;;  %s132_s26 = int_to_ptr.vmem [resolvable:$true] %s131_s26  ;;  %s6391_s28 = int_to_ptr.vmem [resolvable:$true] %s150_s28 }
  0x4d   :  { %s5935_s29 = scalar_lea.hbm %s7733_s9, 16 }
  0x4e   :  { %p5936_p4 = scmp.ne.s32.totalorder %s7733_s9, %s5935_s29  ;;  %p5939_p5 = scmp.lt.u32.totalorder %s5935_s29, %s7733_s9 }
  0x50   :  { %p5941_p6 = pnand %p5939_p5, %p5936_p4 }
  0x52   :  { %5944 = shalt.err (!%p5941_p6)
}
  0x53   :  { %s5945_s7 = scalar_lea.vmem %s132_s26, 16  ;;  %s5949_s17 = scalar_lea.vmem %s132_s26, 32 }
  0x54   :  { %p5946_p7 = scmp.ne.s32.totalorder %s132_s26, %s5945_s7  ;;  %p5950_p8 = scmp.lt.s32.totalorder %s132_s26, %s132_s26 }
  0x55   :  { %p5951_p9 = scmp.lt.s32.totalorder %s5949_s17, %s5945_s7 }
  0x57   :  { %p5952_p10 = por %p5951_p9, %p5950_p8 }
  0x59   :  { %p5953_p11 = pnand %p5952_p10, %p5946_p7 }
  0x5b   :  { %5956 = shalt.err (!%p5953_p11)
}
  0x5c   :  { %134 = dma.hbm_to_vmem [thread:$0]  %s7733_s9, 16, %s132_s26, [#allocation18]  }
  0x5d   :  { %s5957_s25 = scalar_lea.hbm %s7735_s11, 256 }
  0x5e   :  { %p5958_p12 = scmp.ne.s32.totalorder %s7735_s11, %s5957_s25  ;;  %p5961_p13 = scmp.lt.u32.totalorder %s5957_s25, %s7735_s11 }
  0x60   :  { %p5963_p0 = pnand %p5961_p13, %p5958_p12 }
  0x62   :  { %5966 = shalt.err (!%p5963_p0)
}
  0x63   :  { %s5967_s16 = scalar_lea.vmem %s6391_s28, 256  ;;  %p5972_p2 = scmp.lt.s32.totalorder %s6391_s28, %s6391_s28 }
  0x64   :  { %p5968_p1 = scmp.ne.s32.totalorder %s6391_s28, %s5967_s16  ;;  %p5973_p3 = scmp.lt.s32.totalorder %s5967_s16, %s5967_s16 }
  0x66   :  { %p5974_p4 = por %p5973_p3, %p5972_p2 }
  0x68   :  { %p5975_p5 = pnand %p5974_p4, %p5968_p1 }
  0x6a   :  { %5978 = shalt.err (!%p5975_p5)
}
  0x6b   :  { %156 = dma.hbm_to_vmem [thread:$0]  %s7735_s11, 256, %s6391_s28, [#allocation21], %s6221_s21, %s6221_s21, %s6222_s27  }
  0x6c   :  { %s6225_s18 = smov [#allocation23]   ;;  %s6226_s22 = smov [#allocation2]  }
  0x6d   :  { %s172_s20 = sshll.u32 %s6225_s18, 4  ;;  %s34_s7 = sshll.u32 %s6226_s22, 4  ;;  %s173_s20 = int_to_ptr.vmem [resolvable:$true] %s172_s20  ;;  %s6425_s7 = int_to_ptr.vmem [resolvable:$true] %s34_s7 }
  0x6e   :  { %s5979_s24 = scalar_lea.hbm %s7737_s13, 1024 }
  0x6f   :  { %p5980_p6 = scmp.ne.s32.totalorder %s7737_s13, %s5979_s24  ;;  %p5983_p7 = scmp.lt.u32.totalorder %s5979_s24, %s7737_s13 }
  0x71   :  { %p5985_p8 = pnand %p5983_p7, %p5980_p6 }
  0x73   :  { %5988 = shalt.err (!%p5985_p8)
}
  0x74   :  { %s5989_s11 = scalar_lea.vmem %s173_s20, 1024  ;;  %p5994_p10 = scmp.lt.s32.totalorder %s173_s20, %s173_s20 }
  0x75   :  { %p5990_p9 = scmp.ne.s32.totalorder %s173_s20, %s5989_s11  ;;  %p5995_p11 = scmp.lt.s32.totalorder %s5989_s11, %s5989_s11 }
  0x77   :  { %p5996_p12 = por %p5995_p11, %p5994_p10 }
  0x79   :  { %p5997_p13 = pnand %p5996_p12, %p5990_p9 }
  0x7b   :  { %6000 = shalt.err (!%p5997_p13)
}
  0x7c   :  { %178 = dma.hbm_to_vmem [thread:$0]  %s7737_s13, 1024, %s173_s20, [#allocation24], %s6221_s21, %s6221_s21, %s6222_s27  }
  0x7d   :  { %s6001_s16 = scalar_lea.hbm %s7724_s0, 512 }
  0x7e   :  { %p6002_p0 = scmp.ne.s32.totalorder %s7724_s0, %s6001_s16  ;;  %p6005_p1 = scmp.lt.u32.totalorder %s6001_s16, %s7724_s0 }
  0x80   :  { %p6007_p2 = pnand %p6005_p1, %p6002_p0 }
  0x82   :  { %6010 = shalt.err (!%p6007_p2)
}
  0x83   :  { %s6011_s17 = scalar_lea.vmem %s6425_s7, 512  ;;  %p6016_p4 = scmp.lt.s32.totalorder %s6425_s7, %s6425_s7 }
  0x84   :  { %p6012_p3 = scmp.ne.s32.totalorder %s6425_s7, %s6011_s17  ;;  %p6017_p5 = scmp.lt.s32.totalorder %s6011_s17, %s6011_s17 }
  0x86   :  { %p6018_p6 = por %p6017_p5, %p6016_p4 }
  0x88   :  { %p6019_p7 = pnand %p6018_p6, %p6012_p3 }
  0x8a   :  { %6022 = shalt.err (!%p6019_p7)
}
  0x8b   :  { %40 = dma.hbm_to_vmem [thread:$0]  %s7724_s0, 512, %s6425_s7, [#allocation3], %s6221_s21, %s6221_s21, %s6222_s27  }
  0x8c   :  { %s6227_s23 = smov [#allocation7]   ;;  %s6228_s5 = smov [#allocation10]  }
  0x8d   :  { %s57_s24 = sshll.u32 %s6227_s23, 4  ;;  %s77_s30 = sshll.u32 %s6228_s5, 4  ;;  %s58_s24 = int_to_ptr.vmem [resolvable:$true] %s57_s24  ;;  %s78_s30 = int_to_ptr.vmem [resolvable:$true] %s77_s30 }
  0x8e   :  { %s6023_s11 = scalar_lea.hbm %s7726_s2, 16 }
  0x8f   :  { %p6024_p8 = scmp.ne.s32.totalorder %s7726_s2, %s6023_s11  ;;  %p6027_p9 = scmp.lt.u32.totalorder %s6023_s11, %s7726_s2 }
  0x91   :  { %p6029_p10 = pnand %p6027_p9, %p6024_p8 }
  0x93   :  { %6032 = shalt.err (!%p6029_p10)
}
  0x94   :  { %s6033_s0 = scalar_lea.vmem %s58_s24, 16  ;;  %s6037_s7 = scalar_lea.vmem %s58_s24, 32 }
  0x95   :  { %p6034_p11 = scmp.ne.s32.totalorder %s58_s24, %s6033_s0  ;;  %p6038_p12 = scmp.lt.s32.totalorder %s58_s24, %s58_s24 }
  0x96   :  { %p6039_p13 = scmp.lt.s32.totalorder %s6037_s7, %s6033_s0 }
  0x98   :  { %p6040_p0 = por %p6039_p13, %p6038_p12 }
  0x9a   :  { %p6041_p1 = pnand %p6040_p0, %p6034_p11 }
  0x9c   :  { %6044 = shalt.err (!%p6041_p1)
}
  0x9d   :  { %60 = dma.hbm_to_vmem [thread:$0]  %s7726_s2, 16, %s58_s24, [#allocation6]  }
  0x9e   :  { %s6045_s22 = scalar_lea.hbm %s7728_s4, 16 }
  0x9f   :  { %p6046_p2 = scmp.ne.s32.totalorder %s7728_s4, %s6045_s22  ;;  %p6049_p3 = scmp.lt.u32.totalorder %s6045_s22, %s7728_s4 }
  0xa1   :  { %p6051_p4 = pnand %p6049_p3, %p6046_p2 }
  0xa3   :  { %6054 = shalt.err (!%p6051_p4)
}
  0xa4   :  { %s6055_s5 = scalar_lea.vmem %s78_s30, 16  ;;  %s6059_s25 = scalar_lea.vmem %s78_s30, 32 }
  0xa5   :  { %p6056_p5 = scmp.ne.s32.totalorder %s78_s30, %s6055_s5  ;;  %p6060_p6 = scmp.lt.s32.totalorder %s78_s30, %s78_s30 }
  0xa6   :  { %p6061_p7 = scmp.lt.s32.totalorder %s6059_s25, %s6055_s5 }
  0xa8   :  { %p6062_p8 = por %p6061_p7, %p6060_p6 }
  0xaa   :  { %p6063_p9 = pnand %p6062_p8, %p6056_p5 }
  0xac   :  { %6066 = shalt.err (!%p6063_p9)
}
  0xad   :  { %80 = dma.hbm_to_vmem [thread:$0]  %s7728_s4, 16, %s78_s30, [#allocation9]  }
  0xae   :  { %s6229_s3 = smov [#allocation13]   ;;  %s6230_s28 = smov [#allocation16]  }
  0xaf   :  { %s99_s11 = sshll.u32 %s6229_s3, 4  ;;  %s121_s1 = sshll.u32 %s6230_s28, 4  ;;  %s100_s11 = int_to_ptr.vmem [resolvable:$true] %s99_s11  ;;  %s122_s1 = int_to_ptr.vmem [resolvable:$true] %s121_s1 }
  0xb0   :  { %s6067_s0 = scalar_lea.hbm %s7730_s6, 16 }
  0xb1   :  { %p6068_p10 = scmp.ne.s32.totalorder %s7730_s6, %s6067_s0  ;;  %p6071_p11 = scmp.lt.u32.totalorder %s6067_s0, %s7730_s6 }
  0xb3   :  { %p6073_p12 = pnand %p6071_p11, %p6068_p10 }
  0xb5   :  { %6076 = shalt.err (!%p6073_p12)
}
  0xb6   :  { %s6077_s4 = scalar_lea.vmem %s100_s11, 16  ;;  %s6081_s30 = scalar_lea.vmem %s100_s11, 32 }
  0xb7   :  { %p6078_p13 = scmp.ne.s32.totalorder %s100_s11, %s6077_s4  ;;  %p6082_p0 = scmp.lt.s32.totalorder %s100_s11, %s100_s11 }
  0xb8   :  { %p6083_p1 = scmp.lt.s32.totalorder %s6081_s30, %s6077_s4 }
  0xba   :  { %p6084_p2 = por %p6083_p1, %p6082_p0 }
  0xbc   :  { %p6085_p3 = pnand %p6084_p2, %p6078_p13 }
  0xbe   :  { %6088 = shalt.err (!%p6085_p3)
}
  0xbf   :  { %102 = dma.hbm_to_vmem [thread:$0]  %s7730_s6, 16, %s100_s11, [#allocation12]  }
  0xc0   :  { %s6089_s20 = scalar_lea.hbm %s7732_s8, 16 }
  0xc1   :  { %p6090_p4 = scmp.ne.s32.totalorder %s7732_s8, %s6089_s20  ;;  %p6093_p5 = scmp.lt.u32.totalorder %s6089_s20, %s7732_s8 }
  0xc3   :  { %p6095_p6 = pnand %p6093_p5, %p6090_p4 }
  0xc5   :  { %6098 = shalt.err (!%p6095_p6)
}
  0xc6   :  { %s6099_s24 = scalar_lea.vmem %s122_s1, 16  ;;  %s6103_s3 = scalar_lea.vmem %s122_s1, 32 }
  0xc7   :  { %p6100_p7 = scmp.ne.s32.totalorder %s122_s1, %s6099_s24  ;;  %p6104_p8 = scmp.lt.s32.totalorder %s122_s1, %s122_s1 }
  0xc8   :  { %p6105_p9 = scmp.lt.s32.totalorder %s6103_s3, %s6099_s24 }
  0xca   :  { %p6106_p10 = por %p6105_p9, %p6104_p8 }
  0xcc   :  { %p6107_p11 = pnand %p6106_p10, %p6100_p7 }
  0xce   :  { %6110 = shalt.err (!%p6107_p11)
}
  0xcf   :  { %124 = dma.hbm_to_vmem [thread:$0]  %s7732_s8, 16, %s122_s1, [#allocation15]  }
  0xd0   :  { %s6231_s28 = smov [#allocation19]   ;;  %s6232_s29 = smov [#allocation22]  }
  0xd1   :  { %s141_s19 = sshll.u32 %s6231_s28, 4  ;;  %s163_s0 = sshll.u32 %s6232_s29, 4  ;;  %s142_s19 = int_to_ptr.vmem [resolvable:$true] %s141_s19  ;;  %s164_s0 = int_to_ptr.vmem [resolvable:$true] %s163_s0 }
  0xd2   :  { %s6111_s9 = scalar_lea.hbm %s7734_s10, 16 }
  0xd3   :  { %p6112_p12 = scmp.ne.s32.totalorder %s7734_s10, %s6111_s9  ;;  %p6115_p13 = scmp.lt.u32.totalorder %s6111_s9, %s7734_s10 }
  0xd5   :  { %p6117_p0 = pnand %p6115_p13, %p6112_p12 }
  0xd7   :  { %6120 = shalt.err (!%p6117_p0)
}
  0xd8   :  { %s6121_s8 = scalar_lea.vmem %s142_s19, 16  ;;  %s6125_s1 = scalar_lea.vmem %s142_s19, 32 }
  0xd9   :  { %p6122_p1 = scmp.ne.s32.totalorder %s142_s19, %s6121_s8  ;;  %p6126_p2 = scmp.lt.s32.totalorder %s142_s19, %s142_s19 }
  0xda   :  { %p6127_p3 = scmp.lt.s32.totalorder %s6125_s1, %s6121_s8 }
  0xdc   :  { %p6128_p4 = por %p6127_p3, %p6126_p2 }
  0xde   :  { %p6129_p5 = pnand %p6128_p4, %p6122_p1 }
  0xe0   :  { %6132 = shalt.err (!%p6129_p5)
}
  0xe1   :  { %144 = dma.hbm_to_vmem [thread:$0]  %s7734_s10, 16, %s142_s19, [#allocation18]  }
  0xe2   :  { %s6133_s23 = scalar_lea.hbm %s7736_s12, 16 }
  0xe3   :  { %p6134_p6 = scmp.ne.s32.totalorder %s7736_s12, %s6133_s23  ;;  %p6137_p7 = scmp.lt.u32.totalorder %s6133_s23, %s7736_s12 }
  0xe5   :  { %p6139_p8 = pnand %p6137_p7, %p6134_p6 }
  0xe7   :  { %6142 = shalt.err (!%p6139_p8)
}
  0xe8   :  { %s6143_s3 = scalar_lea.vmem %s164_s0, 16  ;;  %s6147_s6 = scalar_lea.vmem %s164_s0, 32 }
  0xe9   :  { %p6144_p9 = scmp.ne.s32.totalorder %s164_s0, %s6143_s3  ;;  %p6148_p10 = scmp.lt.s32.totalorder %s164_s0, %s164_s0 }
  0xea   :  { %p6149_p11 = scmp.lt.s32.totalorder %s6147_s6, %s6143_s3 }
  0xec   :  { %p6150_p12 = por %p6149_p11, %p6148_p10 }
  0xee   :  { %p6151_p13 = pnand %p6150_p12, %p6144_p9 }
  0xf0   :  { %6154 = shalt.err (!%p6151_p13)
}
  0xf1   :  { %166 = dma.hbm_to_vmem [thread:$0]  %s7736_s12, 16, %s164_s0, [#allocation21]  }
  0xf2   :  { %s6233_s28 = smov [#allocation25]   ;;  %s6155_s16 = scalar_lea.hbm %s7738_s14, 16 }
  0xf3   :  { %s185_s19 = sshll.u32 %s6233_s28, 4  ;;  %p6156_p0 = scmp.ne.s32.totalorder %s7738_s14, %s6155_s16  ;;  %s186_s19 = int_to_ptr.vmem [resolvable:$true] %s185_s19 }
  0xf4   :  { %p6159_p1 = scmp.lt.u32.totalorder %s6155_s16, %s7738_s14 }
  0xf6   :  { %p6161_p2 = pnand %p6159_p1, %p6156_p0 }
  0xf8   :  { %6164 = shalt.err (!%p6161_p2)
}
  0xf9   :  { %s6165_s18 = scalar_lea.vmem %s186_s19, 16  ;;  %s6169_s12 = scalar_lea.vmem %s186_s19, 32 }
  0xfa   :  { %p6166_p3 = scmp.ne.s32.totalorder %s186_s19, %s6165_s18  ;;  %p6170_p4 = scmp.lt.s32.totalorder %s186_s19, %s186_s19 }
  0xfb   :  { %p6171_p5 = scmp.lt.s32.totalorder %s6169_s12, %s6165_s18 }
  0xfd   :  { %p6172_p6 = por %p6171_p5, %p6170_p4 }
  0xff   :  { %p6173_p7 = pnand %p6172_p6, %p6166_p3 }
 0x101   :  { %6176 = shalt.err (!%p6173_p7)
}
 0x102   :  { %188 = dma.hbm_to_vmem [thread:$0]  %s7738_s14, 16, %s186_s19, [#allocation24]  }
 0x103   :  { %6199 = dma.done.wait [#allocation3], 512  }
 0x104   :  { %6200 = vsyncadd [#allocation3], 4294966784 }
 0x105   :  { %6201 = dma.done.wait [#allocation6], 32  }
 0x106   :  { %6202 = vsyncadd [#allocation6], 4294967264 }
 0x107   :  { %6203 = dma.done.wait [#allocation9], 32  }
 0x108   :  { %6204 = vsyncadd [#allocation9], 4294967264 }
 0x109   :  { %6205 = dma.done.wait [#allocation12], 272  }
 0x10a   :  { %6206 = vsyncadd [#allocation12], 4294967024 }
 0x10b   :  { %6207 = dma.done.wait [#allocation15], 272  }
 0x10c   :  { %6208 = vsyncadd [#allocation15], 4294967024 }
 0x10d   :  { %6209 = dma.done.wait [#allocation18], 32  }
 0x10e   :  { %6210 = vsyncadd [#allocation18], 4294967264 }
 0x10f   :  { %6211 = dma.done.wait [#allocation21], 272  }
 0x110   :  { %6212 = vsyncadd [#allocation21], 4294967024 }
 0x111   :  { %6213 = dma.done.wait [#allocation24], 1040  }
 0x112   :  { %6214 = vsyncadd [#allocation24], 4294966256  ;;  %vm245_vm0 = vcmask 257024   ;;  %v235_v0 = vld [vmem:[#allocation2] sm:$0xf]  ;;  %vm547_vm1 = vcmask 261120  }
 0x113   :  { %v237_v1 = vld [vmem:[#allocation2 + $0x8] sm:$0xf]  ;;  %v236_v2 = vld [vmem:[#allocation2 + $0x4] sm:$0xf]  ;;  %v246_v3 = vsel %vm245_vm0, %v235_v0, 0.0  ;;  %vm6235_vm2 = vmmov 0  }
 0x114   :  { %v252_v4 = vsel %vm245_vm0, %v237_v1, 0.0  ;;  %v238_v5 = vld [vmem:[#allocation2 + $0xc] sm:$0xf]  ;;  %247 = vadd.xlane.f32.xlu0 %v246_v3  ;;  %v249_v6 = vsel %vm245_vm0, %v236_v2, 0.0  ;;  %v239_v8 = vld [vmem:[#allocation2 + $0x10] sm:$0xf] }
 0x115   :  { %253 = vadd.xlane.f32.xlu1 %v252_v4  ;;  %v255_v7 = vsel %vm245_vm0, %v238_v5, 0.0  ;;  %v240_v9 = vld [vmem:[#allocation2 + $0x14] sm:$0xf]  ;;  %v258_v10 = vsel %vm245_vm0, %v239_v8, 0.0  ;;  %v241_v12 = vld [vmem:[#allocation2 + $0x18] sm:$0xf] }
 0x116   :  { %v261_v11 = vsel %vm245_vm0, %v240_v9, 0.0  ;;  %v242_v13 = vld [vmem:[#allocation2 + $0x1c] sm:$0xf]  ;;  %v264_v14 = vsel %vm245_vm0, %v241_v12, 0.0  ;;  %s6236_s14 = smov 96   ;;  %vm641_vm3 = vcmask 64512  }
 0x117   :  { %v267_v15 = vsel %vm245_vm0, %v242_v13, 0.0  ;;  %vm1142_vm4 = vcmask 1041408   ;;  %vm1039_vm5 = vcmask 27648   ;;  %s6237_s1 = smov 88   ;;  %s6238_s22 = smov 120   ;;  %vm1138_vm6 = vcmask 31744  }
 0x118   :  { %250 = vadd.xlane.f32.xlu0 %v249_v6  ;;  %s6239_s17 = smov 56   ;;  %s6240_s13 = smov 80   ;;  %vm4290_vm7 = vcmask 130048   ;;  %vm4299_vm8 = vcmask 195584  }
 0x119   :  { %256 = vadd.xlane.f32.xlu1 %v255_v7  ;;  %s6241_s20 = smov 112   ;;  %s6242_s23 = smov 48  }
 0x11a   :  { %s6243_s5 = smov 72   ;;  %s6244_s25 = smov 104  }
 0x11b   :  { %s6245_s2 = smov 40   ;;  %s6246_s24 = smov 8  }
 0x11c   :  { %259 = vadd.xlane.f32.xlu0 %v258_v10  ;;  %s6247_s3 = smov 16   ;;  %s6248_s6 = smov 24  }
 0x11d   :  { %262 = vadd.xlane.f32.xlu1 %v261_v11  ;;  %s6249_s10 = smov [#allocation26]  }
 0x11e   :  { %s4909_s11 = sshll.u32 %s6249_s10, 4  ;;  %s4910_s11 = int_to_ptr.vmem [resolvable:$true] %s4909_s11 }
 0x11f   :  { %s6177_s28 = scalar_lea.vmem %s4910_s11, 512  ;;  %p6182_p9 = scmp.lt.s32.totalorder %s4910_s11, %s4910_s11 }
 0x120   :  { %265 = vadd.xlane.f32.xlu0 %v264_v14  ;;  %v4928_v14 = vld [vmem:[#allocation5] ss:$0 sm:$0xff]  ;;  %p6178_p8 = scmp.ne.s32.totalorder %s4910_s11, %s6177_s28  ;;  %p6183_p10 = scmp.lt.s32.totalorder %s6177_s28, %s6177_s28 }
 0x121   :  { %268 = vadd.xlane.f32.xlu1 %v267_v15 }
 0x122   :  { %p6184_p11 = por %p6183_p10, %p6182_p9 }
 0x124   :  { %p6185_p12 = pnand %p6184_p11, %p6178_p8 }
 0x1a1   :  { %v248_v16 = vpop.xlane.xlu0 %247 }
 0x1a2   :  { %v254_v17 = vpop.xlane.xlu1 %253  ;;  %v271_v18 = vmul.f32 0.03125, %v248_v16 }
 0x1a3   :  { %v273_v19 = vmul.f32 0.03125, %v254_v17 }
 0x1a4   :  { %v6554_v20 = vsub.f32 %v235_v0, %v271_v18  ;;  %v4929_v18 = vld [vmem:[#allocation7] ss:$0 sm:$0xff] }
 0x1a5   :  { %v6556_v21 = vsub.f32 %v237_v1, %v273_v19  ;;  %v251_v22 = vpop.xlane.xlu0 %250 }
 0x1a6   :  { %v257_v23 = vpop.xlane.xlu1 %256  ;;  %v272_v24 = vmul.f32 0.03125, %v251_v22  ;;  %v287_v26 = vmul.f32 %v6554_v20, %v6554_v20 }
 0x1a7   :  { %v274_v25 = vmul.f32 0.03125, %v257_v23  ;;  %v289_v27 = vmul.f32 %v6556_v21, %v6556_v21 }
 0x1a8   :  { %v6562_v28 = vsub.f32 %v236_v2, %v272_v24  ;;  %v295_v30 = vsel %vm245_vm0, %v287_v26, 0.0 }
 0x1a9   :  { %v6564_v29 = vsub.f32 %v238_v5, %v274_v25  ;;  %296 = vadd.xlane.f32.xlu0 %v295_v30  ;;  %v260_v31 = vpop.xlane.xlu0 %259  ;;  %v301_v33 = vsel %vm245_vm0, %v289_v27, 0.0 }
 0x1aa   :  { %v263_v32 = vpop.xlane.xlu1 %262  ;;  %v275_v34 = vmul.f32 0.03125, %v260_v31  ;;  %v288_v36 = vmul.f32 %v6562_v28, %v6562_v28 }
 0x1ab   :  { %v276_v35 = vmul.f32 0.03125, %v263_v32  ;;  %v290_v37 = vmul.f32 %v6564_v29, %v6564_v29 }
 0x1ac   :  { %v6572_v38 = vsub.f32 %v239_v8, %v275_v34  ;;  %v298_v40 = vsel %vm245_vm0, %v288_v36, 0.0 }
 0x1ad   :  { %v6574_v39 = vsub.f32 %v240_v9, %v276_v35  ;;  %302 = vadd.xlane.f32.xlu0 %v301_v33  ;;  %299 = vadd.xlane.f32.xlu1 %v298_v40  ;;  %v266_v41 = vpop.xlane.xlu0 %265  ;;  %v304_v43 = vsel %vm245_vm0, %v290_v37, 0.0 }
 0x1ae   :  { %v269_v42 = vpop.xlane.xlu1 %268  ;;  %v277_v44 = vmul.f32 0.03125, %v266_v41  ;;  %v291_v46 = vmul.f32 %v6572_v38, %v6572_v38 }
 0x1af   :  { %v278_v45 = vmul.f32 0.03125, %v269_v42  ;;  %v292_v47 = vmul.f32 %v6574_v39, %v6574_v39 }
 0x1b0   :  { %v6582_v48 = vsub.f32 %v241_v12, %v277_v44  ;;  %v307_v50 = vsel %vm245_vm0, %v291_v46, 0.0 }
 0x1b1   :  { %v6584_v49 = vsub.f32 %v242_v13, %v278_v45  ;;  %305 = vadd.xlane.f32.xlu1 %v304_v43  ;;  %308 = vadd.xlane.f32.xlu0 %v307_v50  ;;  %v310_v51 = vsel %vm245_vm0, %v292_v47, 0.0 }
 0x1b2   :  { %v293_v52 = vmul.f32 %v6582_v48, %v6582_v48 }
 0x1b3   :  { %v294_v53 = vmul.f32 %v6584_v49, %v6584_v49 }
 0x1b4   :  { %v313_v54 = vsel %vm245_vm0, %v293_v52, 0.0 }
 0x1b5   :  { %311 = vadd.xlane.f32.xlu1 %v310_v51  ;;  %314 = vadd.xlane.f32.xlu0 %v313_v54  ;;  %v316_v55 = vsel %vm245_vm0, %v294_v53, 0.0 }
 0x1b9   :  { %317 = vadd.xlane.f32.xlu1 %v316_v55 }
 0x236   :  { %v297_v56 = vpop.xlane.xlu0 %296 }
 0x237   :  { %v319_v57 = vmul.f32 0.03125, %v297_v56 }
 0x239   :  { %v327_v58 = vadd.f32 1e-05, %v319_v57 }
 0x23a   :  { %v300_v59 = vpop.xlane.xlu1 %299  ;;  %v303_v60 = vpop.xlane.xlu0 %302 }
 0x23b   :  { %5647 = vrsqrt.f32 %v327_v58  ;;  %v320_v61 = vmul.f32 0.03125, %v300_v59  ;;  %v321_v62 = vmul.f32 0.03125, %v303_v60 }
 0x23d   :  { %v328_v63 = vadd.f32 1e-05, %v320_v61  ;;  %v329_v0 = vadd.f32 1e-05, %v321_v62 }
 0x23e   :  { %v306_v1 = vpop.xlane.xlu1 %305  ;;  %v309_v2 = vpop.xlane.xlu0 %308 }
 0x23f   :  { %5649 = vrsqrt.f32 %v328_v63  ;;  %v322_v3 = vmul.f32 0.03125, %v306_v1  ;;  %v323_v4 = vmul.f32 0.03125, %v309_v2 }
 0x240   :  { %5651 = vrsqrt.f32 %v329_v0 }
 0x241   :  { %v330_v5 = vadd.f32 1e-05, %v322_v3  ;;  %v331_v6 = vadd.f32 1e-05, %v323_v4 }
 0x242   :  { %v312_v7 = vpop.xlane.xlu1 %311  ;;  %v315_v8 = vpop.xlane.xlu0 %314 }
 0x243   :  { %5653 = vrsqrt.f32 %v330_v5  ;;  %v324_v9 = vmul.f32 0.03125, %v312_v7  ;;  %v325_v10 = vmul.f32 0.03125, %v315_v8 }
 0x244   :  { %5655 = vrsqrt.f32 %v331_v6 }
 0x245   :  { %v5648_v11 = vpop.eup %5647  ;;  %v332_v12 = vadd.f32 1e-05, %v324_v9  ;;  %v333_v13 = vadd.f32 1e-05, %v325_v10 }
 0x246   :  { %v318_v15 = vpop.xlane.xlu1 %317  ;;  %v343_v16 = vmul.f32 %v5648_v11, %v6554_v20 }
 0x247   :  { %5657 = vrsqrt.f32 %v332_v12  ;;  %v326_v17 = vmul.f32 0.03125, %v318_v15 }
 0x248   :  { %5659 = vrsqrt.f32 %v333_v13  ;;  %v357_v19 = vmul.f32 %v4928_v14, %v343_v16 }
 0x249   :  { %v5650_v22 = vpop.eup %5649  ;;  %v334_v23 = vadd.f32 1e-05, %v326_v17 }
 0x24a   :  { %v5652_v24 = vpop.eup %5651  ;;  %v6595_v25 = vadd.f32 %v4929_v18, %v357_v19  ;;  %v344_v26 = vmul.f32 %v5650_v22, %v6562_v28 }
 0x24b   :  { %5661 = vrsqrt.f32 %v334_v23  ;;  %v345_v27 = vmul.f32 %v5652_v24, %v6556_v21 }
 0x24c   :  { %v381_v30 = vsel %vm245_vm0, %v6595_v25, 0.0  ;;  %v358_v31 = vmul.f32 %v4928_v14, %v344_v26 }
 0x24d   :  { %v5654_v20 = vpop.eup %5653  ;;  %382 = vadd.xlane.f32.xlu0 %v381_v30  ;;  %v359_v32 = vmul.f32 %v4928_v14, %v345_v27 }
 0x24e   :  { %v5656_v33 = vpop.eup %5655  ;;  %v6601_v34 = vadd.f32 %v4929_v18, %v358_v31  ;;  %v346_v35 = vmul.f32 %v5654_v20, %v6564_v29 }
 0x24f   :  { %v6604_v36 = vadd.f32 %v4929_v18, %v359_v32  ;;  %v347_v37 = vmul.f32 %v5656_v33, %v6572_v38 }
 0x250   :  { %v384_v28 = vsel %vm245_vm0, %v6601_v34, 0.0  ;;  %v360_v21 = vmul.f32 %v4928_v14, %v346_v35 }
 0x251   :  { %v5658_v40 = vpop.eup %5657  ;;  %385 = vadd.xlane.f32.xlu1 %v384_v28  ;;  %v387_v41 = vsel %vm245_vm0, %v6604_v36, 0.0  ;;  %v361_v42 = vmul.f32 %v4928_v14, %v347_v37 }
 0x252   :  { %v5660_v43 = vpop.eup %5659  ;;  %388 = vadd.xlane.f32.xlu0 %v387_v41  ;;  %v6611_v44 = vadd.f32 %v4929_v18, %v360_v21  ;;  %v348_v29 = vmul.f32 %v5658_v40, %v6574_v39  ;;  %v5633_v40 = vld [vmem:[#allocation11] sm:$0xff]   ;;  %v5634_v41 = vld [vmem:[#allocation11 + $0x8] sm:$0xff]  }
 0x253   :  { %v6614_v45 = vadd.f32 %v4929_v18, %v361_v42  ;;  %v349_v38 = vmul.f32 %v5660_v43, %v6582_v48  ;;  %5172 = vmatprep.subr.bf16.mxu0 %v5633_v40 }
 0x254   :  { %v390_v46 = vsel %vm245_vm0, %v6611_v44, 0.0  ;;  %v362_v47 = vmul.f32 %v4928_v14, %v348_v29  ;;  %5173 = vmatpush3.bf16.msra.mxu0 %v5633_v40 }
 0x255   :  { %v5662_v50 = vpop.eup %5661  ;;  %391 = vadd.xlane.f32.xlu1 %v390_v46  ;;  %v393_v51 = vsel %vm245_vm0, %v6614_v45, 0.0  ;;  %v363_v52 = vmul.f32 %v4928_v14, %v349_v38  ;;  %5174 = vmatprep.subr.bf16.mxu0 %v5634_v41 }
 0x256   :  { %394 = vadd.xlane.f32.xlu0 %v393_v51  ;;  %v6621_v53 = vadd.f32 %v4929_v18, %v362_v47  ;;  %v350_v54 = vmul.f32 %v5662_v50, %v6584_v49 }
 0x257   :  { %v6624_v39 = vadd.f32 %v4929_v18, %v363_v52 }
 0x258   :  { %v396_v48 = vsel %vm245_vm0, %v6621_v53, 0.0  ;;  %v364_v55 = vmul.f32 %v4928_v14, %v350_v54  ;;  %5175 = vmatpush3.bf16.msra.mxu0 %v5634_v41 }
 0x259   :  { %397 = vadd.xlane.f32.xlu1 %v396_v48  ;;  %v399_v56 = vsel %vm245_vm0, %v6624_v39, 0.0 }
 0x25a   :  { %400 = vadd.xlane.f32.xlu0 %v399_v56  ;;  %v6630_v57 = vadd.f32 %v4929_v18, %v364_v55 }
 0x25c   :  { %v402_v58 = vsel %vm245_vm0, %v6630_v57, 0.0 }
 0x25d   :  { %403 = vadd.xlane.f32.xlu1 %v402_v58 }
 0x2da   :  { %v383_v59 = vpop.xlane.xlu0 %382 }
 0x2db   :  { %v405_v60 = vmul.f32 0.03125, %v383_v59 }
 0x2dd   :  { %v6635_v49 = vsub.f32 %v6595_v25, %v405_v60 }
 0x2de   :  { %v386_v61 = vpop.xlane.xlu1 %385 }
 0x2df   :  { %v406_v62 = vmul.f32 0.03125, %v386_v61  ;;  %v389_v63 = vpop.xlane.xlu0 %388  ;;  %v421_v0 = vmul.f32 %v6635_v49, %v6635_v49 }
 0x2e0   :  { %v407_v1 = vmul.f32 0.03125, %v389_v63 }
 0x2e1   :  { %v6640_v2 = vsub.f32 %v6601_v34, %v406_v62  ;;  %v429_v3 = vsel %vm245_vm0, %v421_v0, 0.0 }
 0x2e2   :  { %v6644_v4 = vsub.f32 %v6604_v36, %v407_v1  ;;  %v392_v5 = vpop.xlane.xlu1 %391  ;;  %430 = vadd.xlane.f32.xlu0 %v429_v3 }
 0x2e3   :  { %v408_v6 = vmul.f32 0.03125, %v392_v5  ;;  %v395_v7 = vpop.xlane.xlu0 %394  ;;  %v422_v8 = vmul.f32 %v6640_v2, %v6640_v2 }
 0x2e4   :  { %v409_v9 = vmul.f32 0.03125, %v395_v7  ;;  %v423_v10 = vmul.f32 %v6644_v4, %v6644_v4 }
 0x2e5   :  { %v6651_v11 = vsub.f32 %v6611_v44, %v408_v6  ;;  %v432_v12 = vsel %vm245_vm0, %v422_v8, 0.0 }
 0x2e6   :  { %v6655_v13 = vsub.f32 %v6614_v45, %v409_v9  ;;  %433 = vadd.xlane.f32.xlu1 %v432_v12  ;;  %v398_v14 = vpop.xlane.xlu1 %397  ;;  %v435_v15 = vsel %vm245_vm0, %v423_v10, 0.0  ;;  %v4930_v12 = vld [vmem:[#allocation8] ss:$0 sm:$0xff] }
 0x2e7   :  { %v410_v16 = vmul.f32 0.03125, %v398_v14  ;;  %436 = vadd.xlane.f32.xlu0 %v435_v15  ;;  %v401_v17 = vpop.xlane.xlu0 %400  ;;  %v424_v18 = vmul.f32 %v6651_v11, %v6651_v11 }
 0x2e8   :  { %v411_v19 = vmul.f32 0.03125, %v401_v17  ;;  %v425_v22 = vmul.f32 %v6655_v13, %v6655_v13 }
 0x2e9   :  { %v6663_v23 = vsub.f32 %v6621_v53, %v410_v16  ;;  %v438_v24 = vsel %vm245_vm0, %v424_v18, 0.0 }
 0x2ea   :  { %v6667_v26 = vsub.f32 %v6624_v39, %v411_v19  ;;  %439 = vadd.xlane.f32.xlu1 %v438_v24  ;;  %v404_v27 = vpop.xlane.xlu1 %403  ;;  %v441_v30 = vsel %vm245_vm0, %v425_v22, 0.0  ;;  %v4931_v19 = vld [vmem:[#allocation10] ss:$0 sm:$0xff] }
 0x2eb   :  { %v412_v31 = vmul.f32 0.03125, %v404_v27  ;;  %442 = vadd.xlane.f32.xlu0 %v441_v30  ;;  %v426_v20 = vmul.f32 %v6663_v23, %v6663_v23 }
 0x2ec   :  { %v427_v32 = vmul.f32 %v6667_v26, %v6667_v26 }
 0x2ed   :  { %v6675_v33 = vsub.f32 %v6630_v57, %v412_v31  ;;  %v444_v35 = vsel %vm245_vm0, %v426_v20, 0.0 }
 0x2ee   :  { %445 = vadd.xlane.f32.xlu1 %v444_v35  ;;  %v447_v37 = vsel %vm245_vm0, %v427_v32, 0.0 }
 0x2ef   :  { %448 = vadd.xlane.f32.xlu0 %v447_v37  ;;  %v428_v28 = vmul.f32 %v6675_v33, %v6675_v33 }
 0x2f1   :  { %v450_v21 = vsel %vm245_vm0, %v428_v28, 0.0 }
 0x2f2   :  { %451 = vadd.xlane.f32.xlu1 %v450_v21 }
 0x36f   :  { %v431_v42 = vpop.xlane.xlu0 %430 }
 0x370   :  { %v453_v43 = vmul.f32 0.03125, %v431_v42 }
 0x372   :  { %v461_v29 = vadd.f32 1e-05, %v453_v43 }
 0x373   :  { %v434_v38 = vpop.xlane.xlu1 %433 }
 0x374   :  { %v454_v46 = vmul.f32 0.03125, %v434_v38  ;;  %v437_v47 = vpop.xlane.xlu0 %436  ;;  %5663 = vrsqrt.f32 %v461_v29 }
 0x375   :  { %v455_v50 = vmul.f32 0.03125, %v437_v47 }
 0x376   :  { %v462_v51 = vadd.f32 1e-05, %v454_v46 }
 0x377   :  { %v463_v52 = vadd.f32 1e-05, %v455_v50  ;;  %v440_v54 = vpop.xlane.xlu1 %439 }
 0x378   :  { %5665 = vrsqrt.f32 %v462_v51  ;;  %v456_v48 = vmul.f32 0.03125, %v440_v54  ;;  %v443_v55 = vpop.xlane.xlu0 %442  ;;  %v6234_v54 = vmov 0.0  }
 0x379   :  { %5667 = vrsqrt.f32 %v463_v52  ;;  %v457_v56 = vmul.f32 0.03125, %v443_v55  ;;  %5180 = vmatprep.subr.bf16.mxu0 %v6234_v54  ;;  %5192 = vmatprep.subr.bf16.mxu1 %v6234_v54 }
 0x37a   :  { %v464_v58 = vadd.f32 1e-05, %v456_v48  ;;  %5194 = vmatprep.mubr.msk.bf16.mxu1 %vm6235_vm2, %v6234_v54 }
 0x37b   :  { %v465_v59 = vadd.f32 1e-05, %v457_v56  ;;  %v446_v60 = vpop.xlane.xlu1 %445 }
 0x37c   :  { %5669 = vrsqrt.f32 %v464_v58  ;;  %v458_v61 = vmul.f32 0.03125, %v446_v60  ;;  %v449_v62 = vpop.xlane.xlu0 %448 }
 0x37d   :  { %v459_v63 = vmul.f32 0.03125, %v449_v62  ;;  %5671 = vrsqrt.f32 %v465_v59 }
 0x37e   :  { %v466_v0 = vadd.f32 1e-05, %v458_v61  ;;  %v5664_v1 = vpop.eup %5663 }
 0x37f   :  { %v467_v3 = vadd.f32 1e-05, %v459_v63  ;;  %v452_v5 = vpop.xlane.xlu1 %451  ;;  %v477_v9 = vmul.f32 %v5664_v1, %v6635_v49 }
 0x380   :  { %5673 = vrsqrt.f32 %v466_v0  ;;  %v460_v6 = vmul.f32 0.03125, %v452_v5 }
 0x381   :  { %5675 = vrsqrt.f32 %v467_v3  ;;  %v491_v18 = vmul.f32 %v4930_v12, %v477_v9 }
 0x382   :  { %v5666_v7 = vpop.eup %5665  ;;  %v468_v8 = vadd.f32 1e-05, %v460_v6 }
 0x383   :  { %v5668_v10 = vpop.eup %5667  ;;  %v478_v14 = vmul.f32 %v5666_v7, %v6640_v2  ;;  %v505_v32 = vadd.f32 %v4931_v19, %v491_v18 }
 0x384   :  { %5677 = vrsqrt.f32 %v468_v8  ;;  %v479_v15 = vmul.f32 %v5668_v10, %v6644_v4 }
 0x385   :  { %v492_v16 = vmul.f32 %v4930_v12, %v478_v14 }
 0x386   :  { %v5670_v17 = vpop.eup %5669  ;;  %v493_v24 = vmul.f32 %v4930_v12, %v479_v15 }
 0x387   :  { %v480_v22 = vmul.f32 %v5670_v17, %v6651_v11  ;;  %v5672_v27 = vpop.eup %5671  ;;  %v506_v31 = vadd.f32 %v4931_v19, %v492_v16 }
 0x388   :  { %v481_v35 = vmul.f32 %v5672_v27, %v6655_v13  ;;  %v507_v37 = vadd.f32 %v4931_v19, %v493_v24 }
 0x389   :  { %v494_v30 = vmul.f32 %v4930_v12, %v480_v22  ;;  %v525_v21 = vcombine.low %v505_v32, %v506_v31 }
 0x38a   :  { %v5674_v20 = vpop.eup %5673  ;;  %v495_v29 = vmul.f32 %v4930_v12, %v481_v35 }
 0x38b   :  { %v5676_v49 = vpop.eup %5675  ;;  %v482_v2 = vmul.f32 %v5674_v20, %v6663_v23  ;;  %v508_v28 = vadd.f32 %v4931_v19, %v494_v30 }
 0x38c   :  { %v483_v4 = vmul.f32 %v5676_v49, %v6667_v26  ;;  %v509_v47 = vadd.f32 %v4931_v19, %v495_v29 }
 0x38d   :  { %v526_v40 = vcombine.low %v507_v37, %v508_v28  ;;  %v496_v41 = vmul.f32 %v4930_v12, %v482_v2 }
 0x38e   :  { %v5678_v42 = vpop.eup %5677  ;;  %v497_v38 = vmul.f32 %v4930_v12, %v483_v4 }
 0x38f   :  { %v484_v11 = vmul.f32 %v5678_v42, %v6675_v33  ;;  %v533_v43 = vpack.c.bf16 %v526_v40, %v525_v21  ;;  %v510_v13 = vadd.f32 %v4931_v19, %v496_v41  ;;  %v4936_v33 = vld [vmem:[#allocation13] ss:$0 sm:$0xff] }
 0x390   :  { %v511_v23 = vadd.f32 %v4931_v19, %v497_v38 }
 0x391   :  { %5176 = vmatprep.mubr.msk.bf16.mxu0 %vm547_vm1, %v533_v43  ;;  %v498_v46 = vmul.f32 %v4930_v12, %v484_v11  ;;  %v527_v51 = vcombine.low %v509_v47, %v510_v13 }
 0x393   :  { %v512_v50 = vadd.f32 %v4931_v19, %v498_v46 }
 0x395   :  { %v528_v52 = vcombine.low %v511_v23, %v512_v50 }
 0x397   :  { %v534_v26 = vpack.c.bf16 %v528_v52, %v527_v51 }
 0x399   :  { %5177 = vmatmul.mubr.msk.bf16.vlgmr.msra.gmra.mrb[0].mxu0 %vm547_vm1, %v534_v26 }
 0x39a   :  { %5182 = vmatprep.mubr.msk.bf16.mxu0 %vm6235_vm2, %v6234_v54 }
 0x46c   :  { %v5178_v48 = vpop.f32.mrb[0].mxu0 }
 0x46d   :  { %v588_v55 = vpop.f32.mrb[1].mxu0  ;;  %v626_v61 = vadd.f32 %v5178_v48, %v4936_v33  ;;  %v609_v7 = vcombine.high %v5178_v48, %v5178_v48 }
 0x46e   :  { %v607_v56 = vcombine.high %v588_v55, %v588_v55  ;;  %v622_v58 = vadd.f32 %v4936_v33, %v588_v55  ;;  %v5179_v59 = vpop.f32.mrb[2].mxu0 }
 0x46f   :  { %v591_v60 = vpop.f32.mrb[3].mxu0  ;;  %v6703_v5 = vpack.c.bf16 %v626_v61, %v626_v61  ;;  %v628_v6 = vadd.f32 %v5179_v59, %v4936_v33  ;;  %v627_v12 = vadd.f32 %v4936_v33, %v609_v7  ;;  %v610_v14 = vcombine.high %v5179_v59, %v5179_v59 }
 0x470   :  { %v623_v62 = vadd.f32 %v4936_v33, %v607_v56  ;;  %v6698_v63 = vpack.c.bf16 %v622_v58, %v622_v58  ;;  %v608_v1 = vcombine.high %v591_v60, %v591_v60  ;;  %v624_v3 = vadd.f32 %v4936_v33, %v591_v60 }
 0x471   :  { %v6709_v10 = vpack.c.bf16 %v628_v6, %v628_v6  ;;  %v6716_v16 = vpack.c.bf16 %v627_v12, %v627_v12  ;;  %v629_v17 = vadd.f32 %v4936_v33, %v610_v14 }
 0x472   :  { %v6700_v0 = vpack.c.bf16 %v623_v62, %v623_v62  ;;  %639 = vrot.lane.b32.xlu0 %v6698_v63, %s6236_s14  ;;  %v625_v8 = vadd.f32 %v4936_v33, %v608_v1  ;;  %v6706_v9 = vpack.c.bf16 %v624_v3, %v624_v3 }
 0x473   :  { %v6721_v18 = vpack.c.bf16 %v629_v17, %v629_v17 }
 0x474   :  { %689 = vrot.lane.b32.xlu1 %v6700_v0, %s6236_s14  ;;  %v6712_v15 = vpack.c.bf16 %v625_v8, %v625_v8 }
 0x476   :  { %836 = vrot.lane.b32.xlu0 %v6703_v5, %s6236_s14 }
 0x478   :  { %738 = vrot.lane.b32.xlu1 %v6706_v9, %s6236_s14 }
 0x47a   :  { %934 = vrot.lane.b32.xlu0 %v6709_v10, %s6236_s14 }
 0x47c   :  { %787 = vrot.lane.b32.xlu1 %v6712_v15, %s6236_s14 }
 0x47e   :  { %1136 = vrot.lane.b32.xlu0 %v6698_v63, %s6221_s21 }
 0x480   :  { %885 = vrot.lane.b32.xlu1 %v6716_v16, %s6236_s14 }
 0x484   :  { %983 = vrot.lane.b32.xlu1 %v6721_v18, %s6236_s14 }
 0x488   :  { %1186 = vrot.lane.b32.xlu1 %v6700_v0, %s6221_s21 }
 0x48c   :  { %1234 = vrot.lane.b32.xlu1 %v6706_v9, %s6221_s21 }
 0x490   :  { %1282 = vrot.lane.b32.xlu1 %v6712_v15, %s6221_s21 }
 0x4e4   :  { %v640_v19 = vpop.permute.xlu0 %639 }
 0x4e5   :  { %v646_v22 = vsel %vm641_vm3, %v640_v19, 0 }
 0x4e6   :  { %5181 = vmatpush3.bf16.xpose.msra.mxu0 %v646_v22  ;;  %v690_v24 = vpop.permute.xlu1 %689 }
 0x4e7   :  { %5186 = vmatprep.subr.bf16.mxu0 %v6234_v54  ;;  %v695_v31 = vsel %vm641_vm3, %v690_v24, 0 }
 0x4e8   :  { %v837_v20 = vpop.permute.xlu0 %836 }
 0x4e9   :  { %v842_v49 = vsel %vm641_vm3, %v837_v20, 0 }
 0x4ea   :  { %v739_v27 = vpop.permute.xlu1 %738 }
 0x4eb   :  { %v744_v30 = vsel %vm641_vm3, %v739_v27, 0 }
 0x4ec   :  { %5193 = vmatpush3.bf16.xpose.msra.mxu1 %v744_v30  ;;  %v935_v2 = vpop.permute.xlu0 %934 }
 0x4ed   :  { %5183 = vmatmul.mubr.msk.bf16.vlgmr.msra.gmra.mrb[4].mxu0 %vm641_vm3, %v6698_v63  ;;  %5204 = vmatprep.subr.bf16.mxu1 %v6234_v54  ;;  %v940_v28 = vsel %vm641_vm3, %v935_v2, 0 }
 0x4ee   :  { %5187 = vmatpush3.bf16.xpose.msra.mxu0 %v695_v31  ;;  %5188 = vmatprep.mubr.msk.bf16.mxu0 %vm6235_vm2, %v6234_v54  ;;  %v788_v32 = vpop.permute.xlu1 %787 }
 0x4ef   :  { %5198 = vmatprep.subr.bf16.mxu0 %v6234_v54  ;;  %v793_v35 = vsel %vm641_vm3, %v788_v32, 0 }
 0x4f0   :  { %v1137_v21 = vpop.permute.xlu0 %1136 }
 0x4f1   :  { %v1144_v41 = vsel %vm1142_vm4, %v1137_v21, 0 }
 0x4f2   :  { %v886_v37 = vpop.permute.xlu1 %885 }
 0x4f3   :  { %5195 = vmatmul.mubr.msk.bf16.vlgmr.msra.gmra.mrb[0].mxu1 %vm641_vm3, %v6706_v9  ;;  %v891_v4 = vsel %vm641_vm3, %v886_v37, 0 }
 0x4f4   :  { %5205 = vmatpush3.bf16.xpose.msra.mxu1 %v842_v49  ;;  %5206 = vmatprep.mubr.msk.bf16.mxu1 %vm6235_vm2, %v6234_v54 }
 0x4f5   :  { %5189 = vmatmul.mubr.msk.bf16.vlgmr.msra.gmra.mrb[8].mxu0 %vm641_vm3, %v6700_v0  ;;  %5216 = vmatprep.subr.bf16.mxu1 %v6234_v54 }
 0x4f6   :  { %5199 = vmatpush3.bf16.xpose.msra.mxu0 %v793_v35  ;;  %5200 = vmatprep.mubr.msk.bf16.mxu0 %vm6235_vm2, %v6234_v54  ;;  %v984_v40 = vpop.permute.xlu1 %983 }
 0x4f7   :  { %5210 = vmatprep.subr.bf16.mxu0 %v6234_v54  ;;  %v989_v42 = vsel %vm641_vm3, %v984_v40, 0 }
 0x4fa   :  { %v1187_v11 = vpop.permute.xlu1 %1186 }
 0x4fb   :  { %5207 = vmatmul.mubr.msk.bf16.vlgmr.msra.gmra.mrb[4].mxu1 %vm641_vm3, %v6703_v5  ;;  %v1192_v43 = vsel %vm1142_vm4, %v1187_v11, 0 }
 0x4fc   :  { %5217 = vmatpush3.bf16.xpose.msra.mxu1 %v940_v28  ;;  %5218 = vmatprep.mubr.msk.bf16.mxu1 %vm6235_vm2, %v6234_v54 }
 0x4fd   :  { %5201 = vmatmul.mubr.msk.bf16.vlgmr.msra.gmra.mrb[12].mxu0 %vm641_vm3, %v6712_v15  ;;  %5228 = vmatprep.subr.bf16.mxu1 %v6234_v54 }
 0x4fe   :  { %5211 = vmatpush3.bf16.xpose.msra.mxu0 %v891_v4  ;;  %5212 = vmatprep.mubr.msk.bf16.mxu0 %vm6235_vm2, %v6234_v54 }
 0x4ff   :  { %5222 = vmatprep.subr.bf16.mxu0 %v6234_v54 }
 0x503   :  { %5219 = vmatmul.mubr.msk.bf16.vlgmr.msra.gmra.mrb[8].mxu1 %vm641_vm3, %v6709_v10 }
 0x504   :  { %5229 = vmatpush3.bf16.msra.mxu1 %v1144_v41  ;;  %5230 = vmatprep.mubr.msk.bf16.mxu1 %vm6235_vm2, %v6234_v54 }
 0x505   :  { %5213 = vmatmul.mubr.msk.bf16.vlgmr.msra.gmra.mrb[16].mxu0 %vm641_vm3, %v6716_v16  ;;  %5240 = vmatprep.subr.bf16.mxu1 %v6234_v54 }
 0x506   :  { %5223 = vmatpush3.bf16.xpose.msra.mxu0 %v989_v42  ;;  %5224 = vmatprep.mubr.msk.bf16.mxu0 %vm6235_vm2, %v6234_v54 }
 0x507   :  { %5234 = vmatprep.subr.bf16.mxu0 %v6234_v54 }
 0x50d   :  { %5225 = vmatmul.mubr.msk.bf16.vlgmr.msra.gmra.mrb[20].mxu0 %vm641_vm3, %v6721_v18 }
 0x50e   :  { %5235 = vmatpush3.bf16.msra.mxu0 %v1192_v43  ;;  %5236 = vmatprep.mubr.msk.bf16.mxu0 %vm6235_vm2, %v6234_v54 }
 0x50f   :  { %5246 = vmatprep.subr.bf16.mxu0 %v6234_v54 }
 0x5c0   :  { %v682_v29 = vpop.f32.mrb[4].mxu0 }
 0x5c1   :  { %v1031_v38 = vmul.f32 0.35355338, %v682_v29  ;;  %v5184_v46 = vpop.f32.mrb[5].mxu0 }
 0x5c2   :  { %v685_v13 = vpop.f32.mrb[6].mxu0  ;;  %v6803_v46 = vpop.permute.xlu1 %1234 }
 0x5c3   :  { %v5185_v47 = vpop.f32.mrb[7].mxu0  ;;  %v1040_v23 = vsel %vm1039_vm5, %v1031_v38, -inf }
 0x5c4   :  { %1041 = vmax.xlane.f32.xlu0 %v1040_v23 }
 0x5c6   :  { %v780_v50 = vpop.f32.mrb[0].mxu1 }
 0x5c7   :  { %v1033_v51 = vmul.f32 0.35355338, %v780_v50  ;;  %v5196_v52 = vpop.f32.mrb[1].mxu1  ;;  %v6805_v50 = vpop.permute.xlu1 %1282 }
 0x5c8   :  { %v731_v26 = vpop.f32.mrb[8].mxu0  ;;  %v783_v33 = vpop.f32.mrb[2].mxu1 }
 0x5c9   :  { %v1032_v48 = vmul.f32 0.35355338, %v731_v26  ;;  %v5190_v55 = vpop.f32.mrb[9].mxu0  ;;  %v5197_v56 = vpop.f32.mrb[3].mxu1  ;;  %v1046_v58 = vsel %vm1039_vm5, %v1033_v51, -inf }
 0x5ca   :  { %v734_v59 = vpop.f32.mrb[10].mxu0  ;;  %1047 = vmax.xlane.f32.xlu0 %v1046_v58 }
 0x5cb   :  { %v5191_v60 = vpop.f32.mrb[11].mxu0  ;;  %v1043_v61 = vsel %vm1039_vm5, %v1032_v48, -inf }
 0x5cc   :  { %1044 = vmax.xlane.f32.xlu1 %v1043_v61 }
 0x5ce   :  { %v878_v62 = vpop.f32.mrb[4].mxu1 }
 0x5cf   :  { %v1035_v1 = vmul.f32 0.35355338, %v878_v62  ;;  %v5208_v3 = vpop.f32.mrb[5].mxu1 }
 0x5d0   :  { %v829_v6 = vpop.f32.mrb[12].mxu0  ;;  %v881_v7 = vpop.f32.mrb[6].mxu1 }
 0x5d1   :  { %v6785_v8 = vmul.f32 0.35355338, %v829_v6  ;;  %v5202_v12 = vpop.f32.mrb[13].mxu0  ;;  %v5209_v14 = vpop.f32.mrb[7].mxu1  ;;  %v1052_v17 = vsel %vm1039_vm5, %v1035_v1, -inf }
 0x5d2   :  { %1053 = vmax.xlane.f32.xlu0 %v1052_v17  ;;  %v832_v19 = vpop.f32.mrb[14].mxu0 }
 0x5d3   :  { %v5203_v22 = vpop.f32.mrb[15].mxu0  ;;  %v1049_v24 = vsel %vm1039_vm5, %v6785_v8, -inf }
 0x5d6   :  { %v976_v27 = vpop.f32.mrb[8].mxu1  ;;  %1050 = vmax.xlane.f32.xlu0 %v1049_v24 }
 0x5d7   :  { %v6790_v30 = vmul.f32 0.35355338, %v976_v27  ;;  %v5220_v31 = vpop.f32.mrb[9].mxu1 }
 0x5d8   :  { %v927_v20 = vpop.f32.mrb[16].mxu0  ;;  %v979_v32 = vpop.f32.mrb[10].mxu1 }
 0x5d9   :  { %v5214_v49 = vpop.f32.mrb[17].mxu0  ;;  %v5221_v35 = vpop.f32.mrb[11].mxu1  ;;  %v1058_v2 = vsel %vm1039_vm5, %v6790_v30, -inf  ;;  %v1036_v42 = vmul.f32 0.35355338, %v927_v20 }
 0x5da   :  { %1059 = vmax.xlane.f32.xlu0 %v1058_v2  ;;  %v930_v37 = vpop.f32.mrb[18].mxu0 }
 0x5db   :  { %v5215_v28 = vpop.f32.mrb[19].mxu0  ;;  %v1055_v43 = vsel %vm1039_vm5, %v1036_v42, -inf }
 0x5dd   :  { %1378 = vrot.lane.b32.xlu1 %v6716_v16, %s6221_s21 }
 0x5e0   :  { %v1025_v4 = vpop.f32.mrb[20].mxu0 }
 0x5e1   :  { %v5226_v21 = vpop.f32.mrb[21].mxu0  ;;  %v6798_v11 = vmul.f32 0.35355338, %v1025_v4 }
 0x5e2   :  { %v1028_v40 = vpop.f32.mrb[22].mxu0 }
 0x5e3   :  { %v5227_v41 = vpop.f32.mrb[23].mxu0  ;;  %v1061_v29 = vsel %vm1039_vm5, %v6798_v11, -inf }
 0x5f0   :  { %1330 = vrot.lane.b32.xlu0 %v6703_v5, %s6221_s21 }
 0x601   :  { %1056 = vmax.xlane.f32.xlu1 %v1055_v43 }
 0x605   :  { %1062 = vmax.xlane.f32.xlu1 %v1061_v29 }
 0x651   :  { %v1042_v13 = vpop.xlane.xlu0 %1041 }
 0x652   :  { %v1064_v47 = vsub.f32 %v1031_v38, %v1042_v13 }
 0x654   :  { %v1072_v23 = vmul.f32 1.442695, %v1064_v47 }
 0x656   :  { %5679 = vpow2.f32 %v1072_v23 }
 0x657   :  { %v1048_v52 = vpop.xlane.xlu0 %1047 }
 0x658   :  { %v1066_v26 = vsub.f32 %v1033_v51, %v1048_v52 }
 0x659   :  { %v1045_v33 = vpop.xlane.xlu1 %1044 }
 0x65a   :  { %v1076_v55 = vmul.f32 1.442695, %v1066_v26  ;;  %v1065_v56 = vsub.f32 %v1032_v48, %v1045_v33  ;;  %v1240_v26 = vsel %vm1142_vm4, %v6803_v46, 0 }
 0x65c   :  { %5681 = vpow2.f32 %v1076_v55  ;;  %v1074_v58 = vmul.f32 1.442695, %v1065_v56 }
 0x65d   :  { %v6828_v17 = vpop.permute.xlu1 %1378 }
 0x65e   :  { %5683 = vpow2.f32 %v1074_v58 }
 0x65f   :  { %v1054_v59 = vpop.xlane.xlu0 %1053 }
 0x660   :  { %v6807_v60 = vpop.eup %5679  ;;  %v1068_v61 = vsub.f32 %v1035_v1, %v1054_v59 }
 0x661   :  { %v1088_v62 = vsel %vm1039_vm5, %v6807_v60, 0.0 }
 0x662   :  { %v1080_v38 = vmul.f32 1.442695, %v1068_v61  ;;  %1089 = vadd.xlane.f32.xlu0 %v1088_v62 }
 0x663   :  { %v1051_v12 = vpop.xlane.xlu0 %1050 }
 0x664   :  { %5685 = vpow2.f32 %v1080_v38  ;;  %v1067_v14 = vsub.f32 %v6785_v8, %v1051_v12 }
 0x666   :  { %v6811_v3 = vpop.eup %5681  ;;  %v1078_v22 = vmul.f32 1.442695, %v1067_v14 }
 0x667   :  { %v1094_v51 = vsel %vm1039_vm5, %v6811_v3, 0.0  ;;  %v1060_v19 = vpop.xlane.xlu0 %1059 }
 0x668   :  { %v6815_v6 = vpop.eup %5683  ;;  %1095 = vadd.xlane.f32.xlu0 %v1094_v51  ;;  %v1070_v27 = vsub.f32 %v6790_v30, %v1060_v19  ;;  %5687 = vpow2.f32 %v1078_v22 }
 0x669   :  { %v1091_v48 = vsel %vm1039_vm5, %v6815_v6, 0.0 }
 0x66a   :  { %1092 = vadd.xlane.f32.xlu1 %v1091_v48  ;;  %v1084_v32 = vmul.f32 1.442695, %v1070_v27 }
 0x66e   :  { %v6819_v7 = vpop.eup %5685 }
 0x66f   :  { %v1100_v1 = vsel %vm1039_vm5, %v6819_v7, 0.0 }
 0x670   :  { %1101 = vadd.xlane.f32.xlu0 %v1100_v1 }
 0x672   :  { %v6831_v49 = vpop.eup %5687 }
 0x673   :  { %v1097_v35 = vsel %vm1039_vm5, %v6831_v49, 0.0 }
 0x67b   :  { %1474 = vrot.lane.b32.xlu1 %v6721_v18, %s6221_s21 }
 0x686   :  { %1426 = vrot.lane.b32.xlu0 %v6709_v10, %s6221_s21 }
 0x68e   :  { %v1057_v24 = vpop.xlane.xlu1 %1056 }
 0x68f   :  { %v1069_v31 = vsub.f32 %v1036_v42, %v1057_v24  ;;  %v1331_v42 = vpop.permute.xlu0 %1330 }
 0x690   :  { %v1336_v61 = vsel %vm1142_vm4, %v1331_v42, 0 }
 0x691   :  { %v1082_v20 = vmul.f32 1.442695, %v1069_v31  ;;  %v1384_v31 = vsel %vm1142_vm4, %v6828_v17, 0 }
 0x692   :  { %v1063_v28 = vpop.xlane.xlu1 %1062 }
 0x693   :  { %5689 = vpow2.f32 %v1082_v20  ;;  %v1071_v4 = vsub.f32 %v6798_v11, %v1063_v28 }
 0x694   :  { %5691 = vpow2.f32 %v1084_v32 }
 0x695   :  { %v1086_v21 = vmul.f32 1.442695, %v1071_v4 }
 0x697   :  { %5693 = vpow2.f32 %v1086_v21 }
 0x69d   :  { %v6835_v2 = vpop.eup %5689 }
 0x69e   :  { %v6837_v8 = vpop.eup %5691  ;;  %v1103_v37 = vsel %vm1039_vm5, %v6835_v2, 0.0 }
 0x69f   :  { %1098 = vadd.xlane.f32.xlu1 %v1097_v35  ;;  %v1106_v30 = vsel %vm1039_vm5, %v6837_v8, 0.0 }
 0x6a1   :  { %v6860_v40 = vpop.eup %5693 }
 0x6a2   :  { %v1109_v41 = vsel %vm1039_vm5, %v6860_v40, 0.0 }
 0x6a3   :  { %1104 = vadd.xlane.f32.xlu1 %v1103_v37 }
 0x6a5   :  { %1107 = vadd.xlane.f32.xlu0 %v1106_v30 }
 0x6b4   :  { %1574 = vrot.lane.b32.xlu1 %v6700_v0, %s6237_s1 }
 0x6bb   :  { %1524 = vrot.lane.b32.xlu0 %v6698_v63, %s6237_s1 }
 0x6bf   :  { %1522 = vrot.lane.b32.xlu0 %v6698_v63, %s6238_s22 }
 0x6c3   :  { %1624 = vrot.lane.b32.xlu0 %v6706_v9, %s6237_s1 }
 0x6c7   :  { %1622 = vrot.lane.b32.xlu0 %v6706_v9, %s6238_s22 }
 0x6cb   :  { %1724 = vrot.lane.b32.xlu0 %v6703_v5, %s6237_s1 }
 0x6cf   :  { %1722 = vrot.lane.b32.xlu0 %v6703_v5, %s6238_s22 }
 0x6d3   :  { %1824 = vrot.lane.b32.xlu0 %v6709_v10, %s6237_s1 }
 0x6d7   :  { %1822 = vrot.lane.b32.xlu0 %v6709_v10, %s6238_s22 }
 0x6d8   :  { %1110 = vadd.xlane.f32.xlu1 %v1109_v41 }
 0x6db   :  { %2026 = vrot.lane.b32.xlu0 %v6698_v63, %s6239_s17 }
 0x6e9   :  { %1572 = vrot.lane.b32.xlu1 %v6700_v0, %s6238_s22 }
 0x6ed   :  { %1674 = vrot.lane.b32.xlu1 %v6712_v15, %s6237_s1 }
 0x6ef   :  { %v1090_v11 = vpop.xlane.xlu0 %1089 }
 0x6f0   :  { %5695 = vrcp.f32 %v1090_v11 }
 0x6f1   :  { %1672 = vrot.lane.b32.xlu1 %v6712_v15, %s6238_s22 }
 0x6f5   :  { %v1096_v43 = vpop.xlane.xlu0 %1095  ;;  %1774 = vrot.lane.b32.xlu1 %v6716_v16, %s6237_s1 }
 0x6f6   :  { %5697 = vrcp.f32 %v1096_v43 }
 0x6f7   :  { %v1093_v29 = vpop.xlane.xlu1 %1092 }
 0x6f8   :  { %5699 = vrcp.f32 %v1093_v29 }
 0x6f9   :  { %1772 = vrot.lane.b32.xlu1 %v6716_v16, %s6238_s22 }
 0x6fa   :  { %v5696_v13 = vpop.eup %5695 }
 0x6fb   :  { %v1120_v47 = vmul.f32 %v5696_v13, %v6807_v60  ;;  %v1288_v60 = vsel %vm1142_vm4, %v6805_v50, 0 }
 0x6fd   :  { %v1102_v23 = vpop.xlane.xlu0 %1101  ;;  %1874 = vrot.lane.b32.xlu1 %v6721_v18, %s6237_s1  ;;  %v1128_v52 = vpack.c.bf16 %v1120_v47, %v1120_v47 }
 0x6fe   :  { %5701 = vrcp.f32 %v1102_v23 }
 0x6ff   :  { %5231 = vmatmul.mubr.msk.bf16.vlgmr.msra.gmra.mrb[12].mxu1 %vm1138_vm6, %v1128_v52 }
 0x700   :  { %v5698_v33 = vpop.eup %5697  ;;  %5241 = vmatpush3.bf16.msra.mxu1 %v1240_v26  ;;  %5242 = vmatprep.mubr.msk.bf16.mxu1 %vm6235_vm2, %v6234_v54 }
 0x701   :  { %1872 = vrot.lane.b32.xlu1 %v6721_v18, %s6238_s22  ;;  %5252 = vmatprep.subr.bf16.mxu1 %v6234_v54  ;;  %v1122_v55 = vmul.f32 %v5698_v33, %v6811_v3  ;;  %v1427_v50 = vpop.permute.xlu0 %1426 }
 0x702   :  { %v5700_v56 = vpop.eup %5699  ;;  %v1432_v51 = vsel %vm1142_vm4, %v1427_v50, 0 }
 0x703   :  { %v1121_v58 = vmul.f32 %v5700_v56, %v6815_v6  ;;  %v1130_v59 = vpack.c.bf16 %v1122_v55, %v1122_v55  ;;  %v1475_v6 = vpop.permute.xlu1 %1474 }
 0x704   :  { %v1480_v4 = vsel %vm1142_vm4, %v1475_v6, 0 }
 0x705   :  { %2074 = vrot.lane.b32.xlu1 %v6700_v0, %s6239_s17  ;;  %v1129_v46 = vpack.c.bf16 %v1121_v58, %v1121_v58 }
 0x707   :  { %5237 = vmatmul.mubr.msk.bf16.vlgmr.msra.gmra.mrb[24].mxu0 %vm1138_vm6, %v1129_v46  ;;  %5243 = vmatmul.mubr.msk.bf16.vlgmr.msra.gmra.mrb[16].mxu1 %vm1138_vm6, %v1130_v59 }
 0x708   :  { %v5702_v62 = vpop.eup %5701  ;;  %5247 = vmatpush3.bf16.msra.mxu0 %v1288_v60  ;;  %5253 = vmatpush3.bf16.msra.mxu1 %v1336_v61 }
 0x709   :  { %2122 = vrot.lane.b32.xlu1 %v6706_v9, %s6239_s17  ;;  %5254 = vmatprep.mubr.msk.bf16.mxu1 %vm6235_vm2, %v6234_v54  ;;  %v1124_v38 = vmul.f32 %v5702_v62, %v6819_v7 }
 0x70a   :  { %5264 = vmatprep.subr.bf16.mxu1 %v6234_v54  ;;  %5248 = vmatprep.mubr.msk.bf16.mxu0 %vm6235_vm2, %v6234_v54 }
 0x70b   :  { %5258 = vmatprep.subr.bf16.mxu0 %v6234_v54  ;;  %v1132_v3 = vpack.c.bf16 %v1124_v38, %v1124_v38 }
 0x70d   :  { %2170 = vrot.lane.b32.xlu1 %v6712_v15, %s6239_s17 }
 0x70f   :  { %5255 = vmatmul.mubr.msk.bf16.vlgmr.msra.gmra.mrb[20].mxu1 %vm1138_vm6, %v1132_v3 }
 0x710   :  { %5265 = vmatpush3.bf16.msra.mxu1 %v1432_v51  ;;  %5266 = vmatprep.mubr.msk.bf16.mxu1 %vm6235_vm2, %v6234_v54 }
 0x711   :  { %5276 = vmatprep.subr.bf16.mxu1 %v6234_v54 }
 0x72c   :  { %v1099_v48 = vpop.xlane.xlu1 %1098 }
 0x72d   :  { %5703 = vrcp.f32 %v1099_v48 }
 0x730   :  { %v1105_v7 = vpop.xlane.xlu1 %1104 }
 0x731   :  { %5705 = vrcp.f32 %v1105_v7 }
 0x732   :  { %v1108_v1 = vpop.xlane.xlu0 %1107 }
 0x733   :  { %5707 = vrcp.f32 %v1108_v1 }
 0x734   :  { %v1575_v13 = vpop.permute.xlu1 %1574 }
 0x735   :  { %v1580_v46 = vsel %vm641_vm3, %v1575_v13, 0 }
 0x736   :  { %v1525_v12 = vpop.permute.xlu0 %1524 }
 0x737   :  { %v5704_v14 = vpop.eup %5703  ;;  %v1530_v30 = vsel %vm641_vm3, %v1525_v12, 0 }
 0x738   :  { %v1123_v19 = vmul.f32 %v5704_v14, %v6831_v49 }
 0x73a   :  { %v1523_v22 = vpop.permute.xlu0 %1522  ;;  %v1131_v24 = vpack.c.bf16 %v1123_v19, %v1123_v19 }
 0x73b   :  { %v5706_v27 = vpop.eup %5705 }
 0x73c   :  { %5249 = vmatmul.mubr.msk.bf16.vlgmr.msra.gmra.mrb[28].mxu0 %vm1138_vm6, %v1131_v24  ;;  %v1125_v49 = vmul.f32 %v5706_v27, %v6835_v2 }
 0x73d   :  { %v5708_v20 = vpop.eup %5707  ;;  %5259 = vmatpush3.bf16.msra.mxu0 %v1384_v31  ;;  %5260 = vmatprep.mubr.msk.bf16.mxu0 %vm6235_vm2, %v6234_v54 }
 0x73e   :  { %v1625_v32 = vpop.permute.xlu0 %1624  ;;  %v1126_v35 = vmul.f32 %v5708_v20, %v6837_v8  ;;  %5270 = vmatprep.subr.bf16.mxu0 %v6234_v54  ;;  %v1133_v17 = vpack.c.bf16 %v1125_v49, %v1125_v49 }
 0x73f   :  { %v1630_v8 = vsel %vm641_vm3, %v1625_v32, 0 }
 0x740   :  { %v1134_v37 = vpack.c.bf16 %v1126_v35, %v1126_v35 }
 0x742   :  { %v1623_v28 = vpop.permute.xlu0 %1622  ;;  %5267 = vmatmul.mubr.msk.bf16.vlgmr.msra.gmra.mrb[24].mxu1 %vm1138_vm6, %v1134_v37 }
 0x743   :  { %5277 = vmatpush3.bf16.xpose.msra.mxu1 %v1530_v30  ;;  %5278 = vmatprep.mubr.msk.bf16.mxu1 %vm6235_vm2, %v6234_v54 }
 0x744   :  { %5261 = vmatmul.mubr.msk.bf16.vlgmr.msra.gmra.mrb[32].mxu0 %vm1138_vm6, %v1133_v17  ;;  %5288 = vmatprep.subr.bf16.mxu1 %v6234_v54 }
 0x745   :  { %5271 = vmatpush3.bf16.msra.mxu0 %v1480_v4  ;;  %5272 = vmatprep.mubr.msk.bf16.mxu0 %vm6235_vm2, %v6234_v54 }
 0x746   :  { %5282 = vmatprep.subr.bf16.mxu0 %v6234_v54  ;;  %v1725_v2 = vpop.permute.xlu0 %1724 }
 0x747   :  { %v1730_v41 = vsel %vm641_vm3, %v1725_v2, 0 }
 0x74a   :  { %5279 = vmatmul.mubr.msk.bf16.vlgmr.msra.gmra.mrb[28].mxu1 %vm641_vm3, %v1523_v22  ;;  %v1723_v21 = vpop.permute.xlu0 %1722 }
 0x74b   :  { %5289 = vmatpush3.bf16.xpose.msra.mxu1 %v1630_v8  ;;  %5290 = vmatprep.mubr.msk.bf16.mxu1 %vm6235_vm2, %v6234_v54 }
 0x74c   :  { %5300 = vmatprep.subr.bf16.mxu1 %v6234_v54 }
 0x74e   :  { %v1825_v42 = vpop.permute.xlu0 %1824 }
 0x74f   :  { %v1830_v43 = vsel %vm641_vm3, %v1825_v42, 0 }
 0x752   :  { %5291 = vmatmul.mubr.msk.bf16.vlgmr.msra.gmra.mrb[32].mxu1 %vm641_vm3, %v1623_v28  ;;  %v1823_v11 = vpop.permute.xlu0 %1822 }
 0x753   :  { %5301 = vmatpush3.bf16.xpose.msra.mxu1 %v1730_v41  ;;  %5302 = vmatprep.mubr.msk.bf16.mxu1 %vm6235_vm2, %v6234_v54 }
 0x754   :  { %5312 = vmatprep.subr.bf16.mxu1 %v6234_v54 }
 0x756   :  { %v2027_v29 = vpop.permute.xlu0 %2026 }
 0x757   :  { %v2032_v47 = vsel %vm1142_vm4, %v2027_v29, 0 }
 0x75a   :  { %5303 = vmatmul.mubr.msk.bf16.vlgmr.msra.gmra.mrb[36].mxu1 %vm641_vm3, %v1723_v21 }
 0x75b   :  { %5313 = vmatpush3.bf16.xpose.msra.mxu1 %v1830_v43  ;;  %5314 = vmatprep.mubr.msk.bf16.mxu1 %vm6235_vm2, %v6234_v54 }
 0x75c   :  { %5324 = vmatprep.subr.bf16.mxu1 %v6234_v54 }
 0x762   :  { %5315 = vmatmul.mubr.msk.bf16.vlgmr.msra.gmra.mrb[40].mxu1 %vm641_vm3, %v1823_v11 }
 0x763   :  { %5325 = vmatpush3.bf16.msra.mxu1 %v2032_v47  ;;  %5326 = vmatprep.mubr.msk.bf16.mxu1 %vm6235_vm2, %v6234_v54 }
 0x764   :  { %5336 = vmatprep.subr.bf16.mxu1 %v6234_v54 }
 0x765   :  { %v1111_v23 = vpop.xlane.xlu1 %1110 }
 0x766   :  { %5709 = vrcp.f32 %v1111_v23 }
 0x769   :  { %v1573_v52 = vpop.permute.xlu1 %1572 }
 0x76d   :  { %v1675_v26 = vpop.permute.xlu1 %1674 }
 0x76e   :  { %v1680_v60 = vsel %vm641_vm3, %v1675_v26, 0 }
 0x770   :  { %v5710_v33 = vpop.eup %5709 }
 0x771   :  { %v1127_v55 = vmul.f32 %v5710_v33, %v6860_v40  ;;  %v1673_v58 = vpop.permute.xlu1 %1672 }
 0x773   :  { %v1135_v56 = vpack.c.bf16 %v1127_v55, %v1127_v55 }
 0x775   :  { %5273 = vmatmul.mubr.msk.bf16.vlgmr.msra.gmra.mrb[36].mxu0 %vm1138_vm6, %v1135_v56  ;;  %v1775_v59 = vpop.permute.xlu1 %1774 }
 0x776   :  { %5283 = vmatpush3.bf16.xpose.msra.mxu0 %v1580_v46  ;;  %5284 = vmatprep.mubr.msk.bf16.mxu0 %vm6235_vm2, %v6234_v54  ;;  %v1780_v61 = vsel %vm641_vm3, %v1775_v59, 0 }
 0x777   :  { %5294 = vmatprep.subr.bf16.mxu0 %v6234_v54 }
 0x779   :  { %v1773_v40 = vpop.permute.xlu1 %1772 }
 0x77d   :  { %5285 = vmatmul.mubr.msk.bf16.vlgmr.msra.gmra.mrb[40].mxu0 %vm641_vm3, %v1573_v52  ;;  %v1875_v62 = vpop.permute.xlu1 %1874 }
 0x77e   :  { %5295 = vmatpush3.bf16.xpose.msra.mxu0 %v1680_v60  ;;  %5296 = vmatprep.mubr.msk.bf16.mxu0 %vm6235_vm2, %v6234_v54  ;;  %v1880_v50 = vsel %vm641_vm3, %v1875_v62, 0 }
 0x77f   :  { %5306 = vmatprep.subr.bf16.mxu0 %v6234_v54 }
 0x781   :  { %v1873_v38 = vpop.permute.xlu1 %1872 }
 0x785   :  { %5297 = vmatmul.mubr.msk.bf16.vlgmr.msra.gmra.mrb[44].mxu0 %vm641_vm3, %v1673_v58  ;;  %v2075_v3 = vpop.permute.xlu1 %2074 }
 0x786   :  { %5307 = vmatpush3.bf16.xpose.msra.mxu0 %v1780_v61  ;;  %5308 = vmatprep.mubr.msk.bf16.mxu0 %vm6235_vm2, %v6234_v54  ;;  %v2080_v51 = vsel %vm1142_vm4, %v2075_v3, 0 }
 0x787   :  { %5318 = vmatprep.subr.bf16.mxu0 %v6234_v54 }
 0x78d   :  { %5309 = vmatmul.mubr.msk.bf16.vlgmr.msra.gmra.mrb[48].mxu0 %vm641_vm3, %v1773_v40 }
 0x78e   :  { %5319 = vmatpush3.bf16.xpose.msra.mxu0 %v1880_v50  ;;  %5320 = vmatprep.mubr.msk.bf16.mxu0 %vm6235_vm2, %v6234_v54 }
 0x78f   :  { %5330 = vmatprep.subr.bf16.mxu0 %v6234_v54 }
 0x795   :  { %5321 = vmatmul.mubr.msk.bf16.vlgmr.msra.gmra.mrb[52].mxu0 %vm641_vm3, %v1873_v38 }
 0x796   :  { %5331 = vmatpush3.bf16.msra.mxu0 %v2080_v51  ;;  %5332 = vmatprep.mubr.msk.bf16.mxu0 %vm6235_vm2, %v6234_v54 }
 0x797   :  { %5342 = vmatprep.subr.bf16.mxu0 %v6234_v54 }
 0x7d2   :  { %v6979_v6 = vpop.f32.mrb[12].mxu1 }
 0x7d3   :  { %v5232_v48 = vpop.f32.mrb[13].mxu1 }
 0x7d4   :  { %v1183_v7 = vpop.f32.mrb[14].mxu1 }
 0x7d5   :  { %v5233_v1 = vpop.f32.mrb[15].mxu1 }
 0x7da   :  { %v6981_v12 = vpop.f32.mrb[24].mxu0  ;;  %v6983_v14 = vpop.f32.mrb[16].mxu1 }
 0x7db   :  { %v5238_v19 = vpop.f32.mrb[25].mxu0  ;;  %v5244_v22 = vpop.f32.mrb[17].mxu1 }
 0x7dc   :  { %v1231_v24 = vpop.f32.mrb[26].mxu0  ;;  %v1279_v27 = vpop.f32.mrb[18].mxu1 }
 0x7dd   :  { %v5239_v31 = vpop.f32.mrb[27].mxu0  ;;  %v5245_v20 = vpop.f32.mrb[19].mxu1 }
 0x7e2   :  { %v6985_v32 = vpop.f32.mrb[20].mxu1 }
 0x7e3   :  { %v5256_v35 = vpop.f32.mrb[21].mxu1 }
 0x7e4   :  { %v1375_v49 = vpop.f32.mrb[22].mxu1 }
 0x7e5   :  { %v5257_v37 = vpop.f32.mrb[23].mxu1 }
 0x80f   :  { %v6987_v30 = vpop.f32.mrb[28].mxu0 }
 0x810   :  { %v5250_v28 = vpop.f32.mrb[29].mxu0 }
 0x811   :  { %v1327_v17 = vpop.f32.mrb[30].mxu0 }
 0x812   :  { %v5251_v4 = vpop.f32.mrb[31].mxu0 }
 0x815   :  { %v6989_v2 = vpop.f32.mrb[24].mxu1 }
 0x816   :  { %v5268_v8 = vpop.f32.mrb[25].mxu1 }
 0x817   :  { %v6991_v21 = vpop.f32.mrb[32].mxu0  ;;  %v1471_v41 = vpop.f32.mrb[26].mxu1 }
 0x818   :  { %v5262_v42 = vpop.f32.mrb[33].mxu0  ;;  %v5269_v11 = vpop.f32.mrb[27].mxu1 }
 0x819   :  { %v1423_v43 = vpop.f32.mrb[34].mxu0 }
 0x81a   :  { %v5263_v29 = vpop.f32.mrb[35].mxu0 }
 0x81d   :  { %v1566_v13 = vpop.f32.mrb[28].mxu1 }
 0x81e   :  { %v6993_v47 = vmul.f32 0.35355338, %v1566_v13  ;;  %v5280_v23 = vpop.f32.mrb[29].mxu1 }
 0x81f   :  { %v1569_v52 = vpop.f32.mrb[30].mxu1 }
 0x820   :  { %v5281_v26 = vpop.f32.mrb[31].mxu1  ;;  %v1930_v33 = vsel %vm1039_vm5, %v6993_v47, -inf }
 0x821   :  { %1931 = vmax.xlane.f32.xlu0 %v1930_v33 }
 0x825   :  { %v1666_v55 = vpop.f32.mrb[32].mxu1 }
 0x826   :  { %v1924_v56 = vmul.f32 0.35355338, %v1666_v55  ;;  %v5292_v58 = vpop.f32.mrb[33].mxu1 }
 0x827   :  { %v1669_v46 = vpop.f32.mrb[34].mxu1 }
 0x828   :  { %v5293_v59 = vpop.f32.mrb[35].mxu1  ;;  %v1936_v60 = vsel %vm1039_vm5, %v1924_v56, -inf }
 0x829   :  { %1937 = vmax.xlane.f32.xlu0 %v1936_v60 }
 0x82d   :  { %v1766_v40 = vpop.f32.mrb[36].mxu1 }
 0x82e   :  { %v5304_v61 = vpop.f32.mrb[37].mxu1  ;;  %v1926_v8 = vmul.f32 0.35355338, %v1766_v40 }
 0x82f   :  { %v1769_v62 = vpop.f32.mrb[38].mxu1 }
 0x830   :  { %v5305_v38 = vpop.f32.mrb[39].mxu1  ;;  %v1942_v43 = vsel %vm1039_vm5, %v1926_v8, -inf }
 0x835   :  { %v1866_v50 = vpop.f32.mrb[40].mxu1 }
 0x836   :  { %v5316_v3 = vpop.f32.mrb[41].mxu1  ;;  %v7002_v11 = vmul.f32 0.35355338, %v1866_v50 }
 0x837   :  { %v1869_v51 = vpop.f32.mrb[42].mxu1 }
 0x838   :  { %v5317_v48 = vpop.f32.mrb[43].mxu1  ;;  %v1948_v33 = vsel %vm1039_vm5, %v7002_v11, -inf }
 0x848   :  { %v6998_v7 = vpop.f32.mrb[36].mxu0 }
 0x849   :  { %v5274_v1 = vpop.f32.mrb[37].mxu0 }
 0x84a   :  { %v1519_v19 = vpop.f32.mrb[38].mxu0 }
 0x84b   :  { %v5275_v22 = vpop.f32.mrb[39].mxu0 }
 0x850   :  { %v1616_v24 = vpop.f32.mrb[40].mxu0 }
 0x851   :  { %v1923_v27 = vmul.f32 0.35355338, %v1616_v24  ;;  %v5286_v31 = vpop.f32.mrb[41].mxu0 }
 0x852   :  { %v1619_v20 = vpop.f32.mrb[42].mxu0  ;;  %v2123_v31 = vpop.permute.xlu1 %2122 }
 0x853   :  { %v5287_v35 = vpop.f32.mrb[43].mxu0  ;;  %v1933_v49 = vsel %vm1039_vm5, %v1923_v27, -inf }
 0x854   :  { %1934 = vmax.xlane.f32.xlu1 %v1933_v49 }
 0x858   :  { %v1716_v37 = vpop.f32.mrb[44].mxu0 }
 0x859   :  { %v1925_v28 = vmul.f32 0.35355338, %v1716_v37  ;;  %v5298_v17 = vpop.f32.mrb[45].mxu0 }
 0x85a   :  { %v1719_v4 = vpop.f32.mrb[46].mxu0 }
 0x85b   :  { %v5299_v41 = vpop.f32.mrb[47].mxu0  ;;  %v1939_v42 = vsel %vm1039_vm5, %v1925_v28, -inf }
 0x85c   :  { %1940 = vmax.xlane.f32.xlu0 %v1939_v42 }
 0x860   :  { %1943 = vmax.xlane.f32.xlu0 %v1942_v43  ;;  %v1816_v29 = vpop.f32.mrb[48].mxu0 }
 0x861   :  { %v1927_v13 = vmul.f32 0.35355338, %v1816_v29  ;;  %v5310_v23 = vpop.f32.mrb[49].mxu0 }
 0x862   :  { %v1819_v52 = vpop.f32.mrb[50].mxu0 }
 0x863   :  { %v5311_v26 = vpop.f32.mrb[51].mxu0  ;;  %v1945_v55 = vsel %vm1039_vm5, %v1927_v13, -inf }
 0x864   :  { %1949 = vmax.xlane.f32.xlu0 %v1948_v33  ;;  %1946 = vmax.xlane.f32.xlu1 %v1945_v55 }
 0x868   :  { %v1916_v58 = vpop.f32.mrb[52].mxu0 }
 0x869   :  { %v5322_v46 = vpop.f32.mrb[53].mxu0  ;;  %v7012_v40 = vmul.f32 0.35355338, %v1916_v58 }
 0x86a   :  { %v1919_v59 = vpop.f32.mrb[54].mxu0 }
 0x86b   :  { %v5323_v60 = vpop.f32.mrb[55].mxu0  ;;  %v1951_v61 = vsel %vm1039_vm5, %v7012_v40, -inf }
 0x875   :  { %2266 = vrot.lane.b32.xlu1 %v6716_v16, %s6239_s17 }
 0x87a   :  { %2218 = vrot.lane.b32.xlu0 %v6703_v5, %s6239_s17 }
 0x899   :  { %1952 = vmax.xlane.f32.xlu1 %v1951_v61 }
 0x8ae   :  { %v1932_v62 = vpop.xlane.xlu0 %1931 }
 0x8af   :  { %v1954_v38 = vsub.f32 %v6993_v47, %v1932_v62  ;;  %v7025_v47 = vpop.permute.xlu1 %2170 }
 0x8b1   :  { %v1962_v50 = vmul.f32 1.442695, %v1954_v38 }
 0x8b3   :  { %5711 = vpow2.f32 %v1962_v50 }
 0x8b6   :  { %v1938_v3 = vpop.xlane.xlu0 %1937 }
 0x8b7   :  { %v1956_v51 = vsub.f32 %v1924_v56, %v1938_v3 }
 0x8b9   :  { %v1966_v48 = vmul.f32 1.442695, %v1956_v51 }
 0x8bb   :  { %5713 = vpow2.f32 %v1966_v48 }
 0x8bd   :  { %v7017_v1 = vpop.eup %5711 }
 0x8be   :  { %v1978_v19 = vsel %vm1039_vm5, %v7017_v1, 0.0 }
 0x8bf   :  { %1979 = vadd.xlane.f32.xlu0 %v1978_v19 }
 0x8c5   :  { %v7021_v22 = vpop.eup %5713 }
 0x8c6   :  { %v1984_v24 = vsel %vm1039_vm5, %v7021_v22, 0.0 }
 0x8c7   :  { %1985 = vadd.xlane.f32.xlu0 %v1984_v24 }
 0x8e1   :  { %v1935_v20 = vpop.xlane.xlu1 %1934 }
 0x8e2   :  { %v1955_v35 = vsub.f32 %v1923_v27, %v1935_v20 }
 0x8e4   :  { %v1964_v56 = vmul.f32 1.442695, %v1955_v35  ;;  %v2128_v35 = vsel %vm1142_vm4, %v2123_v31, 0 }
 0x8e6   :  { %5715 = vpow2.f32 %v1964_v56 }
 0x8e9   :  { %v1941_v49 = vpop.xlane.xlu0 %1940 }
 0x8ea   :  { %v1957_v37 = vsub.f32 %v1925_v28, %v1941_v49 }
 0x8ec   :  { %v1968_v17 = vmul.f32 1.442695, %v1957_v37 }
 0x8ed   :  { %v1944_v4 = vpop.xlane.xlu0 %1943 }
 0x8ee   :  { %5717 = vpow2.f32 %v1968_v17  ;;  %v1958_v41 = vsub.f32 %v1926_v8, %v1944_v4 }
 0x8f0   :  { %v7027_v42 = vpop.eup %5715  ;;  %v1970_v43 = vmul.f32 1.442695, %v1958_v41 }
 0x8f1   :  { %v1981_v29 = vsel %vm1039_vm5, %v7027_v42, 0.0  ;;  %v1947_v8 = vpop.xlane.xlu1 %1946  ;;  %v1950_v33 = vpop.xlane.xlu0 %1949 }
 0x8f2   :  { %5719 = vpow2.f32 %v1970_v43  ;;  %1982 = vadd.xlane.f32.xlu1 %v1981_v29  ;;  %v1959_v26 = vsub.f32 %v1927_v13, %v1947_v8  ;;  %v1960_v55 = vsub.f32 %v7002_v11, %v1950_v33 }
 0x8f4   :  { %v1972_v58 = vmul.f32 1.442695, %v1959_v26  ;;  %v1974_v46 = vmul.f32 1.442695, %v1960_v55 }
 0x8f5   :  { %v7054_v11 = vpop.permute.xlu1 %2266  ;;  %v2219_v13 = vpop.permute.xlu0 %2218 }
 0x8f6   :  { %5721 = vpow2.f32 %v1972_v58  ;;  %v2224_v37 = vsel %vm1142_vm4, %v2219_v13, 0 }
 0x8f7   :  { %5723 = vpow2.f32 %v1974_v46 }
 0x8f8   :  { %v7031_v23 = vpop.eup %5717 }
 0x8f9   :  { %v1987_v27 = vsel %vm1039_vm5, %v7031_v23, 0.0 }
 0x8fa   :  { %1988 = vadd.xlane.f32.xlu1 %v1987_v27  ;;  %v2176_v27 = vsel %vm1142_vm4, %v7025_v47, 0  ;;  %v2272_v47 = vsel %vm1142_vm4, %v7054_v11, 0 }
 0x8fc   :  { %v7035_v52 = vpop.eup %5719 }
 0x8fd   :  { %v1990_v28 = vsel %vm1039_vm5, %v7035_v52, 0.0 }
 0x8fe   :  { %1991 = vadd.xlane.f32.xlu0 %v1990_v28 }
 0x900   :  { %v7044_v59 = vpop.eup %5721 }
 0x901   :  { %v1993_v60 = vsel %vm1039_vm5, %v7044_v59, 0.0  ;;  %v7048_v61 = vpop.eup %5723 }
 0x902   :  { %v1996_v62 = vsel %vm1039_vm5, %v7048_v61, 0.0 }
 0x90b   :  { %2362 = vrot.lane.b32.xlu1 %v6721_v18, %s6239_s17 }
 0x914   :  { %2314 = vrot.lane.b32.xlu0 %v6709_v10, %s6239_s17 }
 0x926   :  { %v1953_v38 = vpop.xlane.xlu1 %1952 }
 0x927   :  { %v1961_v3 = vsub.f32 %v7012_v40, %v1953_v38 }
 0x929   :  { %v1976_v51 = vmul.f32 1.442695, %v1961_v3 }
 0x92f   :  { %1994 = vadd.xlane.f32.xlu1 %v1993_v60 }
 0x933   :  { %1997 = vadd.xlane.f32.xlu0 %v1996_v62 }
 0x940   :  { %2462 = vrot.lane.b32.xlu1 %v6700_v0, %s6240_s13 }
 0x949   :  { %2412 = vrot.lane.b32.xlu0 %v6698_v63, %s6240_s13 }
 0x94c   :  { %v1980_v50 = vpop.xlane.xlu0 %1979 }
 0x94d   :  { %5725 = vrcp.f32 %v1980_v50  ;;  %2410 = vrot.lane.b32.xlu0 %v6698_v63, %s6241_s20 }
 0x951   :  { %2512 = vrot.lane.b32.xlu0 %v6706_v9, %s6240_s13 }
 0x954   :  { %v1986_v48 = vpop.xlane.xlu0 %1985 }
 0x955   :  { %5727 = vrcp.f32 %v1986_v48  ;;  %2510 = vrot.lane.b32.xlu0 %v6706_v9, %s6241_s20 }
 0x956   :  { %5729 = vpow2.f32 %v1976_v51 }
 0x957   :  { %v5726_v19 = vpop.eup %5725 }
 0x958   :  { %v2010_v24 = vmul.f32 %v5726_v19, %v7017_v1 }
 0x959   :  { %2612 = vrot.lane.b32.xlu0 %v6703_v5, %s6240_s13 }
 0x95a   :  { %v2018_v20 = vpack.c.bf16 %v2010_v24, %v2010_v24 }
 0x95c   :  { %5327 = vmatmul.mubr.msk.bf16.vlgmr.msra.gmra.mrb[44].mxu1 %vm1138_vm6, %v2018_v20 }
 0x95d   :  { %5337 = vmatpush3.bf16.msra.mxu1 %v2128_v35  ;;  %2610 = vrot.lane.b32.xlu0 %v6703_v5, %s6241_s20 }
 0x95e   :  { %5338 = vmatprep.mubr.msk.bf16.mxu1 %vm6235_vm2, %v6234_v54  ;;  %5348 = vmatprep.subr.bf16.mxu1 %v6234_v54 }
 0x95f   :  { %v5728_v40 = vpop.eup %5727 }
 0x960   :  { %v7075_v56 = vpop.eup %5729  ;;  %v2012_v1 = vmul.f32 %v5728_v40, %v7021_v22 }
 0x961   :  { %2712 = vrot.lane.b32.xlu0 %v6709_v10, %s6240_s13  ;;  %v1999_v49 = vsel %vm1039_vm5, %v7075_v56, 0.0 }
 0x962   :  { %v2020_v31 = vpack.c.bf16 %v2012_v1, %v2012_v1 }
 0x964   :  { %5339 = vmatmul.mubr.msk.bf16.vlgmr.msra.gmra.mrb[48].mxu1 %vm1138_vm6, %v2020_v31  ;;  %2000 = vadd.xlane.f32.xlu1 %v1999_v49 }
 0x965   :  { %5349 = vmatpush3.bf16.msra.mxu1 %v2224_v37  ;;  %2710 = vrot.lane.b32.xlu0 %v6709_v10, %s6241_s20 }
 0x966   :  { %5350 = vmatprep.mubr.msk.bf16.mxu1 %vm6235_vm2, %v6234_v54  ;;  %5360 = vmatprep.subr.bf16.mxu1 %v6234_v54 }
 0x969   :  { %2914 = vrot.lane.b32.xlu0 %v6698_v63, %s6242_s23 }
 0x975   :  { %2460 = vrot.lane.b32.xlu1 %v6700_v0, %s6241_s20 }
 0x979   :  { %2562 = vrot.lane.b32.xlu1 %v6712_v15, %s6240_s13 }
 0x97d   :  { %2560 = vrot.lane.b32.xlu1 %v6712_v15, %s6241_s20 }
 0x97f   :  { %v1983_v22 = vpop.xlane.xlu1 %1982 }
 0x980   :  { %5731 = vrcp.f32 %v1983_v22 }
 0x981   :  { %2662 = vrot.lane.b32.xlu1 %v6716_v16, %s6240_s13 }
 0x985   :  { %2660 = vrot.lane.b32.xlu1 %v6716_v16, %s6241_s20 }
 0x987   :  { %v1989_v17 = vpop.xlane.xlu1 %1988 }
 0x988   :  { %5733 = vrcp.f32 %v1989_v17 }
 0x989   :  { %2762 = vrot.lane.b32.xlu1 %v6721_v18, %s6240_s13 }
 0x98a   :  { %v5732_v4 = vpop.eup %5731 }
 0x98b   :  { %v1992_v41 = vpop.xlane.xlu0 %1991  ;;  %v2011_v43 = vmul.f32 %v5732_v4, %v7027_v42 }
 0x98c   :  { %5735 = vrcp.f32 %v1992_v41 }
 0x98d   :  { %2760 = vrot.lane.b32.xlu1 %v6721_v18, %s6241_s20  ;;  %v2019_v29 = vpack.c.bf16 %v2011_v43, %v2011_v43 }
 0x98f   :  { %5333 = vmatmul.mubr.msk.bf16.vlgmr.msra.gmra.mrb[56].mxu0 %vm1138_vm6, %v2019_v29  ;;  %v2315_v55 = vpop.permute.xlu0 %2314 }
 0x990   :  { %5343 = vmatpush3.bf16.msra.mxu0 %v2176_v27  ;;  %5344 = vmatprep.mubr.msk.bf16.mxu0 %vm6235_vm2, %v6234_v54  ;;  %v2320_v58 = vsel %vm1142_vm4, %v2315_v55, 0 }
 0x991   :  { %2962 = vrot.lane.b32.xlu1 %v6700_v0, %s6242_s23  ;;  %5354 = vmatprep.subr.bf16.mxu0 %v6234_v54 }
 0x992   :  { %v5734_v42 = vpop.eup %5733 }
 0x993   :  { %v2013_v28 = vmul.f32 %v5734_v42, %v7031_v23 }
 0x995   :  { %3010 = vrot.lane.b32.xlu1 %v6706_v9, %s6242_s23  ;;  %v2021_v8 = vpack.c.bf16 %v2013_v28, %v2013_v28 }
 0x996   :  { %v5736_v26 = vpop.eup %5735 }
 0x997   :  { %5345 = vmatmul.mubr.msk.bf16.vlgmr.msra.gmra.mrb[60].mxu0 %vm1138_vm6, %v2021_v8  ;;  %v2014_v33 = vmul.f32 %v5736_v26, %v7035_v52  ;;  %v2363_v52 = vpop.permute.xlu1 %2362 }
 0x998   :  { %5355 = vmatpush3.bf16.msra.mxu0 %v2272_v47  ;;  %5356 = vmatprep.mubr.msk.bf16.mxu0 %vm6235_vm2, %v6234_v54  ;;  %v2368_v51 = vsel %vm1142_vm4, %v2363_v52, 0 }
 0x999   :  { %3058 = vrot.lane.b32.xlu1 %v6712_v15, %s6242_s23  ;;  %v2022_v23 = vpack.c.bf16 %v2014_v33, %v2014_v33  ;;  %5366 = vmatprep.subr.bf16.mxu0 %v6234_v54 }
 0x99b   :  { %5351 = vmatmul.mubr.msk.bf16.vlgmr.msra.gmra.mrb[52].mxu1 %vm1138_vm6, %v2022_v23 }
 0x99c   :  { %5361 = vmatpush3.bf16.msra.mxu1 %v2320_v58  ;;  %5362 = vmatprep.mubr.msk.bf16.mxu1 %vm6235_vm2, %v6234_v54 }
 0x99d   :  { %5372 = vmatprep.subr.bf16.mxu1 %v6234_v54 }
 0x9bc   :  { %v1995_v46 = vpop.xlane.xlu1 %1994 }
 0x9bd   :  { %5737 = vrcp.f32 %v1995_v46 }
 0x9c0   :  { %v1998_v60 = vpop.xlane.xlu0 %1997  ;;  %v2463_v22 = vpop.permute.xlu1 %2462 }
 0x9c1   :  { %5739 = vrcp.f32 %v1998_v60  ;;  %v2468_v26 = vsel %vm641_vm3, %v2463_v22, 0 }
 0x9c4   :  { %v2413_v62 = vpop.permute.xlu0 %2412 }
 0x9c5   :  { %v2418_v20 = vsel %vm641_vm3, %v2413_v62, 0 }
 0x9c7   :  { %v5738_v11 = vpop.eup %5737 }
 0x9c8   :  { %v2411_v13 = vpop.permute.xlu0 %2410  ;;  %v2015_v38 = vmul.f32 %v5738_v11, %v7044_v59 }
 0x9ca   :  { %v2023_v50 = vpack.c.bf16 %v2015_v38, %v2015_v38 }
 0x9cb   :  { %v5740_v3 = vpop.eup %5739 }
 0x9cc   :  { %v2513_v48 = vpop.permute.xlu0 %2512  ;;  %5357 = vmatmul.mubr.msk.bf16.vlgmr.msra.gmra.mrb[64].mxu0 %vm1138_vm6, %v2023_v50  ;;  %v2016_v19 = vmul.f32 %v5740_v3, %v7048_v61 }
 0x9cd   :  { %5367 = vmatpush3.bf16.msra.mxu0 %v2368_v51  ;;  %5368 = vmatprep.mubr.msk.bf16.mxu0 %vm6235_vm2, %v6234_v54  ;;  %v2518_v61 = vsel %vm641_vm3, %v2513_v48, 0 }
 0x9ce   :  { %v2024_v24 = vpack.c.bf16 %v2016_v19, %v2016_v19  ;;  %5378 = vmatprep.subr.bf16.mxu0 %v6234_v54 }
 0x9d0   :  { %v2511_v35 = vpop.permute.xlu0 %2510  ;;  %5363 = vmatmul.mubr.msk.bf16.vlgmr.msra.gmra.mrb[56].mxu1 %vm1138_vm6, %v2024_v24 }
 0x9d1   :  { %5373 = vmatpush3.bf16.xpose.msra.mxu1 %v2418_v20  ;;  %5374 = vmatprep.mubr.msk.bf16.mxu1 %vm6235_vm2, %v6234_v54 }
 0x9d2   :  { %5384 = vmatprep.subr.bf16.mxu1 %v6234_v54 }
 0x9d4   :  { %v2613_v59 = vpop.permute.xlu0 %2612 }
 0x9d5   :  { %v2618_v1 = vsel %vm641_vm3, %v2613_v59, 0 }
 0x9d8   :  { %5375 = vmatmul.mubr.msk.bf16.vlgmr.msra.gmra.mrb[60].mxu1 %vm641_vm3, %v2411_v13  ;;  %v2611_v40 = vpop.permute.xlu0 %2610 }
 0x9d9   :  { %5385 = vmatpush3.bf16.xpose.msra.mxu1 %v2518_v61  ;;  %5386 = vmatprep.mubr.msk.bf16.mxu1 %vm6235_vm2, %v6234_v54 }
 0x9da   :  { %5396 = vmatprep.subr.bf16.mxu1 %v6234_v54 }
 0x9dc   :  { %v2713_v31 = vpop.permute.xlu0 %2712 }
 0x9dd   :  { %v2718_v37 = vsel %vm641_vm3, %v2713_v31, 0 }
 0x9e0   :  { %5387 = vmatmul.mubr.msk.bf16.vlgmr.msra.gmra.mrb[64].mxu1 %vm641_vm3, %v2511_v35  ;;  %v2711_v49 = vpop.permute.xlu0 %2710 }
 0x9e1   :  { %5397 = vmatpush3.bf16.xpose.msra.mxu1 %v2618_v1  ;;  %5398 = vmatprep.mubr.msk.bf16.mxu1 %vm6235_vm2, %v6234_v54 }
 0x9e2   :  { %5408 = vmatprep.subr.bf16.mxu1 %v6234_v54 }
 0x9e4   :  { %v2915_v17 = vpop.permute.xlu0 %2914 }
 0x9e5   :  { %v2920_v4 = vsel %vm1142_vm4, %v2915_v17, 0 }
 0x9e8   :  { %5399 = vmatmul.mubr.msk.bf16.vlgmr.msra.gmra.mrb[68].mxu1 %vm641_vm3, %v2611_v40 }
 0x9e9   :  { %5409 = vmatpush3.bf16.xpose.msra.mxu1 %v2718_v37  ;;  %5410 = vmatprep.mubr.msk.bf16.mxu1 %vm6235_vm2, %v6234_v54 }
 0x9ea   :  { %5420 = vmatprep.subr.bf16.mxu1 %v6234_v54 }
 0x9f0   :  { %5411 = vmatmul.mubr.msk.bf16.vlgmr.msra.gmra.mrb[72].mxu1 %vm641_vm3, %v2711_v49 }
 0x9f1   :  { %5421 = vmatpush3.bf16.msra.mxu1 %v2920_v4  ;;  %v2001_v41 = vpop.xlane.xlu1 %2000  ;;  %5422 = vmatprep.mubr.msk.bf16.mxu1 %vm6235_vm2, %v6234_v54 }
 0x9f2   :  { %5741 = vrcp.f32 %v2001_v41  ;;  %5432 = vmatprep.subr.bf16.mxu1 %v6234_v54 }
 0x9f5   :  { %v2461_v43 = vpop.permute.xlu1 %2460 }
 0x9f9   :  { %v2563_v29 = vpop.permute.xlu1 %2562 }
 0x9fa   :  { %v2568_v33 = vsel %vm641_vm3, %v2563_v29, 0 }
 0x9fc   :  { %v5742_v27 = vpop.eup %5741 }
 0x9fd   :  { %v2017_v42 = vmul.f32 %v5742_v27, %v7075_v56  ;;  %v2561_v8 = vpop.permute.xlu1 %2560 }
 0x9ff   :  { %v2025_v28 = vpack.c.bf16 %v2017_v42, %v2017_v42 }
 0xa01   :  { %5369 = vmatmul.mubr.msk.bf16.vlgmr.msra.gmra.mrb[68].mxu0 %vm1138_vm6, %v2025_v28  ;;  %v2663_v47 = vpop.permute.xlu1 %2662 }
 0xa02   :  { %5379 = vmatpush3.bf16.xpose.msra.mxu0 %v2468_v26  ;;  %5380 = vmatprep.mubr.msk.bf16.mxu0 %vm6235_vm2, %v6234_v54  ;;  %v2668_v55 = vsel %vm641_vm3, %v2663_v47, 0 }
 0xa03   :  { %5390 = vmatprep.subr.bf16.mxu0 %v6234_v54 }
 0xa05   :  { %v2661_v56 = vpop.permute.xlu1 %2660 }
 0xa09   :  { %5381 = vmatmul.mubr.msk.bf16.vlgmr.msra.gmra.mrb[72].mxu0 %vm641_vm3, %v2461_v43  ;;  %v2763_v23 = vpop.permute.xlu1 %2762 }
 0xa0a   :  { %5391 = vmatpush3.bf16.xpose.msra.mxu0 %v2568_v33  ;;  %5392 = vmatprep.mubr.msk.bf16.mxu0 %vm6235_vm2, %v6234_v54  ;;  %v2768_v52 = vsel %vm641_vm3, %v2763_v23, 0 }
 0xa0b   :  { %5402 = vmatprep.subr.bf16.mxu0 %v6234_v54 }
 0xa0d   :  { %v2761_v58 = vpop.permute.xlu1 %2760 }
 0xa11   :  { %5393 = vmatmul.mubr.msk.bf16.vlgmr.msra.gmra.mrb[76].mxu0 %vm641_vm3, %v2561_v8  ;;  %v2963_v46 = vpop.permute.xlu1 %2962 }
 0xa12   :  { %5403 = vmatpush3.bf16.xpose.msra.mxu0 %v2668_v55  ;;  %5404 = vmatprep.mubr.msk.bf16.mxu0 %vm6235_vm2, %v6234_v54  ;;  %v2968_v60 = vsel %vm1142_vm4, %v2963_v46, 0 }
 0xa13   :  { %5414 = vmatprep.subr.bf16.mxu0 %v6234_v54 }
 0xa19   :  { %5405 = vmatmul.mubr.msk.bf16.vlgmr.msra.gmra.mrb[80].mxu0 %vm641_vm3, %v2661_v56 }
 0xa1a   :  { %5415 = vmatpush3.bf16.xpose.msra.mxu0 %v2768_v52  ;;  %5416 = vmatprep.mubr.msk.bf16.mxu0 %vm6235_vm2, %v6234_v54 }
 0xa1b   :  { %5426 = vmatprep.subr.bf16.mxu0 %v6234_v54 }
 0xa21   :  { %5417 = vmatmul.mubr.msk.bf16.vlgmr.msra.gmra.mrb[84].mxu0 %vm641_vm3, %v2761_v58 }
 0xa22   :  { %5427 = vmatpush3.bf16.msra.mxu0 %v2968_v60  ;;  %5428 = vmatprep.mubr.msk.bf16.mxu0 %vm6235_vm2, %v6234_v54 }
 0xa23   :  { %5438 = vmatprep.subr.bf16.mxu0 %v6234_v54 }
 0xa2f   :  { %v7189_v62 = vpop.f32.mrb[44].mxu1 }
 0xa30   :  { %v5328_v11 = vpop.f32.mrb[45].mxu1 }
 0xa31   :  { %v2071_v13 = vpop.f32.mrb[46].mxu1 }
 0xa32   :  { %v5329_v38 = vpop.f32.mrb[47].mxu1 }
 0xa37   :  { %v7191_v50 = vpop.f32.mrb[48].mxu1 }
 0xa38   :  { %v5340_v3 = vpop.f32.mrb[49].mxu1 }
 0xa39   :  { %v2167_v51 = vpop.f32.mrb[50].mxu1 }
 0xa3a   :  { %v5341_v48 = vpop.f32.mrb[51].mxu1 }
 0xa62   :  { %v7193_v19 = vpop.f32.mrb[56].mxu0 }
 0xa63   :  { %v5334_v24 = vpop.f32.mrb[57].mxu0 }
 0xa64   :  { %v2119_v20 = vpop.f32.mrb[58].mxu0 }
 0xa65   :  { %v5335_v35 = vpop.f32.mrb[59].mxu0 }
 0xa6a   :  { %v7195_v59 = vpop.f32.mrb[60].mxu0 }
 0xa6b   :  { %v5346_v61 = vpop.f32.mrb[61].mxu0 }
 0xa6c   :  { %v2215_v40 = vpop.f32.mrb[62].mxu0 }
 0xa6d   :  { %v5347_v1 = vpop.f32.mrb[63].mxu0 }
 0xa6e   :  { %v7197_v31 = vpop.f32.mrb[52].mxu1 }
 0xa6f   :  { %v5352_v49 = vpop.f32.mrb[53].mxu1 }
 0xa70   :  { %v2263_v37 = vpop.f32.mrb[54].mxu1 }
 0xa71   :  { %v5353_v22 = vpop.f32.mrb[55].mxu1 }
 0xa9f   :  { %v7199_v17 = vpop.f32.mrb[64].mxu0 }
 0xaa0   :  { %v5358_v4 = vpop.f32.mrb[65].mxu0 }
 0xaa1   :  { %v2311_v41 = vpop.f32.mrb[66].mxu0 }
 0xaa2   :  { %v5359_v43 = vpop.f32.mrb[67].mxu0 }
 0xaa3   :  { %v7201_v29 = vpop.f32.mrb[56].mxu1 }
 0xaa4   :  { %v5364_v27 = vpop.f32.mrb[57].mxu1 }
 0xaa5   :  { %v2359_v42 = vpop.f32.mrb[58].mxu1 }
 0xaa6   :  { %v5365_v28 = vpop.f32.mrb[59].mxu1 }
 0xaab   :  { %v2454_v8 = vpop.f32.mrb[60].mxu1 }
 0xaac   :  { %v7203_v26 = vmul.f32 0.35355338, %v2454_v8  ;;  %v5376_v47 = vpop.f32.mrb[61].mxu1 }
 0xaad   :  { %v2457_v33 = vpop.f32.mrb[62].mxu1 }
 0xaae   :  { %v5377_v56 = vpop.f32.mrb[63].mxu1  ;;  %v2818_v55 = vsel %vm1039_vm5, %v7203_v26, -inf }
 0xaaf   :  { %2819 = vmax.xlane.f32.xlu0 %v2818_v55 }
 0xab3   :  { %v2554_v23 = vpop.f32.mrb[64].mxu1 }
 0xab4   :  { %v2812_v58 = vmul.f32 0.35355338, %v2554_v23  ;;  %v5388_v52 = vpop.f32.mrb[65].mxu1 }
 0xab5   :  { %v2557_v46 = vpop.f32.mrb[66].mxu1 }
 0xab6   :  { %v5389_v60 = vpop.f32.mrb[67].mxu1  ;;  %v2824_v11 = vsel %vm1039_vm5, %v2812_v58, -inf }
 0xab7   :  { %2825 = vmax.xlane.f32.xlu0 %v2824_v11 }
 0xabb   :  { %v2654_v13 = vpop.f32.mrb[68].mxu1 }
 0xabc   :  { %v5400_v38 = vpop.f32.mrb[69].mxu1  ;;  %v2814_v33 = vmul.f32 0.35355338, %v2654_v13 }
 0xabd   :  { %v2657_v3 = vpop.f32.mrb[70].mxu1 }
 0xabe   :  { %v5401_v51 = vpop.f32.mrb[71].mxu1  ;;  %v2830_v52 = vsel %vm1039_vm5, %v2814_v33, -inf }
 0xac3   :  { %v2754_v48 = vpop.f32.mrb[72].mxu1 }
 0xac4   :  { %v5412_v24 = vpop.f32.mrb[73].mxu1  ;;  %v7212_v23 = vmul.f32 0.35355338, %v2754_v48 }
 0xac5   :  { %v2757_v20 = vpop.f32.mrb[74].mxu1 }
 0xac6   :  { %v5413_v35 = vpop.f32.mrb[75].mxu1  ;;  %v2836_v51 = vsel %vm1039_vm5, %v7212_v23, -inf }
 0xad4   :  { %v7208_v61 = vpop.f32.mrb[68].mxu0 }
 0xad5   :  { %v5370_v40 = vpop.f32.mrb[69].mxu0 }
 0xad6   :  { %v2407_v1 = vpop.f32.mrb[70].mxu0 }
 0xad7   :  { %v5371_v49 = vpop.f32.mrb[71].mxu0 }
 0xadc   :  { %v2504_v37 = vpop.f32.mrb[72].mxu0 }
 0xadd   :  { %v2811_v22 = vmul.f32 0.35355338, %v2504_v37  ;;  %v5382_v4 = vpop.f32.mrb[73].mxu0 }
 0xade   :  { %v2507_v41 = vpop.f32.mrb[74].mxu0 }
 0xadf   :  { %v5383_v43 = vpop.f32.mrb[75].mxu0  ;;  %v2821_v27 = vsel %vm1039_vm5, %v2811_v22, -inf }
 0xae0   :  { %2822 = vmax.xlane.f32.xlu1 %v2821_v27 }
 0xae4   :  { %v2604_v42 = vpop.f32.mrb[76].mxu0 }
 0xae5   :  { %v2813_v28 = vmul.f32 0.35355338, %v2604_v42  ;;  %v5394_v8 = vpop.f32.mrb[77].mxu0 }
 0xae6   :  { %v2607_v47 = vpop.f32.mrb[78].mxu0 }
 0xae7   :  { %v5395_v56 = vpop.f32.mrb[79].mxu0  ;;  %v2827_v55 = vsel %vm1039_vm5, %v2813_v28, -inf }
 0xae8   :  { %2828 = vmax.xlane.f32.xlu0 %v2827_v55  ;;  %v3011_v55 = vpop.permute.xlu1 %3010 }
 0xaec   :  { %2831 = vmax.xlane.f32.xlu0 %v2830_v52  ;;  %v2704_v46 = vpop.f32.mrb[80].mxu0 }
 0xaed   :  { %v2815_v60 = vmul.f32 0.35355338, %v2704_v46  ;;  %v5406_v11 = vpop.f32.mrb[81].mxu0 }
 0xaee   :  { %v2707_v38 = vpop.f32.mrb[82].mxu0 }
 0xaef   :  { %v5407_v3 = vpop.f32.mrb[83].mxu0  ;;  %v2833_v24 = vsel %vm1039_vm5, %v2815_v60, -inf }
 0xaf0   :  { %2837 = vmax.xlane.f32.xlu0 %v2836_v51  ;;  %2834 = vmax.xlane.f32.xlu1 %v2833_v24 }
 0xaf4   :  { %v2804_v13 = vpop.f32.mrb[84].mxu0 }
 0xaf5   :  { %v5418_v20 = vpop.f32.mrb[85].mxu0  ;;  %v7222_v40 = vmul.f32 0.35355338, %v2804_v13 }
 0xaf6   :  { %v2807_v35 = vpop.f32.mrb[86].mxu0 }
 0xaf7   :  { %v5419_v48 = vpop.f32.mrb[87].mxu0  ;;  %v2839_v1 = vsel %vm1039_vm5, %v7222_v40, -inf }
 0xb01   :  { %3154 = vrot.lane.b32.xlu1 %v6716_v16, %s6242_s23 }
 0xb06   :  { %3106 = vrot.lane.b32.xlu0 %v6703_v5, %s6242_s23 }
 0xb25   :  { %2840 = vmax.xlane.f32.xlu1 %v2839_v1 }
 0xb3c   :  { %v2820_v49 = vpop.xlane.xlu0 %2819 }
 0xb3d   :  { %v2842_v37 = vsub.f32 %v7203_v26, %v2820_v49  ;;  %v7235_v26 = vpop.permute.xlu1 %3058 }
 0xb3f   :  { %v2850_v4 = vmul.f32 1.442695, %v2842_v37 }
 0xb41   :  { %5743 = vpow2.f32 %v2850_v4 }
 0xb44   :  { %v2826_v41 = vpop.xlane.xlu0 %2825 }
 0xb45   :  { %v2844_v43 = vsub.f32 %v2812_v58, %v2826_v41 }
 0xb47   :  { %v2854_v27 = vmul.f32 1.442695, %v2844_v43 }
 0xb49   :  { %5745 = vpow2.f32 %v2854_v27 }
 0xb4b   :  { %v7227_v42 = vpop.eup %5743 }
 0xb4c   :  { %v2866_v8 = vsel %vm1039_vm5, %v7227_v42, 0.0 }
 0xb4d   :  { %2867 = vadd.xlane.f32.xlu0 %v2866_v8 }
 0xb53   :  { %v7231_v47 = vpop.eup %5745 }
 0xb54   :  { %v2872_v56 = vsel %vm1039_vm5, %v7231_v47, 0.0 }
 0xb55   :  { %2873 = vadd.xlane.f32.xlu0 %v2872_v56 }
 0xb6d   :  { %v2823_v52 = vpop.xlane.xlu1 %2822 }
 0xb6e   :  { %v2843_v46 = vsub.f32 %v2811_v22, %v2823_v52 }
 0xb70   :  { %v2852_v58 = vmul.f32 1.442695, %v2843_v46 }
 0xb72   :  { %5747 = vpow2.f32 %v2852_v58 }
 0xb75   :  { %v2829_v11 = vpop.xlane.xlu0 %2828 }
 0xb76   :  { %v2845_v38 = vsub.f32 %v2813_v28, %v2829_v11 }
 0xb78   :  { %v2856_v3 = vmul.f32 1.442695, %v2845_v38 }
 0xb79   :  { %v2832_v51 = vpop.xlane.xlu0 %2831 }
 0xb7a   :  { %5749 = vpow2.f32 %v2856_v3  ;;  %v2846_v24 = vsub.f32 %v2814_v33, %v2832_v51 }
 0xb7c   :  { %v7237_v13 = vpop.eup %5747  ;;  %v2858_v20 = vmul.f32 1.442695, %v2846_v24 }
 0xb7d   :  { %v2869_v35 = vsel %vm1039_vm5, %v7237_v13, 0.0  ;;  %v2835_v33 = vpop.xlane.xlu1 %2834  ;;  %v2838_v37 = vpop.xlane.xlu0 %2837 }
 0xb7e   :  { %5751 = vpow2.f32 %v2858_v20  ;;  %2870 = vadd.xlane.f32.xlu1 %v2869_v35  ;;  %v2847_v49 = vsub.f32 %v2815_v60, %v2835_v33  ;;  %v2848_v4 = vsub.f32 %v7212_v23, %v2838_v37 }
 0xb80   :  { %v2860_v41 = vmul.f32 1.442695, %v2847_v49  ;;  %v2862_v43 = vmul.f32 1.442695, %v2848_v4 }
 0xb81   :  { %v7264_v23 = vpop.permute.xlu1 %3154  ;;  %v3107_v60 = vpop.permute.xlu0 %3106 }
 0xb82   :  { %5753 = vpow2.f32 %v2860_v41  ;;  %v3112_v33 = vsel %vm1142_vm4, %v3107_v60, 0 }
 0xb83   :  { %5755 = vpow2.f32 %v2862_v43 }
 0xb84   :  { %v7241_v48 = vpop.eup %5749 }
 0xb85   :  { %v2875_v22 = vsel %vm1039_vm5, %v7241_v48, 0.0 }
 0xb86   :  { %2876 = vadd.xlane.f32.xlu1 %v2875_v22 }
 0xb88   :  { %v7245_v1 = vpop.eup %5751 }
 0xb89   :  { %v2878_v28 = vsel %vm1039_vm5, %v7245_v1, 0.0 }
 0xb8a   :  { %2879 = vadd.xlane.f32.xlu0 %v2878_v28 }
 0xb8c   :  { %v7254_v27 = vpop.eup %5753 }
 0xb8d   :  { %v2881_v8 = vsel %vm1039_vm5, %v7254_v27, 0.0  ;;  %v7258_v56 = vpop.eup %5755 }
 0xb8e   :  { %v2884_v52 = vsel %vm1039_vm5, %v7258_v56, 0.0 }
 0xb97   :  { %3250 = vrot.lane.b32.xlu1 %v6721_v18, %s6242_s23 }
 0xba0   :  { %3202 = vrot.lane.b32.xlu0 %v6709_v10, %s6242_s23 }
 0xbb2   :  { %v2841_v46 = vpop.xlane.xlu1 %2840 }
 0xbb3   :  { %v2849_v58 = vsub.f32 %v7222_v40, %v2841_v46  ;;  %v3016_v40 = vsel %vm1142_vm4, %v3011_v55, 0 }
 0xbb5   :  { %v2864_v38 = vmul.f32 1.442695, %v2849_v58  ;;  %v3160_v58 = vsel %vm1142_vm4, %v7264_v23, 0 }
 0xbbb   :  { %2882 = vadd.xlane.f32.xlu1 %v2881_v8  ;;  %v3064_v8 = vsel %vm1142_vm4, %v7235_v26, 0 }
 0xbbf   :  { %2885 = vadd.xlane.f32.xlu0 %v2884_v52 }
 0xbcc   :  { %3350 = vrot.lane.b32.xlu1 %v6700_v0, %s6243_s5 }
 0xbd5   :  { %3300 = vrot.lane.b32.xlu0 %v6698_v63, %s6243_s5 }
 0xbd9   :  { %3298 = vrot.lane.b32.xlu0 %v6698_v63, %s6244_s25 }
 0xbda   :  { %v2868_v11 = vpop.xlane.xlu0 %2867 }
 0xbdb   :  { %5757 = vrcp.f32 %v2868_v11 }
 0xbdc   :  { %5759 = vpow2.f32 %v2864_v38 }
 0xbdd   :  { %3400 = vrot.lane.b32.xlu0 %v6706_v9, %s6243_s5 }
 0xbe1   :  { %3398 = vrot.lane.b32.xlu0 %v6706_v9, %s6244_s25 }
 0xbe2   :  { %v2874_v3 = vpop.xlane.xlu0 %2873 }
 0xbe3   :  { %5761 = vrcp.f32 %v2874_v3 }
 0xbe5   :  { %v5758_v51 = vpop.eup %5757  ;;  %3500 = vrot.lane.b32.xlu0 %v6703_v5, %s6243_s5 }
 0xbe6   :  { %v2898_v24 = vmul.f32 %v5758_v51, %v7227_v42  ;;  %v7284_v35 = vpop.eup %5759 }
 0xbe7   :  { %v2887_v28 = vsel %vm1039_vm5, %v7284_v35, 0.0 }
 0xbe8   :  { %v2906_v20 = vpack.c.bf16 %v2898_v24, %v2898_v24 }
 0xbe9   :  { %3498 = vrot.lane.b32.xlu0 %v6703_v5, %s6244_s25 }
 0xbea   :  { %5423 = vmatmul.mubr.msk.bf16.vlgmr.msra.gmra.mrb[76].mxu1 %vm1138_vm6, %v2906_v20 }
 0xbeb   :  { %5433 = vmatpush3.bf16.msra.mxu1 %v3016_v40  ;;  %5434 = vmatprep.mubr.msk.bf16.mxu1 %vm6235_vm2, %v6234_v54 }
 0xbec   :  { %5444 = vmatprep.subr.bf16.mxu1 %v6234_v54 }
 0xbed   :  { %v5762_v22 = vpop.eup %5761  ;;  %3600 = vrot.lane.b32.xlu0 %v6709_v10, %s6243_s5 }
 0xbee   :  { %v2900_v42 = vmul.f32 %v5762_v22, %v7231_v47 }
 0xbf0   :  { %2888 = vadd.xlane.f32.xlu1 %v2887_v28  ;;  %v2908_v55 = vpack.c.bf16 %v2900_v42, %v2900_v42 }
 0xbf1   :  { %3598 = vrot.lane.b32.xlu0 %v6709_v10, %s6244_s25 }
 0xbf2   :  { %5435 = vmatmul.mubr.msk.bf16.vlgmr.msra.gmra.mrb[80].mxu1 %vm1138_vm6, %v2908_v55 }
 0xbf3   :  { %5445 = vmatpush3.bf16.msra.mxu1 %v3112_v33  ;;  %5446 = vmatprep.mubr.msk.bf16.mxu1 %vm6235_vm2, %v6234_v54 }
 0xbf4   :  { %5456 = vmatprep.subr.bf16.mxu1 %v6234_v54 }
 0xc01   :  { %3348 = vrot.lane.b32.xlu1 %v6700_v0, %s6244_s25 }
 0xc05   :  { %3450 = vrot.lane.b32.xlu1 %v6712_v15, %s6243_s5 }
 0xc09   :  { %3448 = vrot.lane.b32.xlu1 %v6712_v15, %s6244_s25 }
 0xc0b   :  { %v2871_v47 = vpop.xlane.xlu1 %2870 }
 0xc0c   :  { %5763 = vrcp.f32 %v2871_v47 }
 0xc0d   :  { %3550 = vrot.lane.b32.xlu1 %v6716_v16, %s6243_s5 }
 0xc11   :  { %3548 = vrot.lane.b32.xlu1 %v6716_v16, %s6244_s25 }
 0xc13   :  { %v2877_v49 = vpop.xlane.xlu1 %2876 }
 0xc14   :  { %5765 = vrcp.f32 %v2877_v49 }
 0xc15   :  { %3650 = vrot.lane.b32.xlu1 %v6721_v18, %s6243_s5 }
 0xc16   :  { %v5764_v37 = vpop.eup %5763 }
 0xc17   :  { %v2899_v4 = vmul.f32 %v5764_v37, %v7237_v13  ;;  %v2880_v41 = vpop.xlane.xlu0 %2879 }
 0xc18   :  { %5767 = vrcp.f32 %v2880_v41 }
 0xc19   :  { %3648 = vrot.lane.b32.xlu1 %v6721_v18, %s6244_s25  ;;  %v2907_v43 = vpack.c.bf16 %v2899_v4, %v2899_v4 }
 0xc1b   :  { %5429 = vmatmul.mubr.msk.bf16.vlgmr.msra.gmra.mrb[88].mxu0 %vm1138_vm6, %v2907_v43  ;;  %v3203_v26 = vpop.permute.xlu0 %3202 }
 0xc1c   :  { %5439 = vmatpush3.bf16.msra.mxu0 %v3064_v8  ;;  %5440 = vmatprep.mubr.msk.bf16.mxu0 %vm6235_vm2, %v6234_v54  ;;  %v3208_v3 = vsel %vm1142_vm4, %v3203_v26, 0 }
 0xc1d   :  { %5450 = vmatprep.subr.bf16.mxu0 %v6234_v54 }
 0xc1e   :  { %v5766_v52 = vpop.eup %5765 }
 0xc1f   :  { %v2901_v13 = vmul.f32 %v5766_v52, %v7241_v48  ;;  %v3251_v48 = vpop.permute.xlu1 %3250 }
 0xc20   :  { %v3256_v28 = vsel %vm1142_vm4, %v3251_v48, 0 }
 0xc21   :  { %v2909_v60 = vpack.c.bf16 %v2901_v13, %v2901_v13 }
 0xc22   :  { %v5768_v46 = vpop.eup %5767 }
 0xc23   :  { %v2902_v11 = vmul.f32 %v5768_v46, %v7245_v1  ;;  %5441 = vmatmul.mubr.msk.bf16.vlgmr.msra.gmra.mrb[92].mxu0 %vm1138_vm6, %v2909_v60 }
 0xc24   :  { %5451 = vmatpush3.bf16.msra.mxu0 %v3160_v58  ;;  %5452 = vmatprep.mubr.msk.bf16.mxu0 %vm6235_vm2, %v6234_v54 }
 0xc25   :  { %v2910_v38 = vpack.c.bf16 %v2902_v11, %v2902_v11  ;;  %5462 = vmatprep.subr.bf16.mxu0 %v6234_v54 }
 0xc27   :  { %5447 = vmatmul.mubr.msk.bf16.vlgmr.msra.gmra.mrb[84].mxu1 %vm1138_vm6, %v2910_v38 }
 0xc28   :  { %5457 = vmatpush3.bf16.msra.mxu1 %v3208_v3  ;;  %5458 = vmatprep.mubr.msk.bf16.mxu1 %vm6235_vm2, %v6234_v54 }
 0xc29   :  { %5468 = vmatprep.subr.bf16.mxu1 %v6234_v54 }
 0xc48   :  { %v2883_v1 = vpop.xlane.xlu1 %2882 }
 0xc49   :  { %5769 = vrcp.f32 %v2883_v1 }
 0xc4c   :  { %v2886_v23 = vpop.xlane.xlu0 %2885  ;;  %v3351_v52 = vpop.permute.xlu1 %3350 }
 0xc4d   :  { %5771 = vrcp.f32 %v2886_v23  ;;  %v3356_v3 = vsel %vm641_vm3, %v3351_v52, 0 }
 0xc50   :  { %v3301_v51 = vpop.permute.xlu0 %3300 }
 0xc51   :  { %v3306_v49 = vsel %vm641_vm3, %v3301_v51, 0 }
 0xc53   :  { %v5770_v24 = vpop.eup %5769 }
 0xc54   :  { %v2903_v20 = vmul.f32 %v5770_v24, %v7254_v27  ;;  %v3299_v40 = vpop.permute.xlu0 %3298 }
 0xc56   :  { %v2911_v22 = vpack.c.bf16 %v2903_v20, %v2903_v20 }
 0xc57   :  { %v5772_v42 = vpop.eup %5771 }
 0xc58   :  { %v2904_v55 = vmul.f32 %v5772_v42, %v7258_v56  ;;  %5453 = vmatmul.mubr.msk.bf16.vlgmr.msra.gmra.mrb[96].mxu0 %vm1138_vm6, %v2911_v22  ;;  %v3401_v33 = vpop.permute.xlu0 %3400 }
 0xc59   :  { %5463 = vmatpush3.bf16.msra.mxu0 %v3256_v28  ;;  %5464 = vmatprep.mubr.msk.bf16.mxu0 %vm6235_vm2, %v6234_v54  ;;  %v3406_v56 = vsel %vm641_vm3, %v3401_v33, 0 }
 0xc5a   :  { %v2912_v47 = vpack.c.bf16 %v2904_v55, %v2904_v55  ;;  %5474 = vmatprep.subr.bf16.mxu0 %v6234_v54 }
 0xc5c   :  { %5459 = vmatmul.mubr.msk.bf16.vlgmr.msra.gmra.mrb[88].mxu1 %vm1138_vm6, %v2912_v47  ;;  %v3399_v27 = vpop.permute.xlu0 %3398 }
 0xc5d   :  { %5469 = vmatpush3.bf16.xpose.msra.mxu1 %v3306_v49  ;;  %5470 = vmatprep.mubr.msk.bf16.mxu1 %vm6235_vm2, %v6234_v54 }
 0xc5e   :  { %5480 = vmatprep.subr.bf16.mxu1 %v6234_v54 }
 0xc60   :  { %v3501_v37 = vpop.permute.xlu0 %3500 }
 0xc61   :  { %v3506_v41 = vsel %vm641_vm3, %v3501_v37, 0 }
 0xc64   :  { %5471 = vmatmul.mubr.msk.bf16.vlgmr.msra.gmra.mrb[92].mxu1 %vm641_vm3, %v3299_v40  ;;  %v3499_v4 = vpop.permute.xlu0 %3498 }
 0xc65   :  { %5481 = vmatpush3.bf16.xpose.msra.mxu1 %v3406_v56  ;;  %5482 = vmatprep.mubr.msk.bf16.mxu1 %vm6235_vm2, %v6234_v54 }
 0xc66   :  { %5492 = vmatprep.subr.bf16.mxu1 %v6234_v54 }
 0xc68   :  { %v3601_v43 = vpop.permute.xlu0 %3600 }
 0xc69   :  { %v3606_v8 = vsel %vm641_vm3, %v3601_v43, 0 }
 0xc6c   :  { %5483 = vmatmul.mubr.msk.bf16.vlgmr.msra.gmra.mrb[96].mxu1 %vm641_vm3, %v3399_v27  ;;  %v3599_v13 = vpop.permute.xlu0 %3598 }
 0xc6d   :  { %5493 = vmatpush3.bf16.xpose.msra.mxu1 %v3506_v41  ;;  %5494 = vmatprep.mubr.msk.bf16.mxu1 %vm6235_vm2, %v6234_v54 }
 0xc6e   :  { %5504 = vmatprep.subr.bf16.mxu1 %v6234_v54 }
 0xc74   :  { %5495 = vmatmul.mubr.msk.bf16.vlgmr.msra.gmra.mrb[100].mxu1 %vm641_vm3, %v3499_v4 }
 0xc75   :  { %5505 = vmatpush3.bf16.xpose.msra.mxu1 %v3606_v8  ;;  %5506 = vmatprep.mubr.msk.bf16.mxu1 %vm6235_vm2, %v6234_v54 }
 0xc76   :  { %5516 = vmatprep.subr.bf16.mxu1 %v6234_v54 }
 0xc7c   :  { %5507 = vmatmul.mubr.msk.bf16.vlgmr.msra.gmra.mrb[104].mxu1 %vm641_vm3, %v3599_v13 }
 0xc7d   :  { %v2889_v60 = vpop.xlane.xlu1 %2888  ;;  %5518 = vmatprep.mubr.msk.bf16.mxu1 %vm6235_vm2, %v6234_v54 }
 0xc7e   :  { %5773 = vrcp.f32 %v2889_v60 }
 0xc81   :  { %v3349_v46 = vpop.permute.xlu1 %3348 }
 0xc85   :  { %v3451_v26 = vpop.permute.xlu1 %3450 }
 0xc86   :  { %v3456_v1 = vsel %vm641_vm3, %v3451_v26, 0 }
 0xc88   :  { %v5774_v58 = vpop.eup %5773 }
 0xc89   :  { %v2905_v11 = vmul.f32 %v5774_v58, %v7284_v35  ;;  %v3449_v48 = vpop.permute.xlu1 %3448 }
 0xc8b   :  { %v2913_v38 = vpack.c.bf16 %v2905_v11, %v2905_v11 }
 0xc8d   :  { %5465 = vmatmul.mubr.msk.bf16.vlgmr.msra.gmra.mrb[100].mxu0 %vm1138_vm6, %v2913_v38  ;;  %v3551_v23 = vpop.permute.xlu1 %3550 }
 0xc8e   :  { %5475 = vmatpush3.bf16.xpose.msra.mxu0 %v3356_v3  ;;  %5476 = vmatprep.mubr.msk.bf16.mxu0 %vm6235_vm2, %v6234_v54  ;;  %v3556_v51 = vsel %vm641_vm3, %v3551_v23, 0 }
 0xc8f   :  { %5486 = vmatprep.subr.bf16.mxu0 %v6234_v54 }
 0xc91   :  { %v3549_v35 = vpop.permute.xlu1 %3548 }
 0xc95   :  { %5477 = vmatmul.mubr.msk.bf16.vlgmr.msra.gmra.mrb[104].mxu0 %vm641_vm3, %v3349_v46  ;;  %v3651_v24 = vpop.permute.xlu1 %3650 }
 0xc96   :  { %5487 = vmatpush3.bf16.xpose.msra.mxu0 %v3456_v1  ;;  %5488 = vmatprep.mubr.msk.bf16.mxu0 %vm6235_vm2, %v6234_v54  ;;  %v3656_v20 = vsel %vm641_vm3, %v3651_v24, 0 }
 0xc97   :  { %5498 = vmatprep.subr.bf16.mxu0 %v6234_v54 }
 0xc99   :  { %v3649_v40 = vpop.permute.xlu1 %3648 }
 0xc9d   :  { %5489 = vmatmul.mubr.msk.bf16.vlgmr.msra.gmra.mrb[108].mxu0 %vm641_vm3, %v3449_v48 }
 0xc9e   :  { %5499 = vmatpush3.bf16.xpose.msra.mxu0 %v3556_v51  ;;  %5500 = vmatprep.mubr.msk.bf16.mxu0 %vm6235_vm2, %v6234_v54 }
 0xc9f   :  { %5510 = vmatprep.subr.bf16.mxu0 %v6234_v54 }
 0xca5   :  { %5501 = vmatmul.mubr.msk.bf16.vlgmr.msra.gmra.mrb[112].mxu0 %vm641_vm3, %v3549_v35 }
 0xca6   :  { %5511 = vmatpush3.bf16.xpose.msra.mxu0 %v3656_v20  ;;  %5512 = vmatprep.mubr.msk.bf16.mxu0 %vm6235_vm2, %v6234_v54 }
 0xca7   :  { %5522 = vmatprep.subr.bf16.mxu0 %v6234_v54 }
 0xcad   :  { %5513 = vmatmul.mubr.msk.bf16.vlgmr.msra.gmra.mrb[116].mxu0 %vm641_vm3, %v3649_v40 }
 0xcae   :  { %5524 = vmatprep.mubr.msk.bf16.mxu0 %vm6235_vm2, %v6234_v54 }
 0xcbd   :  { %v7387_v22 = vpop.f32.mrb[76].mxu1 }
 0xcbe   :  { %v5424_v42 = vpop.f32.mrb[77].mxu1 }
 0xcbf   :  { %v2959_v28 = vpop.f32.mrb[78].mxu1 }
 0xcc0   :  { %v5425_v55 = vpop.f32.mrb[79].mxu1 }
 0xcc5   :  { %v7389_v33 = vpop.f32.mrb[80].mxu1 }
 0xcc6   :  { %v5436_v47 = vpop.f32.mrb[81].mxu1 }
 0xcc7   :  { %v3055_v49 = vpop.f32.mrb[82].mxu1 }
 0xcc8   :  { %v5437_v27 = vpop.f32.mrb[83].mxu1 }
 0xcee   :  { %v7391_v56 = vpop.f32.mrb[88].mxu0 }
 0xcef   :  { %v5430_v37 = vpop.f32.mrb[89].mxu0 }
 0xcf0   :  { %v3007_v4 = vpop.f32.mrb[90].mxu0 }
 0xcf1   :  { %v5431_v41 = vpop.f32.mrb[91].mxu0 }
 0xcf6   :  { %v7393_v43 = vpop.f32.mrb[92].mxu0 }
 0xcf7   :  { %v5442_v8 = vpop.f32.mrb[93].mxu0 }
 0xcf8   :  { %v3103_v52 = vpop.f32.mrb[94].mxu0 }
 0xcf9   :  { %v5443_v13 = vpop.f32.mrb[95].mxu0 }
 0xcfa   :  { %v7395_v60 = vpop.f32.mrb[84].mxu1 }
 0xcfb   :  { %v5448_v46 = vpop.f32.mrb[85].mxu1 }
 0xcfc   :  { %v3151_v58 = vpop.f32.mrb[86].mxu1 }
 0xcfd   :  { %v5449_v11 = vpop.f32.mrb[87].mxu1 }
 0xd2b   :  { %v7397_v26 = vpop.f32.mrb[96].mxu0 }
 0xd2c   :  { %v5454_v38 = vpop.f32.mrb[97].mxu0 }
 0xd2d   :  { %v3199_v3 = vpop.f32.mrb[98].mxu0 }
 0xd2e   :  { %v5455_v48 = vpop.f32.mrb[99].mxu0 }
 0xd2f   :  { %v7399_v1 = vpop.f32.mrb[88].mxu1 }
 0xd30   :  { %v5460_v23 = vpop.f32.mrb[89].mxu1 }
 0xd31   :  { %v3247_v35 = vpop.f32.mrb[90].mxu1 }
 0xd32   :  { %v5461_v51 = vpop.f32.mrb[91].mxu1 }
 0xd37   :  { %v3342_v24 = vpop.f32.mrb[92].mxu1 }
 0xd38   :  { %v7401_v20 = vmul.f32 0.35355338, %v3342_v24  ;;  %v5472_v40 = vpop.f32.mrb[93].mxu1 }
 0xd39   :  { %v3345_v42 = vpop.f32.mrb[94].mxu1 }
 0xd3a   :  { %v5473_v28 = vpop.f32.mrb[95].mxu1  ;;  %v3706_v55 = vsel %vm1039_vm5, %v7401_v20, -inf }
 0xd3b   :  { %3707 = vmax.xlane.f32.xlu0 %v3706_v55 }
 0xd3f   :  { %v3442_v47 = vpop.f32.mrb[96].mxu1 }
 0xd40   :  { %v7405_v49 = vmul.f32 0.35355338, %v3442_v47  ;;  %v5484_v27 = vpop.f32.mrb[97].mxu1 }
 0xd41   :  { %v3445_v37 = vpop.f32.mrb[98].mxu1 }
 0xd42   :  { %v5485_v4 = vpop.f32.mrb[99].mxu1  ;;  %v3712_v41 = vsel %vm1039_vm5, %v7405_v49, -inf }
 0xd43   :  { %3713 = vmax.xlane.f32.xlu0 %v3712_v41 }
 0xd47   :  { %v3542_v8 = vpop.f32.mrb[100].mxu1 }
 0xd48   :  { %v5496_v52 = vpop.f32.mrb[101].mxu1 }
 0xd49   :  { %v3545_v13 = vpop.f32.mrb[102].mxu1  ;;  %v3702_v52 = vmul.f32 0.35355338, %v3542_v8 }
 0xd4a   :  { %v5497_v46 = vpop.f32.mrb[103].mxu1 }
 0xd4f   :  { %v3642_v58 = vpop.f32.mrb[104].mxu1 }
 0xd50   :  { %v5508_v11 = vpop.f32.mrb[105].mxu1 }
 0xd51   :  { %v3645_v38 = vpop.f32.mrb[106].mxu1  ;;  %v3704_v11 = vmul.f32 0.35355338, %v3642_v58 }
 0xd52   :  { %v5509_v3 = vpop.f32.mrb[107].mxu1  ;;  %v3718_v38 = vsel %vm1039_vm5, %v3702_v52, -inf }
 0xd60   :  { %v7409_v48 = vpop.f32.mrb[100].mxu0 }
 0xd61   :  { %v5466_v23 = vpop.f32.mrb[101].mxu0 }
 0xd62   :  { %v3295_v35 = vpop.f32.mrb[102].mxu0 }
 0xd63   :  { %v5467_v51 = vpop.f32.mrb[103].mxu0 }
 0xd68   :  { %v3392_v24 = vpop.f32.mrb[104].mxu0 }
 0xd69   :  { %v3699_v40 = vmul.f32 0.35355338, %v3392_v24  ;;  %v5478_v42 = vpop.f32.mrb[105].mxu0 }
 0xd6a   :  { %v3395_v28 = vpop.f32.mrb[106].mxu0  ;;  %v3724_v42 = vsel %vm1039_vm5, %v3704_v11, -inf }
 0xd6b   :  { %v5479_v55 = vpop.f32.mrb[107].mxu0  ;;  %v3709_v47 = vsel %vm1039_vm5, %v3699_v40, -inf }
 0xd6c   :  { %3710 = vmax.xlane.f32.xlu1 %v3709_v47 }
 0xd70   :  { %v3492_v27 = vpop.f32.mrb[108].mxu0 }
 0xd71   :  { %v7412_v37 = vmul.f32 0.35355338, %v3492_v27  ;;  %v5490_v4 = vpop.f32.mrb[109].mxu0 }
 0xd72   :  { %v3495_v41 = vpop.f32.mrb[110].mxu0 }
 0xd73   :  { %v5491_v13 = vpop.f32.mrb[111].mxu0  ;;  %v3715_v46 = vsel %vm1039_vm5, %v7412_v37, -inf }
 0xd74   :  { %3716 = vmax.xlane.f32.xlu0 %v3715_v46 }
 0xd78   :  { %3719 = vmax.xlane.f32.xlu0 %v3718_v38  ;;  %v3592_v3 = vpop.f32.mrb[112].mxu0 }
 0xd79   :  { %v7417_v23 = vmul.f32 0.35355338, %v3592_v3  ;;  %v5502_v35 = vpop.f32.mrb[113].mxu0 }
 0xd7a   :  { %v3595_v51 = vpop.f32.mrb[114].mxu0 }
 0xd7b   :  { %v5503_v24 = vpop.f32.mrb[115].mxu0  ;;  %v3721_v8 = vsel %vm1039_vm5, %v7417_v23, -inf }
 0xd7c   :  { %3725 = vmax.xlane.f32.xlu0 %v3724_v42  ;;  %3722 = vmax.xlane.f32.xlu1 %v3721_v8 }
 0xd80   :  { %v3692_v28 = vpop.f32.mrb[116].mxu0 }
 0xd81   :  { %v5514_v55 = vpop.f32.mrb[117].mxu0  ;;  %v7428_v27 = vmul.f32 0.35355338, %v3692_v28 }
 0xd82   :  { %v3695_v47 = vpop.f32.mrb[118].mxu0 }
 0xd83   :  { %v5515_v58 = vpop.f32.mrb[119].mxu0  ;;  %v3727_v4 = vsel %vm1039_vm5, %v7428_v27, -inf }
 0xd8d   :  { %3850 = vrot.lane.b32.xlu1 %v6700_v0, %s6245_s2 }
 0xd91   :  { %3898 = vrot.lane.b32.xlu1 %v6706_v9, %s6245_s2 }
 0xd92   :  { %3802 = vrot.lane.b32.xlu0 %v6698_v63, %s6245_s2 }
 0xdb5   :  { %3728 = vmax.xlane.f32.xlu1 %v3727_v4 }
 0xdc6   :  { %3946 = vrot.lane.b32.xlu1 %v6712_v15, %s6245_s2 }
 0xdc8   :  { %v3708_v41 = vpop.xlane.xlu0 %3707 }
 0xdc9   :  { %v3730_v13 = vsub.f32 %v7401_v20, %v3708_v41 }
 0xdcb   :  { %v3738_v46 = vmul.f32 1.442695, %v3730_v13 }
 0xdcd   :  { %5775 = vpow2.f32 %v3738_v46 }
 0xdd0   :  { %v3714_v0 = vpop.xlane.xlu0 %3713 }
 0xdd1   :  { %v3732_v9 = vsub.f32 %v7405_v49, %v3714_v0 }
 0xdd3   :  { %v3742_v38 = vmul.f32 1.442695, %v3732_v9 }
 0xdd5   :  { %5777 = vpow2.f32 %v3742_v38 }
 0xdd7   :  { %v7436_v63 = vpop.eup %5775 }
 0xdd8   :  { %v3754_v3 = vsel %vm1039_vm5, %v7436_v63, 0.0 }
 0xdd9   :  { %3755 = vadd.xlane.f32.xlu0 %v3754_v3 }
 0xddf   :  { %v7440_v35 = vpop.eup %5777 }
 0xde0   :  { %v3760_v15 = vsel %vm1039_vm5, %v7440_v35, 0.0 }
 0xde1   :  { %3761 = vadd.xlane.f32.xlu0 %v3760_v15 }
 0xdf7   :  { %3994 = vrot.lane.b32.xlu0 %v6703_v5, %s6245_s2 }
 0xdf9   :  { %v3711_v20 = vpop.xlane.xlu1 %3710 }
 0xdfa   :  { %v3731_v51 = vsub.f32 %v3699_v40, %v3711_v20 }
 0xdfc   :  { %v3740_v49 = vmul.f32 1.442695, %v3731_v51 }
 0xdfe   :  { %5779 = vpow2.f32 %v3740_v49 }
 0xe01   :  { %v3717_v24 = vpop.xlane.xlu0 %3716 }
 0xe02   :  { %v3733_v3 = vsub.f32 %v7412_v37, %v3717_v24 }
 0xe04   :  { %v3744_v15 = vmul.f32 1.442695, %v3733_v3 }
 0xe05   :  { %v3720_v42 = vpop.xlane.xlu0 %3719 }
 0xe06   :  { %v3734_v8 = vsub.f32 %v3702_v52, %v3720_v42 }
 0xe08   :  { %v7446_v28 = vpop.eup %5779  ;;  %v3746_v55 = vmul.f32 1.442695, %v3734_v8 }
 0xe09   :  { %v3726_v47 = vpop.xlane.xlu0 %3725  ;;  %v3723_v58 = vpop.xlane.xlu1 %3722  ;;  %v3757_v4 = vsel %vm1039_vm5, %v7446_v28, 0.0 }
 0xe0a   :  { %5781 = vpow2.f32 %v3746_v55  ;;  %v3736_v41 = vsub.f32 %v3704_v11, %v3726_v47  ;;  %3758 = vadd.xlane.f32.xlu1 %v3757_v4  ;;  %v3735_v20 = vsub.f32 %v7417_v23, %v3723_v58 }
 0xe0c   :  { %v3750_v13 = vmul.f32 1.442695, %v3736_v41  ;;  %v3748_v51 = vmul.f32 1.442695, %v3735_v20 }
 0xe0d   :  { %v3803_v5 = vpop.permute.xlu0 %3802  ;;  %v3851_v46 = vpop.permute.xlu1 %3850 }
 0xe0e   :  { %5783 = vpow2.f32 %v3750_v13  ;;  %v3808_v40 = vsel %vm1142_vm4, %v3803_v5, 0  ;;  %v3856_v0 = vsel %vm1142_vm4, %v3851_v46, 0 }
 0xe0f   :  { %5517 = vmatpush3.bf16.msra.mxu1 %v3808_v40  ;;  %5523 = vmatpush3.bf16.msra.mxu0 %v3856_v0  ;;  %5785 = vpow2.f32 %v3744_v15 }
 0xe10   :  { %5528 = vmatprep.subr.bf16.mxu1 %v6234_v54  ;;  %5534 = vmatprep.subr.bf16.mxu0 %v6234_v54  ;;  %5787 = vpow2.f32 %v3748_v51 }
 0xe14   :  { %v7454_v52 = vpop.eup %5781 }
 0xe15   :  { %v3766_v11 = vsel %vm1039_vm5, %v7454_v52, 0.0 }
 0xe16   :  { %3767 = vadd.xlane.f32.xlu0 %v3766_v11 }
 0xe18   :  { %v7458_v9 = vpop.eup %5783 }
 0xe19   :  { %v3772_v38 = vsel %vm1039_vm5, %v7458_v9, 0.0  ;;  %v7472_v49 = vpop.eup %5785 }
 0xe1a   :  { %3773 = vadd.xlane.f32.xlu0 %v3772_v38  ;;  %v3763_v37 = vsel %vm1039_vm5, %v7472_v49, 0.0 }
 0xe1b   :  { %4042 = vrot.lane.b32.xlu1 %v6716_v16, %s6245_s2  ;;  %v3899_v16 = vpop.permute.xlu1 %3898 }
 0xe1c   :  { %v3904_v24 = vsel %vm1142_vm4, %v3899_v16, 0 }
 0xe30   :  { %4090 = vrot.lane.b32.xlu0 %v6709_v10, %s6245_s2  ;;  %v7478_v10 = vpop.eup %5787 }
 0xe31   :  { %v3769_v23 = vsel %vm1039_vm5, %v7478_v10, 0.0 }
 0xe34   :  { %4194 = vrot.lane.b32.xlu0 %v7189_v62, %s6246_s24 }
 0xe38   :  { %4198 = vrot.lane.b32.xlu0 %v7191_v50, %s6246_s24 }
 0xe3c   :  { %4202 = vrot.lane.b32.xlu0 %v7197_v31, %s6246_s24 }
 0xe3f   :  { %3764 = vadd.xlane.f32.xlu1 %v3763_v37 }
 0xe40   :  { %4206 = vrot.lane.b32.xlu0 %v7201_v29, %s6246_s24 }
 0xe42   :  { %v3729_v62 = vpop.xlane.xlu1 %3728 }
 0xe43   :  { %v3737_v50 = vsub.f32 %v7428_v27, %v3729_v62  ;;  %3770 = vadd.xlane.f32.xlu1 %v3769_v23 }
 0xe44   :  { %4226 = vrot.lane.b32.xlu0 %v7387_v22, %s6247_s3 }
 0xe45   :  { %v3752_v31 = vmul.f32 1.442695, %v3737_v50 }
 0xe47   :  { %5789 = vpow2.f32 %v3752_v31 }
 0xe48   :  { %4230 = vrot.lane.b32.xlu0 %v7389_v33, %s6247_s3 }
 0xe4c   :  { %4234 = vrot.lane.b32.xlu0 %v7395_v60, %s6247_s3 }
 0xe50   :  { %4238 = vrot.lane.b32.xlu0 %v7399_v1, %s6247_s3 }
 0xe51   :  { %v7493_v29 = vpop.eup %5789 }
 0xe52   :  { %v3775_v27 = vsel %vm1039_vm5, %v7493_v29, 0.0 }
 0xe53   :  { %3776 = vadd.xlane.f32.xlu1 %v3775_v27 }
 0xe64   :  { %4138 = vrot.lane.b32.xlu1 %v6721_v18, %s6245_s2 }
 0xe66   :  { %v3756_v22 = vpop.xlane.xlu0 %3755 }
 0xe67   :  { %5791 = vrcp.f32 %v3756_v22 }
 0xe68   :  { %4196 = vrot.lane.b32.xlu1 %v7193_v19, %s6246_s24 }
 0xe6c   :  { %4200 = vrot.lane.b32.xlu1 %v7195_v59, %s6246_s24 }
 0xe6e   :  { %v3762_v33 = vpop.xlane.xlu0 %3761 }
 0xe6f   :  { %5793 = vrcp.f32 %v3762_v33 }
 0xe70   :  { %4204 = vrot.lane.b32.xlu1 %v7199_v17, %s6246_s24 }
 0xe71   :  { %v5792_v60 = vpop.eup %5791 }
 0xe72   :  { %v3786_v1 = vmul.f32 %v5792_v60, %v7436_v63  ;;  %v3995_v17 = vpop.permute.xlu0 %3994 }
 0xe73   :  { %v4000_v63 = vsel %vm1142_vm4, %v3995_v17, 0 }
 0xe74   :  { %4208 = vrot.lane.b32.xlu1 %v7208_v61, %s6246_s24  ;;  %v3794_v18 = vpack.c.bf16 %v3786_v1, %v3786_v1 }
 0xe76   :  { %5519 = vmatmul.mubr.msk.bf16.vlgmr.msra.gmra.mrb[108].mxu1 %vm1138_vm6, %v3794_v18 }
 0xe77   :  { %5529 = vmatpush3.bf16.msra.mxu1 %v3904_v24  ;;  %5530 = vmatprep.mubr.msk.bf16.mxu1 %vm6235_vm2, %v6234_v54 }
 0xe78   :  { %4228 = vrot.lane.b32.xlu1 %v7391_v56, %s6247_s3  ;;  %5540 = vmatprep.subr.bf16.mxu1 %v6234_v54  ;;  %v3947_v56 = vpop.permute.xlu1 %3946 }
 0xe79   :  { %v5794_v19 = vpop.eup %5793  ;;  %v3952_v47 = vsel %vm1142_vm4, %v3947_v56, 0 }
 0xe7a   :  { %v3788_v59 = vmul.f32 %v5794_v19, %v7440_v35 }
 0xe7c   :  { %4232 = vrot.lane.b32.xlu1 %v7393_v43, %s6247_s3  ;;  %v3796_v61 = vpack.c.bf16 %v3788_v59, %v3788_v59 }
 0xe7e   :  { %5531 = vmatmul.mubr.msk.bf16.vlgmr.msra.gmra.mrb[112].mxu1 %vm1138_vm6, %v3796_v61 }
 0xe7f   :  { %5541 = vmatpush3.bf16.msra.mxu1 %v4000_v63  ;;  %5542 = vmatprep.mubr.msk.bf16.mxu1 %vm6235_vm2, %v6234_v54 }
 0xe80   :  { %4236 = vrot.lane.b32.xlu1 %v7397_v26, %s6247_s3  ;;  %5552 = vmatprep.subr.bf16.mxu1 %v6234_v54 }
 0xe84   :  { %4240 = vrot.lane.b32.xlu1 %v7409_v48, %s6247_s3 }
 0xe97   :  { %v3759_v35 = vpop.xlane.xlu1 %3758 }
 0xe98   :  { %5795 = vrcp.f32 %v3759_v35 }
 0xe9b   :  { %v4043_v40 = vpop.permute.xlu1 %4042 }
 0xe9c   :  { %v4048_v20 = vsel %vm1142_vm4, %v4043_v40, 0 }
 0xea2   :  { %v5796_v43 = vpop.eup %5795 }
 0xea3   :  { %v3787_v42 = vmul.f32 %v5796_v43, %v7446_v28  ;;  %v3768_v8 = vpop.xlane.xlu0 %3767 }
 0xea4   :  { %5797 = vrcp.f32 %v3768_v8  ;;  %v5635_v8 = vld [vmem:[#allocation14] sm:$0xff]  }
 0xea5   :  { %v3795_v55 = vpack.c.bf16 %v3787_v42, %v3787_v42 }
 0xea7   :  { %v3774_v58 = vpop.xlane.xlu0 %3773  ;;  %5525 = vmatmul.mubr.msk.bf16.vlgmr.msra.gmra.mrb[120].mxu0 %vm1138_vm6, %v3795_v55 }
 0xea8   :  { %5799 = vrcp.f32 %v3774_v58  ;;  %5535 = vmatpush3.bf16.msra.mxu0 %v3952_v47  ;;  %5536 = vmatprep.mubr.msk.bf16.mxu0 %vm6235_vm2, %v6234_v54 }
 0xea9   :  { %5546 = vmatprep.subr.bf16.mxu0 %v6234_v54 }
 0xeab   :  { %v4091_v4 = vpop.permute.xlu0 %4090 }
 0xeac   :  { %v4096_v13 = vsel %vm1142_vm4, %v4091_v4, 0  ;;  %v5636_v4 = vld [vmem:[#allocation14 + $0x8] sm:$0xff]  }
 0xeae   :  { %v5798_v26 = vpop.eup %5797 }
 0xeaf   :  { %v3790_v48 = vmul.f32 %v5798_v26, %v7454_v52 }
 0xeb1   :  { %v3798_v28 = vpack.c.bf16 %v3790_v48, %v3790_v48 }
 0xeb2   :  { %v5800_v41 = vpop.eup %5799 }
 0xeb3   :  { %5543 = vmatmul.mubr.msk.bf16.vlgmr.msra.gmra.mrb[116].mxu1 %vm1138_vm6, %v3798_v28  ;;  %v3792_v5 = vmul.f32 %v5800_v41, %v7458_v9 }
 0xeb4   :  { %5553 = vmatpush3.bf16.msra.mxu1 %v4096_v13  ;;  %5554 = vmatprep.mubr.msk.bf16.mxu1 %vm6235_vm2, %v6234_v54 }
 0xeb5   :  { %v3800_v46 = vpack.c.bf16 %v3792_v5, %v3792_v5  ;;  %5564 = vmatprep.subr.bf16.mxu1 %v5635_v8  ;;  %v4195_v5 = vpop.permute.xlu0 %4194 }
 0xeb9   :  { %v4199_v40 = vpop.permute.xlu0 %4198 }
 0xebb   :  { %5555 = vmatmul.mubr.msk.bf16.vlgmr.msra.gmra.mrb[120].mxu1 %vm1138_vm6, %v3800_v46 }
 0xebc   :  { %5565 = vmatpush3.bf16.msra.mxu1 %v5635_v8 }
 0xebd   :  { %5566 = vmatprep.subr.bf16.mxu1 %v5636_v4 }
 0xec0   :  { %5567 = vmatpush3.bf16.msra.mxu1 %v5636_v4 }
 0xecc   :  { %v3765_v0 = vpop.xlane.xlu1 %3764 }
 0xecd   :  { %5801 = vrcp.f32 %v3765_v0 }
 0xed0   :  { %v3771_v52 = vpop.xlane.xlu1 %3770 }
 0xed1   :  { %5803 = vrcp.f32 %v3771_v52 }
 0xed7   :  { %v5802_v11 = vpop.eup %5801 }
 0xed8   :  { %v3789_v38 = vmul.f32 %v5802_v11, %v7472_v49 }
 0xeda   :  { %v3797_v3 = vpack.c.bf16 %v3789_v38, %v3789_v38 }
 0xedb   :  { %v5804_v15 = vpop.eup %5803 }
 0xedc   :  { %5537 = vmatmul.mubr.msk.bf16.vlgmr.msra.gmra.mrb[124].mxu0 %vm1138_vm6, %v3797_v3  ;;  %v3791_v9 = vmul.f32 %v5804_v15, %v7478_v10  ;;  %v4203_v15 = vpop.permute.xlu0 %4202 }
 0xedd   :  { %5547 = vmatpush3.bf16.msra.mxu0 %v4048_v20  ;;  %5548 = vmatprep.mubr.msk.bf16.mxu0 %vm6235_vm2, %v6234_v54 }
 0xede   :  { %5558 = vmatprep.subr.bf16.mxu0 %v6234_v54  ;;  %v3799_v16 = vpack.c.bf16 %v3791_v9, %v3791_v9 }
 0xee0   :  { %v3777_v51 = vpop.xlane.xlu1 %3776  ;;  %v4207_v9 = vpop.permute.xlu0 %4206 }
 0xee1   :  { %5805 = vrcp.f32 %v3777_v51 }
 0xee4   :  { %5549 = vmatmul.mubr.msk.bf16.vlgmr.msra.gmra.mrb[128].mxu0 %vm1138_vm6, %v3799_v16  ;;  %v4139_v49 = vpop.permute.xlu1 %4138  ;;  %v4227_v16 = vpop.permute.xlu0 %4226 }
 0xee5   :  { %v4144_v37 = vsel %vm1142_vm4, %v4139_v49, 0  ;;  %5560 = vmatprep.mubr.msk.bf16.mxu0 %vm6235_vm2, %v6234_v54 }
 0xee6   :  { %5559 = vmatpush3.bf16.msra.mxu0 %v4144_v37 }
 0xee8   :  { %v4197_v46 = vpop.permute.xlu1 %4196  ;;  %v4231_v37 = vpop.permute.xlu0 %4230 }
 0xeeb   :  { %v5806_v62 = vpop.eup %5805 }
 0xeec   :  { %v3793_v23 = vmul.f32 %v5806_v62, %v7493_v29  ;;  %v4201_v11 = vpop.permute.xlu1 %4200 }
 0xeee   :  { %v3801_v50 = vpack.c.bf16 %v3793_v23, %v3793_v23  ;;  %v4235_v23 = vpop.permute.xlu0 %4234 }
 0xef0   :  { %5561 = vmatmul.mubr.msk.bf16.vlgmr.msra.gmra.mrb[132].mxu0 %vm1138_vm6, %v3801_v50  ;;  %v4205_v20 = vpop.permute.xlu1 %4204 }
 0xef4   :  { %v4209_v51 = vpop.permute.xlu1 %4208 }
 0xef8   :  { %v4229_v49 = vpop.permute.xlu1 %4228 }
 0xefc   :  { %v4233_v62 = vpop.permute.xlu1 %4232 }
 0xf00   :  { %v4237_v50 = vpop.permute.xlu1 %4236 }
 0xf49   :  { %v3844_v10 = vpop.f32.mrb[108].mxu1 }
 0xf4a   :  { %4258 = vrot.lane.b32.xlu0 %v3844_v10, %s6248_s6  ;;  %v5520_v31 = vpop.f32.mrb[109].mxu1  ;;  %v4239_v10 = vpop.permute.xlu0 %4238 }
 0xf4b   :  { %v3847_v27 = vpop.f32.mrb[110].mxu1  ;;  %v4241_v31 = vpop.permute.xlu1 %4240 }
 0xf4c   :  { %v5521_v22 = vpop.f32.mrb[111].mxu1 }
 0xf4d   :  { %v4282_v22 = vsel %vm641_vm3, %v6979_v6, %v4195_v5  ;;  %v4285_v6 = vsel %vm641_vm3, %v6987_v30, %v4201_v11  ;;  %v4287_v30 = vsel %vm641_vm3, %v6991_v21, %v4205_v20  ;;  %v5005_v11 = vld [vmem:[#allocation16] ss:$0 sm:$0xff] }
 0xf51   :  { %v3940_v33 = vpop.f32.mrb[112].mxu1 }
 0xf52   :  { %4262 = vrot.lane.b32.xlu0 %v3940_v33, %s6248_s6  ;;  %v5532_v60 = vpop.f32.mrb[113].mxu1  ;;  %v4283_v33 = vsel %vm641_vm3, %v6981_v12, %v4197_v46  ;;  %v4294_v12 = vsel %vm4290_vm7, %v4285_v6, %v4233_v62 }
 0xf53   :  { %v3943_v1 = vpop.f32.mrb[114].mxu1  ;;  %v4291_v60 = vsel %vm4290_vm7, %v4282_v22, %v4227_v16 }
 0xf54   :  { %v5533_v54 = vpop.f32.mrb[115].mxu1  ;;  %v4292_v1 = vsel %vm4290_vm7, %v4283_v33, %v4229_v49 }
 0xf7a   :  { %v3892_v18 = vpop.f32.mrb[120].mxu0 }
 0xf7b   :  { %4260 = vrot.lane.b32.xlu1 %v3892_v18, %s6248_s6  ;;  %v5526_v29 = vpop.f32.mrb[121].mxu0 }
 0xf7c   :  { %v3895_v24 = vpop.f32.mrb[122].mxu0 }
 0xf7d   :  { %v5527_v19 = vpop.f32.mrb[123].mxu0 }
 0xf86   :  { %v4036_v59 = vpop.f32.mrb[116].mxu1 }
 0xf87   :  { %4266 = vrot.lane.b32.xlu0 %v4036_v59, %s6248_s6  ;;  %v5544_v17 = vpop.f32.mrb[117].mxu1  ;;  %v4284_v59 = vsel %vm641_vm3, %v6983_v14, %v4199_v40  ;;  %v4286_v14 = vsel %vm641_vm3, %v6985_v32, %v4203_v15  ;;  %v4289_v32 = vsel %vm641_vm3, %v6998_v7, %v4209_v51 }
 0xf88   :  { %v4039_v61 = vpop.f32.mrb[118].mxu1  ;;  %v4293_v17 = vsel %vm4290_vm7, %v4284_v59, %v4231_v37  ;;  %v4295_v8 = vsel %vm4290_vm7, %v4286_v14, %v4235_v23  ;;  %v4298_v21 = vsel %vm4290_vm7, %v4289_v32, %v4241_v31 }
 0xf89   :  { %v5545_v63 = vpop.f32.mrb[119].mxu1 }
 0xf8e   :  { %v4132_v56 = vpop.f32.mrb[120].mxu1 }
 0xf8f   :  { %4270 = vrot.lane.b32.xlu0 %v4132_v56, %s6248_s6  ;;  %v5556_v35 = vpop.f32.mrb[121].mxu1 }
 0xf90   :  { %v4135_v43 = vpop.f32.mrb[122].mxu1 }
 0xf91   :  { %v5557_v42 = vpop.f32.mrb[123].mxu1 }
 0xfaf   :  { %v3988_v55 = vpop.f32.mrb[124].mxu0 }
 0xfb0   :  { %4264 = vrot.lane.b32.xlu1 %v3988_v55, %s6248_s6  ;;  %v5538_v47 = vpop.f32.mrb[125].mxu0  ;;  %v4296_v55 = vsel %vm4290_vm7, %v4287_v30, %v4237_v50 }
 0xfb1   :  { %v3991_v58 = vpop.f32.mrb[126].mxu0 }
 0xfb2   :  { %v5539_v26 = vpop.f32.mrb[127].mxu0 }
 0xfb7   :  { %v4084_v48 = vpop.f32.mrb[128].mxu0 }
 0xfb8   :  { %4268 = vrot.lane.b32.xlu1 %v4084_v48, %s6248_s6  ;;  %v5550_v28 = vpop.f32.mrb[129].mxu0 }
 0xfb9   :  { %v4087_v41 = vpop.f32.mrb[130].mxu0  ;;  %v4288_v28 = vsel %vm641_vm3, %v6989_v2, %v4207_v9 }
 0xfba   :  { %v5551_v13 = vpop.f32.mrb[131].mxu0  ;;  %v4297_v41 = vsel %vm4290_vm7, %v4288_v28, %v4239_v10 }
 0xfbc   :  { %v4259_v27 = vpop.permute.xlu0 %4258 }
 0xfbd   :  { %v4300_v18 = vsel %vm4299_vm8, %v4291_v60, %v4259_v27 }
 0xfc3   :  { %v4180_v0 = vpop.f32.mrb[132].mxu0 }
 0xfc4   :  { %4272 = vrot.lane.b32.xlu1 %v4180_v0, %s6248_s6  ;;  %v5562_v52 = vpop.f32.mrb[133].mxu0  ;;  %v4263_v19 = vpop.permute.xlu0 %4262 }
 0xfc5   :  { %v4183_v38 = vpop.f32.mrb[134].mxu0  ;;  %v4302_v63 = vsel %vm4299_vm8, %v4293_v17, %v4263_v19 }
 0xfc6   :  { %v5563_v3 = vpop.f32.mrb[135].mxu0 }
 0xfed   :  { %v4261_v54 = vpop.permute.xlu1 %4260 }
 0xfee   :  { %v4301_v29 = vsel %vm4299_vm8, %v4292_v1, %v4261_v54 }
 0xfef   :  { %v4320_v24 = vcombine.low %v4300_v18, %v4301_v29 }
 0xff9   :  { %v4267_v42 = vpop.permute.xlu0 %4266 }
 0xffa   :  { %v4304_v58 = vsel %vm4299_vm8, %v4295_v8, %v4267_v42 }
0x1001   :  { %v4271_v4 = vpop.permute.xlu0 %4270 }
0x1002   :  { %v4306_v5 = vsel %vm4299_vm8, %v4297_v41, %v4271_v4 }
0x1022   :  { %v4265_v61 = vpop.permute.xlu1 %4264 }
0x1023   :  { %v4303_v56 = vsel %vm4299_vm8, %v4294_v12, %v4265_v61 }
0x1024   :  { %v4321_v35 = vcombine.low %v4302_v63, %v4303_v56 }
0x1026   :  { %v4328_v43 = vpack.c.bf16 %v4321_v35, %v4320_v24 }
0x1028   :  { %5568 = vmatprep.mubr.msk.bf16.mxu1 %vm547_vm1, %v4328_v43 }
0x102a   :  { %v4269_v47 = vpop.permute.xlu1 %4268 }
0x102b   :  { %v4305_v26 = vsel %vm4299_vm8, %v4296_v55, %v4269_v47 }
0x102c   :  { %v4322_v48 = vcombine.low %v4304_v58, %v4305_v26 }
0x1036   :  { %v4273_v13 = vpop.permute.xlu1 %4272 }
0x1037   :  { %v4307_v46 = vsel %vm4299_vm8, %v4298_v21, %v4273_v13 }
0x1038   :  { %v4323_v40 = vcombine.low %v4306_v5, %v4307_v46 }
0x103a   :  { %v4329_v0 = vpack.c.bf16 %v4323_v40, %v4322_v48 }
0x103c   :  { %5569 = vmatmul.mubr.msk.bf16.vlgmr.msra.gmra.mrb[124].mxu1 %vm547_vm1, %v4329_v0 }
0x110f   :  { %v5570_v52 = vpop.f32.mrb[124].mxu1 }
0x1110   :  { %v4403_v38 = vcombine.high %v5570_v52, %v5570_v52  ;;  %v4413_v2 = vadd.f32 %v5570_v52, %v6614_v45  ;;  %v4382_v3 = vpop.f32.mrb[125].mxu1 }
0x1111   :  { %v4401_v7 = vcombine.high %v4382_v3, %v4382_v3  ;;  %v4409_v15 = vadd.f32 %v4382_v3, %v6595_v25  ;;  %v5571_v20 = vpop.f32.mrb[126].mxu1 }
0x1112   :  { %v4414_v9 = vadd.f32 %v4403_v38, %v6621_v53  ;;  %v7598_v51 = vadd.f32 %v5005_v11, %v4413_v2  ;;  %v4404_v16 = vcombine.high %v5571_v20, %v5571_v20  ;;  %v4385_v49 = vpop.f32.mrb[127].mxu1 }
0x1113   :  { %v4410_v37 = vadd.f32 %v4401_v7, %v6601_v34  ;;  %v7601_v62 = vadd.f32 %v5005_v11, %v4409_v15  ;;  %v4402_v50 = vcombine.high %v4385_v49, %v4385_v49  ;;  %v4411_v45 = vadd.f32 %v4385_v49, %v6604_v36  ;;  %v5638_v49 = vld [vmem:[#allocation20 + $0x8] sm:$0xff]  }
0x1114   :  { %v7603_v23 = vadd.f32 %v5005_v11, %v4414_v9  ;;  %v4446_v10 = vsel %vm245_vm0, %v7598_v51, 0.0  ;;  %v4416_v53 = vadd.f32 %v4404_v16, %v6630_v57  ;;  %v4415_v57 = vadd.f32 %v5571_v20, %v6624_v39  ;;  %v5637_v16 = vld [vmem:[#allocation20] sm:$0xff]  }
0x1115   :  { %4447 = vadd.xlane.f32.xlu0 %v4446_v10  ;;  %v7608_v25 = vadd.f32 %v5005_v11, %v4410_v37  ;;  %v4412_v34 = vadd.f32 %v4402_v50, %v6611_v44  ;;  %v7614_v27 = vadd.f32 %v5005_v11, %v4411_v45  ;;  %v4434_v22 = vsel %vm245_vm0, %v7601_v62, 0.0  ;;  %5572 = vmatprep.subr.bf16.mxu0 %v5637_v16  ;;  %v5639_v37 = vld [vmem:[#allocation23] sm:$0xff]  }
0x1116   :  { %v4449_v31 = vsel %vm245_vm0, %v7603_v23, 0.0  ;;  %v7618_v36 = vadd.f32 %v5005_v11, %v4416_v53  ;;  %v7629_v54 = vadd.f32 %v5005_v11, %v4415_v57  ;;  %5573 = vmatpush3.bf16.msra.mxu0 %v5637_v16  ;;  %5580 = vmatprep.subr.bf16.mxu1 %v5639_v37 }
0x1117   :  { %4450 = vadd.xlane.f32.xlu1 %v4449_v31  ;;  %v4437_v33 = vsel %vm245_vm0, %v7608_v25, 0.0  ;;  %v7623_v60 = vadd.f32 %v5005_v11, %v4412_v34  ;;  %v4440_v1 = vsel %vm245_vm0, %v7614_v27, 0.0  ;;  %5574 = vmatprep.subr.bf16.mxu0 %v5638_v49 }
0x1118   :  { %v4455_v44 = vsel %vm245_vm0, %v7618_v36, 0.0  ;;  %v4452_v29 = vsel %vm245_vm0, %v7629_v54, 0.0  ;;  %5581 = vmatpush3.bf16.msra.mxu1 %v5639_v37 }
0x1119   :  { %4435 = vadd.xlane.f32.xlu0 %v4434_v22  ;;  %v4443_v18 = vsel %vm245_vm0, %v7623_v60, 0.0 }
0x111a   :  { %5575 = vmatpush3.bf16.msra.mxu0 %v5638_v49 }
0x111b   :  { %4438 = vadd.xlane.f32.xlu1 %v4437_v33 }
0x111d   :  { %4441 = vadd.xlane.f32.xlu0 %v4440_v1 }
0x111f   :  { %4456 = vadd.xlane.f32.xlu1 %v4455_v44 }
0x1121   :  { %4444 = vadd.xlane.f32.xlu0 %v4443_v18 }
0x1125   :  { %4453 = vadd.xlane.f32.xlu0 %v4452_v29 }
0x11a2   :  { %v4448_v39 = vpop.xlane.xlu0 %4447 }
0x11a3   :  { %v4462_v24 = vmul.f32 0.03125, %v4448_v39 }
0x11a4   :  { %v4451_v19 = vpop.xlane.xlu1 %4450 }
0x11a5   :  { %v7636_v59 = vsub.f32 %v7598_v51, %v4462_v24  ;;  %v4463_v6 = vmul.f32 0.03125, %v4451_v19 }
0x11a6   :  { %v4436_v17 = vpop.xlane.xlu0 %4435 }
0x11a7   :  { %v7639_v12 = vsub.f32 %v7603_v23, %v4463_v6  ;;  %v4458_v61 = vmul.f32 0.03125, %v4436_v17  ;;  %v4478_v63 = vmul.f32 %v7636_v59, %v7636_v59 }
0x11a8   :  { %v4439_v56 = vpop.xlane.xlu1 %4438 }
0x11a9   :  { %v7644_v35 = vsub.f32 %v7601_v62, %v4458_v61  ;;  %v4459_v43 = vmul.f32 0.03125, %v4439_v56  ;;  %v4494_v42 = vsel %vm245_vm0, %v4478_v63, 0.0  ;;  %v4479_v14 = vmul.f32 %v7639_v12, %v7639_v12 }
0x11aa   :  { %v4442_v30 = vpop.xlane.xlu0 %4441  ;;  %4495 = vadd.xlane.f32.xlu0 %v4494_v42 }
0x11ab   :  { %v7650_v8 = vsub.f32 %v7608_v25, %v4459_v43  ;;  %v4460_v55 = vmul.f32 0.03125, %v4442_v30  ;;  %v4497_v47 = vsel %vm245_vm0, %v4479_v14, 0.0  ;;  %v4474_v58 = vmul.f32 %v7644_v35, %v7644_v35 }
0x11ac   :  { %4498 = vadd.xlane.f32.xlu1 %v4497_v47  ;;  %v4457_v26 = vpop.xlane.xlu1 %4456 }
0x11ad   :  { %v7656_v48 = vsub.f32 %v7614_v27, %v4460_v55  ;;  %v4465_v4 = vmul.f32 0.03125, %v4457_v26  ;;  %v4482_v28 = vsel %vm245_vm0, %v4474_v58, 0.0  ;;  %v4475_v32 = vmul.f32 %v7650_v8, %v7650_v8 }
0x11ae   :  { %4483 = vadd.xlane.f32.xlu0 %v4482_v28  ;;  %v4445_v41 = vpop.xlane.xlu0 %4444 }
0x11af   :  { %v4461_v21 = vmul.f32 0.03125, %v4445_v41  ;;  %v4485_v13 = vsel %vm245_vm0, %v4475_v32, 0.0  ;;  %v4476_v5 = vmul.f32 %v7656_v48, %v7656_v48  ;;  %v7665_v46 = vsub.f32 %v7618_v36, %v4465_v4  ;;  %v5006_v32 = vld [vmem:[#allocation17] ss:$0 sm:$0xff] }
0x11b0   :  { %4486 = vadd.xlane.f32.xlu1 %v4485_v13 }
0x11b1   :  { %v7668_v40 = vsub.f32 %v7623_v60, %v4461_v21  ;;  %v4488_v0 = vsel %vm245_vm0, %v4476_v5, 0.0  ;;  %v4481_v7 = vmul.f32 %v7665_v46, %v7665_v46 }
0x11b2   :  { %4489 = vadd.xlane.f32.xlu0 %v4488_v0  ;;  %v4454_v52 = vpop.xlane.xlu0 %4453 }
0x11b3   :  { %v4464_v11 = vmul.f32 0.03125, %v4454_v52  ;;  %v4477_v38 = vmul.f32 %v7668_v40, %v7668_v40  ;;  %v4503_v20 = vsel %vm245_vm0, %v4481_v7, 0.0 }
0x11b5   :  { %v7674_v2 = vsub.f32 %v7629_v54, %v4464_v11  ;;  %v4491_v3 = vsel %vm245_vm0, %v4477_v38, 0.0 }
0x11b6   :  { %4492 = vadd.xlane.f32.xlu1 %v4491_v3 }
0x11b7   :  { %v4480_v15 = vmul.f32 %v7674_v2, %v7674_v2 }
0x11b9   :  { %v4500_v9 = vsel %vm245_vm0, %v4480_v15, 0.0 }
0x11ba   :  { %4504 = vadd.xlane.f32.xlu1 %v4503_v20  ;;  %4501 = vadd.xlane.f32.xlu0 %v4500_v9 }
0x1237   :  { %v4496_v50 = vpop.xlane.xlu0 %4495 }
0x1238   :  { %v4510_v57 = vmul.f32 0.03125, %v4496_v50 }
0x1239   :  { %v4499_v45 = vpop.xlane.xlu1 %4498 }
0x123a   :  { %v4511_v31 = vmul.f32 0.03125, %v4499_v45  ;;  %v4518_v24 = vadd.f32 1e-05, %v4510_v57 }
0x123b   :  { %v4484_v10 = vpop.xlane.xlu0 %4483 }
0x123c   :  { %v4506_v53 = vmul.f32 0.03125, %v4484_v10  ;;  %v4519_v29 = vadd.f32 1e-05, %v4511_v31 }
0x123d   :  { %v4487_v34 = vpop.xlane.xlu1 %4486 }
0x123e   :  { %v4514_v22 = vadd.f32 1e-05, %v4506_v53  ;;  %v4507_v33 = vmul.f32 0.03125, %v4487_v34 }
0x123f   :  { %v4490_v1 = vpop.xlane.xlu0 %4489 }
0x1240   :  { %v4515_v44 = vadd.f32 1e-05, %v4507_v33  ;;  %v4508_v18 = vmul.f32 0.03125, %v4490_v1  ;;  %5807 = vrsqrt.f32 %v4514_v22  ;;  %v5640_v1 = vld [vmem:[#allocation23 + $0x8] sm:$0xff]  }
0x1241   :  { %5582 = vmatprep.subr.bf16.mxu1 %v5640_v1 }
0x1242   :  { %5809 = vrsqrt.f32 %v4515_v44  ;;  %v4516_v39 = vadd.f32 1e-05, %v4508_v18  ;;  %5583 = vmatpush3.bf16.msra.mxu1 %v5640_v1  ;;  %v5642_v44 = vld [vmem:[#allocation23 + $0x18] sm:$0xff]   ;;  %v5643_v18 = vld [vmem:[#allocation23 + $0x20] sm:$0xff]  }
0x1243   :  { %v4493_v19 = vpop.xlane.xlu1 %4492 }
0x1244   :  { %5811 = vrsqrt.f32 %v4516_v39  ;;  %v4509_v6 = vmul.f32 0.03125, %v4493_v19  ;;  %v5645_v39 = vld [vmem:[#allocation23 + $0x30] sm:$0xff]   ;;  %v5012_v19 = vld [vmem:[#allocation22] ss:$0 sm:$0xff] }
0x1245   :  { %5813 = vrsqrt.f32 %v4519_v29  ;;  %v5644_v29 = vld [vmem:[#allocation23 + $0x28] sm:$0xff]  }
0x1246   :  { %v4517_v17 = vadd.f32 1e-05, %v4509_v6  ;;  %5815 = vrsqrt.f32 %v4518_v24  ;;  %v5646_v24 = vld [vmem:[#allocation23 + $0x38] sm:$0xff]  }
0x1247   :  { %v4505_v61 = vpop.xlane.xlu1 %4504  ;;  %v4502_v63 = vpop.xlane.xlu0 %4501 }
0x1248   :  { %5817 = vrsqrt.f32 %v4517_v17  ;;  %v4513_v56 = vmul.f32 0.03125, %v4505_v61  ;;  %v4512_v43 = vmul.f32 0.03125, %v4502_v63 }
0x124a   :  { %v4521_v42 = vadd.f32 1e-05, %v4513_v56  ;;  %v4520_v14 = vadd.f32 1e-05, %v4512_v43  ;;  %v5808_v30 = vpop.eup %5807 }
0x124b   :  { %v4530_v4 = vmul.f32 %v5808_v30, %v7644_v35 }
0x124c   :  { %v5810_v55 = vpop.eup %5809  ;;  %5819 = vrsqrt.f32 %v4521_v42 }
0x124d   :  { %v4531_v47 = vmul.f32 %v5810_v55, %v7650_v8  ;;  %5821 = vrsqrt.f32 %v4520_v14  ;;  %v4544_v52 = vmul.f32 %v5006_v32, %v4530_v4  ;;  %v5007_v8 = vld [vmem:[#allocation19] ss:$0 sm:$0xff] }
0x124e   :  { %v5812_v58 = vpop.eup %5811 }
0x124f   :  { %v5814_v26 = vpop.eup %5813  ;;  %v4532_v28 = vmul.f32 %v5812_v58, %v7656_v48  ;;  %v4545_v21 = vmul.f32 %v5006_v32, %v4531_v47  ;;  %v4558_v9 = vadd.f32 %v5007_v8, %v4544_v52 }
0x1250   :  { %v5816_v41 = vpop.eup %5815  ;;  %v4535_v5 = vmul.f32 %v5814_v26, %v7639_v12 }
0x1251   :  { %v4546_v11 = vmul.f32 %v5006_v32, %v4532_v28  ;;  %v4534_v38 = vmul.f32 %v5816_v41, %v7636_v59  ;;  %v4559_v7 = vadd.f32 %v5007_v8, %v4545_v21 }
0x1252   :  { %v5818_v13 = vpop.eup %5817  ;;  %v4549_v20 = vmul.f32 %v5006_v32, %v4535_v5 }
0x1253   :  { %v4533_v0 = vmul.f32 %v5818_v13, %v7668_v40  ;;  %v4560_v16 = vadd.f32 %v5007_v8, %v4546_v11  ;;  %v4548_v37 = vmul.f32 %v5006_v32, %v4534_v38  ;;  %v4578_v40 = vcombine.low %v4558_v9, %v4559_v7 }
0x1254   :  { %v4563_v53 = vadd.f32 %v5007_v8, %v4549_v20 }
0x1255   :  { %v4547_v3 = vmul.f32 %v5006_v32, %v4533_v0  ;;  %v4562_v22 = vadd.f32 %v5007_v8, %v4548_v37 }
0x1256   :  { %v5820_v15 = vpop.eup %5819 }
0x1257   :  { %v5822_v35 = vpop.eup %5821  ;;  %v4537_v48 = vmul.f32 %v5820_v15, %v7665_v46  ;;  %v4561_v49 = vadd.f32 %v5007_v8, %v4547_v3  ;;  %v4580_v33 = vcombine.low %v4562_v22, %v4563_v53 }
0x1258   :  { %v4536_v12 = vmul.f32 %v5822_v35, %v7674_v2  ;;  %v5641_v2 = vld [vmem:[#allocation23 + $0x10] sm:$0xff]  }
0x1259   :  { %v4551_v50 = vmul.f32 %v5006_v32, %v4537_v48  ;;  %v4579_v45 = vcombine.low %v4560_v16, %v4561_v49  ;;  %5584 = vmatprep.subr.bf16.mxu1 %v5641_v2 }
0x125a   :  { %v4550_v10 = vmul.f32 %v5006_v32, %v4536_v12  ;;  %5585 = vmatpush3.bf16.msra.mxu1 %v5641_v2 }
0x125b   :  { %v4565_v59 = vadd.f32 %v5007_v8, %v4551_v50  ;;  %v4586_v31 = vpack.c.bf16 %v4579_v45, %v4578_v40  ;;  %5586 = vmatprep.subr.bf16.mxu1 %v5642_v44 }
0x125c   :  { %v4564_v34 = vadd.f32 %v5007_v8, %v4550_v10 }
0x125d   :  { %5576 = vmatprep.mubr.msk.bf16.mxu0 %vm547_vm1, %v4586_v31 }
0x125e   :  { %v4581_v57 = vcombine.low %v4564_v34, %v4565_v59  ;;  %5587 = vmatpush3.bf16.msra.mxu1 %v5642_v44 }
0x125f   :  { %5588 = vmatprep.subr.bf16.mxu1 %v5643_v18 }
0x1260   :  { %v4587_v46 = vpack.c.bf16 %v4581_v57, %v4580_v33 }
0x1262   :  { %5577 = vmatmul.mubr.msk.bf16.vlgmr.msra.gmra.mrb[136].mxu0 %vm547_vm1, %v4587_v46  ;;  %5589 = vmatpush3.bf16.msra.mxu1 %v5643_v18 }
0x1263   :  { %5590 = vmatprep.subr.bf16.mxu1 %v5644_v29 }
0x1266   :  { %5591 = vmatpush3.bf16.msra.mxu1 %v5644_v29 }
0x1267   :  { %5592 = vmatprep.subr.bf16.mxu1 %v5645_v39 }
0x126a   :  { %5593 = vmatpush3.bf16.msra.mxu1 %v5645_v39 }
0x126b   :  { %5594 = vmatprep.subr.bf16.mxu1 %v5646_v24 }
0x126e   :  { %5595 = vmatpush3.bf16.msra.mxu1 %v5646_v24 }
0x1335   :  { %v5578_v6 = vpop.f32.mrb[136].mxu0 }
0x1336   :  { %v4661_v17 = vcombine.high %v5578_v6, %v5578_v6  ;;  %v4678_v61 = vadd.f32 %v5578_v6, %v5012_v19  ;;  %v4640_v63 = vpop.f32.mrb[137].mxu0 }
0x1337   :  { %v4659_v56 = vcombine.high %v4640_v63, %v4640_v63  ;;  %v4674_v43 = vadd.f32 %v5012_v19, %v4640_v63  ;;  %v5579_v42 = vpop.f32.mrb[138].mxu0 }
0x1338   :  { %v4679_v14 = vadd.f32 %v5012_v19, %v4661_v17  ;;  %v4694_v30 = vmul.f32 0.70710677, %v4678_v61  ;;  %v4662_v55 = vcombine.high %v5579_v42, %v5579_v42  ;;  %v4643_v47 = vpop.f32.mrb[139].mxu0  ;;  %v4680_v4 = vadd.f32 %v5579_v42, %v5012_v19 }
0x1339   :  { %v4675_v58 = vadd.f32 %v5012_v19, %v4659_v56  ;;  %v4690_v26 = vmul.f32 0.70710677, %v4674_v43  ;;  %v4660_v5 = vcombine.high %v4643_v47, %v4643_v47  ;;  %v4676_v0 = vadd.f32 %v5012_v19, %v4643_v47  ;;  %v5840_v47 = vld [vmem:[#allocation2 + $0x14] sm:$0xf] }
0x133a   :  { %v4695_v28 = vmul.f32 0.70710677, %v4679_v14  ;;  %5823 = verf.f32 %v4694_v30  ;;  %v4681_v32 = vadd.f32 %v5012_v19, %v4662_v55  ;;  %v4696_v21 = vmul.f32 0.70710677, %v4680_v4  ;;  %v5839_v55 = vld [vmem:[#allocation2 + $0x10] sm:$0xf] }
0x133b   :  { %v4691_v41 = vmul.f32 0.70710677, %v4675_v58  ;;  %5825 = verf.f32 %v4690_v26  ;;  %v4677_v52 = vadd.f32 %v5012_v19, %v4660_v5  ;;  %v4692_v11 = vmul.f32 0.70710677, %v4676_v0 }
0x133c   :  { %5827 = verf.f32 %v4695_v28  ;;  %v4697_v13 = vmul.f32 0.70710677, %v4681_v32  ;;  %v4687_v48 = vmul.f32 0.5, %v4679_v14  ;;  %v4686_v49 = vmul.f32 0.5, %v4678_v61  ;;  %v5021_v14 = vld [vmem:[#allocation25] ss:$0 sm:$0xff] }
0x133d   :  { %5829 = verf.f32 %v4691_v41  ;;  %v4693_v38 = vmul.f32 0.70710677, %v4677_v52  ;;  %v4688_v37 = vmul.f32 0.5, %v4680_v4  ;;  %v4689_v45 = vmul.f32 0.5, %v4681_v32  ;;  %v5841_v32 = vld [vmem:[#allocation2] sm:$0xf] }
0x133e   :  { %5831 = verf.f32 %v4696_v21  ;;  %v4683_v59 = vmul.f32 0.5, %v4675_v58  ;;  %v4682_v1 = vmul.f32 0.5, %v4674_v43  ;;  %v4684_v2 = vmul.f32 0.5, %v4676_v0  ;;  %v5842_v21 = vld [vmem:[#allocation2 + $0x4] sm:$0xf] }
0x133f   :  { %5833 = verf.f32 %v4697_v13  ;;  %v4685_v44 = vmul.f32 0.5, %v4677_v52  ;;  %v4884_v43 = vadd.f32 %v5839_v55, %v7598_v51  ;;  %v4885_v58 = vadd.f32 %v5840_v47, %v7603_v23 }
0x1340   :  { %5835 = verf.f32 %v4692_v11  ;;  %v4880_v41 = vadd.f32 %v5841_v32, %v7601_v62  ;;  %v4881_v13 = vadd.f32 %v5842_v21, %v7608_v25  ;;  %v5843_v11 = vld [vmem:[#allocation2 + $0x18] sm:$0xf] }
0x1341   :  { %5837 = verf.f32 %v4693_v38  ;;  %v4886_v38 = vadd.f32 %v5843_v11, %v7629_v54 }
0x1344   :  { %v5824_v8 = vpop.eup %5823 }
0x1345   :  { %v5826_v3 = vpop.eup %5825  ;;  %v4710_v9 = vadd.f32 1.0, %v5824_v8  ;;  %v5844_v8 = vld [vmem:[#allocation2 + $0x8] sm:$0xf] }
0x1346   :  { %v5828_v7 = vpop.eup %5827  ;;  %v4706_v31 = vadd.f32 1.0, %v5826_v3  ;;  %v4882_v51 = vadd.f32 %v5844_v8, %v7614_v27 }
0x1347   :  { %v5830_v15 = vpop.eup %5829  ;;  %v4711_v20 = vadd.f32 1.0, %v5828_v7  ;;  %v4718_v34 = vmul.f32 %v4710_v9, %v4686_v49  ;;  %v5845_v49 = vld [vmem:[#allocation2 + $0x1c] sm:$0xf] }
0x1348   :  { %v5832_v35 = vpop.eup %5831  ;;  %v4707_v40 = vadd.f32 1.0, %v5830_v15  ;;  %v4714_v19 = vmul.f32 %v4706_v31, %v4682_v1 }
0x1349   :  { %v5834_v16 = vpop.eup %5833  ;;  %v4712_v12 = vadd.f32 1.0, %v5832_v35  ;;  %v4719_v50 = vmul.f32 %v4711_v20, %v4687_v48 }
0x134a   :  { %v4713_v10 = vadd.f32 1.0, %v5834_v16  ;;  %v5836_v53 = vpop.eup %5835  ;;  %v4715_v29 = vmul.f32 %v4707_v40, %v4683_v59 }
0x134b   :  { %v4720_v22 = vmul.f32 %v4712_v12, %v4688_v37  ;;  %v4708_v57 = vadd.f32 1.0, %v5836_v53  ;;  %v5838_v46 = vpop.eup %5837  ;;  %v4748_v18 = vcombine.low %v4718_v34, %v4719_v50  ;;  %v4887_v37 = vadd.f32 %v5845_v49, %v7618_v36  ;;  %v5846_v50 = vld [vmem:[#allocation2 + $0xc] sm:$0xf] }
0x134c   :  { %v4721_v33 = vmul.f32 %v4713_v10, %v4689_v45  ;;  %v4709_v24 = vadd.f32 1.0, %v5838_v46  ;;  %v4746_v63 = vcombine.low %v4714_v19, %v4715_v29  ;;  %v4883_v40 = vadd.f32 %v5846_v50, %v7623_v60 }
0x134d   :  { %v4716_v6 = vmul.f32 %v4708_v57, %v4684_v2 }
0x134e   :  { %v4749_v39 = vcombine.low %v4720_v22, %v4721_v33  ;;  %v4717_v17 = vmul.f32 %v4709_v24, %v4685_v44 }
0x1350   :  { %v4755_v61 = vpack.c.bf16 %v4749_v39, %v4748_v18  ;;  %v4747_v56 = vcombine.low %v4716_v6, %v4717_v17 }
0x1352   :  { %v4754_v42 = vpack.c.bf16 %v4747_v56, %v4746_v63 }
0x1354   :  { %5596 = vmatprep.mubr.bf16.mxu1 %v4754_v42 }
0x1355   :  { %5597 = vmatmul.mubr.bf16.vlgmr.msra.gmra.mrb[128].mxu1 %v4755_v61 }
0x1428   :  { %v5598_v30 = vpop.f32.mrb[128].mxu1 }
0x1429   :  { %v4859_v26 = vcombine.high %v5598_v30, %v5598_v30  ;;  %v4876_v4 = vadd.f32 %v5598_v30, %v5021_v14  ;;  %v4838_v28 = vpop.f32.mrb[129].mxu1 }
0x142a   :  { %v4857_v5 = vcombine.high %v4838_v28, %v4838_v28  ;;  %v4872_v0 = vadd.f32 %v5021_v14, %v4838_v28  ;;  %v5599_v52 = vpop.f32.mrb[130].mxu1 }
0x142b   :  { %v4877_v3 = vadd.f32 %v5021_v14, %v4859_v26  ;;  %v4892_v23 = vadd.f32 %v4884_v43, %v4876_v4  ;;  %v4860_v7 = vcombine.high %v5599_v52, %v5599_v52  ;;  %v4878_v15 = vadd.f32 %v5599_v52, %v5021_v14  ;;  %v4841_v20 = vpop.f32.mrb[131].mxu1 }
0x142c   :  { %v4873_v35 = vadd.f32 %v5021_v14, %v4857_v5  ;;  %v4888_v48 = vadd.f32 %v4880_v41, %v4872_v0  ;;  %v4858_v62 = vcombine.high %v4841_v20, %v4841_v20  ;;  %v4874_v9 = vadd.f32 %v5021_v14, %v4841_v20 }
0x142d   :  { %v4893_v16 = vadd.f32 %v4885_v58, %v4877_v3  ;;  %4900 = vst.msk [vmem:[#allocation26 + $0x10] sm:$0xf] %vm245_vm0, %v4892_v23  ;;  %v4879_v25 = vadd.f32 %v5021_v14, %v4860_v7  ;;  %v4894_v54 = vadd.f32 %v4886_v38, %v4878_v15 }
0x142e   :  { %v4889_v27 = vadd.f32 %v4881_v13, %v4873_v35  ;;  %4896 = vst.msk [vmem:[#allocation26] sm:$0xf] %vm245_vm0, %v4888_v48  ;;  %v4875_v12 = vadd.f32 %v5021_v14, %v4858_v62  ;;  %v4890_v45 = vadd.f32 %v4882_v51, %v4874_v9 }
0x142f   :  { %4901 = vst.msk [vmem:[#allocation26 + $0x14] sm:$0xf] %vm245_vm0, %v4893_v16  ;;  %v4895_v10 = vadd.f32 %v4887_v37, %v4879_v25  ;;  %4902 = vst.msk [vmem:[#allocation26 + $0x18] sm:$0xf] %vm245_vm0, %v4894_v54 }
0x1430   :  { %4897 = vst.msk [vmem:[#allocation26 + $0x4] sm:$0xf] %vm245_vm0, %v4889_v27  ;;  %v4891_v53 = vadd.f32 %v4883_v40, %v4875_v12  ;;  %4898 = vst.msk [vmem:[#allocation26 + $0x8] sm:$0xf] %vm245_vm0, %v4890_v45 }
0x1431   :  { %4903 = vst.msk [vmem:[#allocation26 + $0x1c] sm:$0xf] %vm245_vm0, %v4895_v10 }
0x1432   :  { %4899 = vst.msk [vmem:[#allocation26 + $0xc] sm:$0xf] %vm245_vm0, %v4891_v53 }
0x1433   :  { %6188 = shalt.err (!%p6185_p12)
}
0x1434   :  { %s6189_s7 = scalar_lea.hbm %s7739_s15, 512 }
0x1435   :  { %p6190_p13 = scmp.ne.s32.totalorder %s7739_s15, %s6189_s7  ;;  %p6193_p0 = scmp.lt.u32.totalorder %s6189_s7, %s7739_s15 }
0x1437   :  { %p6195_p1 = pnand %p6193_p0, %p6190_p13 }
0x1439   :  { %6198 = shalt.err (!%p6195_p1)
}
0x143a   :  { %4915 = dma.vmem_to_hbm [thread:$0]  %s4910_s11, 512, %s7739_s15, [#allocation4], %s6221_s21, %s6221_s21, %s6222_s27  }
0x143b   :  { %6215 = dma.done.wait [#allocation4], 512  }
0x143c   :  { %6216 = vsyncadd [#allocation4], 4294966784 }
0x143d   :  { %4919 = vsyncpa [#allocation3], 1 }
0x143e   :  { %4920 = vsyncpa [#allocation6], 1 }
0x143f   :  { %4921 = vsyncpa [#allocation9], 1 }
0x1440   :  { %4922 = vsyncpa [#allocation12], 1 }
0x1441   :  { %4923 = vsyncpa [#allocation15], 1 }
0x1442   :  { %4924 = vsyncpa [#allocation18], 1 }
0x1443   :  { %4925 = vsyncpa [#allocation21], 1 }
0x1444   :  { %4926 = vsyncpa [#allocation24], 1 }
0x1445   :  { %4927 = vsyncpa [#allocation4], 1 }

</bundles_post_ra>
